<compile_context>
chip_gen: v7x
topology: tpu7x:2x2x1
jax: 0.10.0
libtpu: 0.0.40
codegen_flags: <defaults>
</compile_context>

<pallas_src>
import functools
import math

import jax
import jax.numpy as jnp
import numpy as np
from jax.experimental import pallas as pl
from jax.experimental.pallas import tpu as pltpu


def _rup(x, m):
    return -(-x // m) * m


def _detect_v7x():
    try:
        kind = jax.devices()[0].device_kind.lower().replace(" ", "")
        return ("v7" in kind) or ("tpu7" in kind)
    except Exception:
        return False


_IS_V7X = _detect_v7x()
_VMEM_LIMIT = (48 if _IS_V7X else 64) * 1024 * 1024


def _compiler_params(dims):
    return pltpu.CompilerParams(dimension_semantics=dims,
                                vmem_limit_bytes=_VMEM_LIMIT)


# ----------------------------------------------------------------------------
# Pallas kernels
# ----------------------------------------------------------------------------

def _double_conv_kernel(x_ref, w1_ref, b1_ref, m_ref, w2_ref, b2_ref, o_ref,
                        *, offs, l1t, tile, wx, cin_p, cout_p, n_tiles,
                        per_tap):
    # x_ref : (1, cin_p, Lx)     bf16  zero-padded flattened input (resident)
    # w1_ref: (cout_p, 9*cin_p)  bf16  folded 3x3 weights of conv1
    # b1_ref: (cout_p, 1)        f32
    # m_ref : (1, L1m)           f32   zero-ring mask between the two convs
    # w2_ref: (Cout, 9*cout_p)   bf16  folded 3x3 weights of conv2
    # b2_ref: (Cout, 1)          f32
    # o_ref : (1, Cout, tile)    bf16  conv2 output tile (lane-dense, 128-mult)
    if n_tiles == 1:
        c0 = 0                                          # static fast path
    else:
        c0 = pl.multiple_of(pl.program_id(1) * tile, 128)

    xw = x_ref[0, :, pl.ds(c0, wx)]                     # (cin_p, wx)   bf16
    m = m_ref[:, pl.ds(c0, l1t)]                        # (1, l1t)      f32

    # conv1: 9 shifted bf16 views; folded K = 9*cin_p on v5e/v6e, or 9
    # per-tap accumulating dots on v7x (MRB accumulates in place).
    if per_tap:
        y1 = None
        for ti, o in enumerate(offs):
            d = jnp.dot(w1_ref[:, ti * cin_p:(ti + 1) * cin_p],
                        xw[:, o:o + l1t], preferred_element_type=jnp.float32)
            y1 = d if y1 is None else y1 + d
    else:
        rhs1 = jnp.concatenate([xw[:, o:o + l1t] for o in offs], axis=0)
        y1 = jnp.dot(w1_ref[...], rhs1, preferred_element_type=jnp.float32)
    y1 = jnp.maximum(y1 + b1_ref[...], 0.0) * m
    y1b = y1.astype(jnp.bfloat16)                       # cast once

    # conv2 on the in-VMEM intermediate (same tap offsets, local coordinates).
    if per_tap:
        y2 = None
        for ti, o in enumerate(offs):
            d = jnp.dot(w2_ref[:, ti * cout_p:(ti + 1) * cout_p],
                        y1b[:, o:o + tile], preferred_element_type=jnp.float32)
            y2 = d if y2 is None else y2 + d
    else:
        rhs2 = jnp.concatenate([y1b[:, o:o + tile] for o in offs], axis=0)
        y2 = jnp.dot(w2_ref[...], rhs2, preferred_element_type=jnp.float32)
    y2 = jnp.maximum(y2 + b2_ref[...], 0.0)
    o_ref[0] = y2.astype(o_ref.dtype)


def _matmul_bias_act_kernel(x_ref, w_ref, b_ref, o_ref, *, act):
    # x_ref: (N, Cin, PT) bf16 ; w_ref: (Cout, Cin) bf16 ; b_ref: (Cout, 1) f32
    # o_ref: (N, Cout, PT)  -- batch folded into the block, lanes = spatial
    n = x_ref.shape[0]
    for i in range(n):
        y = jnp.dot(w_ref[...], x_ref[i], preferred_element_type=jnp.float32)
        y = y + b_ref[...]
        if act == "relu":
            y = jnp.maximum(y, 0.0)
        elif act == "tanh5":
            y = 5.0 * jnp.tanh(y)
        o_ref[i] = y.astype(o_ref.dtype)


def _cbam_kernel(x_ref, m_ref, w1_ref, w2_ref, xout_ref, hl_ref, *, true_p):
    # TODO(synk): the CBAMmax class is not given in the source file; this is a
    # standard CBAM-style channel attention (masked avg+max spatial pooling,
    # shared MLP, sigmoid) collapsed to one channel via a max over the
    # attention-weighted channels.
    # x_ref: (N, C, Pp) bf16 ; m_ref: (N, 1, Pp) f32
    # w1_ref: (hid, C) f32   ; w2_ref: (C, hid) f32
    # xout_ref: (N, 1, Pp) f32 ; hl_ref: (N, C, 2) f32 (col 0 = h, col 1 = logits)
    n = x_ref.shape[0]
    xs, pooled_cols = [], []
    for i in range(n):
        x = x_ref[i].astype(jnp.float32)                      # (C, Pp)
        m = m_ref[i]                                          # (1, Pp)
        xm = x * m
        pooled_cols.append(jnp.sum(xm, axis=1, keepdims=True) * (1.0 / true_p))
        pooled_cols.append(jnp.max(xm, axis=1, keepdims=True))
        xs.append(x)
    pooled = jnp.concatenate(pooled_cols, axis=1)             # (C, 2N)
    hid = jnp.maximum(
        jnp.dot(w1_ref[...], pooled, preferred_element_type=jnp.float32), 0.0)
    outm = jnp.dot(w2_ref[...], hid, preferred_element_type=jnp.float32)
    for i in range(n):
        logits = outm[:, 2 * i:2 * i + 1] + outm[:, 2 * i + 1:2 * i + 2]
        h = jax.nn.sigmoid(logits)                            # (C, 1)
        xout_ref[i] = jnp.max(xs[i] * h, axis=0, keepdims=True)
        hl_ref[i] = jnp.concatenate([h, logits], axis=1)


# ----------------------------------------------------------------------------
# Pallas-backed ops (thin JAX wrappers around pallas_call)
# ----------------------------------------------------------------------------

def double_conv_block(x_nchw, w1, b1, w2, b2, padding):
    """conv3x3 -> ReLU -> conv3x3 -> ReLU fused in one Pallas kernel."""
    N, Cin, H, W = x_nchw.shape
    Cout = w1.shape[0]
    assert w1.shape[1] == Cin

    cin_p = _rup(Cin, 16)       # bf16 sublane tile is 16 rows
    cout_p = _rup(Cout, 16)

    p = 1 if padding else 0
    Hin, Win = H + 4 * p, W + 4 * p              # doubly padded extent
    H1t, W1t = H + 2 * p - 2, W + 2 * p - 2      # true conv1 output spatial
    H2t, W2t = H1t + 2 * p - 2, W1t + 2 * p - 2  # true conv2 output spatial
    R2 = Hin - 4
    L2 = R2 * Win                                # conv2 extended flat length

    L2_128 = _rup(L2, 128)
    TILE = L2_128 if L2_128 <= 2048 else 1024    # lane tile (mult of 128)
    L2r = _rup(L2_128, TILE)
    n_tiles = L2r // TILE
    L1t = TILE + 2 * Win + 2                     # conv1 columns needed per tile
    Wx = TILE + 4 * Win + 4                      # input columns needed per tile
    L1m = _rup(L2r + 2 * Win + 2, 128)           # mask extent (global coords)
    Lx = _rup(L2r + 4 * Win + 4, 128)            # resident flat input extent

    # Pad channels (zeros keep the math identical) and flatten the spatial pad.
    if cin_p != Cin:
        x_nchw = jnp.pad(x_nchw, ((0, 0), (0, cin_p - Cin), (0, 0), (0, 0)))
    xp = jnp.pad(x_nchw, ((0, 0), (0, 0), (2 * p, 2 * p), (2 * p, 2 * p)))
    xp = xp.reshape(N, cin_p, Hin * Win)
    xp = jnp.pad(xp, ((0, 0), (0, 0), (0, Lx - Hin * Win))).astype(jnp.bfloat16)

    # Zero-ring mask: keeps only the true conv1 output pixels so conv2 sees
    # proper zero padding; also zeroes the wide-layout garbage columns.
    q = np.arange(L1m)
    row, col = q // Win, q % Win
    mask_np = ((row >= p) & (row < p + H1t) & (col >= p) & (col < p + W1t))
    mask = jnp.asarray(mask_np.astype(np.float32).reshape(1, L1m))

    w1p = jnp.pad(w1, ((0, cout_p - Cout), (0, cin_p - Cin), (0, 0), (0, 0)))
    w1f = jnp.transpose(w1p, (0, 2, 3, 1)).reshape(cout_p, 9 * cin_p)
    w1f = w1f.astype(jnp.bfloat16)
    b1c = jnp.pad(b1, (0, cout_p - Cout)).reshape(cout_p, 1).astype(jnp.float32)
    w2p = jnp.pad(w2, ((0, 0), (0, cout_p - Cout), (0, 0), (0, 0)))
    w2f = jnp.transpose(w2p, (0, 2, 3, 1)).reshape(Cout, 9 * cout_p)
    w2f = w2f.astype(jnp.bfloat16)
    b2c = b2.reshape(Cout, 1).astype(jnp.float32)

    offs = tuple(ky * Win + kx for ky in range(3) for kx in range(3))

    out = pl.pallas_call(
        functools.partial(_double_conv_kernel, offs=offs, l1t=L1t, tile=TILE,
                          wx=Wx, cin_p=cin_p, cout_p=cout_p, n_tiles=n_tiles,
                          per_tap=_IS_V7X),
        out_shape=jax.ShapeDtypeStruct((N, Cout, L2r), jnp.bfloat16),
        grid=(N, n_tiles),
        in_specs=[
            pl.BlockSpec((1, cin_p, Lx), lambda n, t: (n, 0, 0)),   # resident
            pl.BlockSpec((cout_p, 9 * cin_p), lambda n, t: (0, 0)),
            pl.BlockSpec((cout_p, 1), lambda n, t: (0, 0)),
            pl.BlockSpec((1, L1m), lambda n, t: (0, 0)),
            pl.BlockSpec((Cout, 9 * cout_p), lambda n, t: (0, 0)),
            pl.BlockSpec((Cout, 1), lambda n, t: (0, 0)),
        ],
        out_specs=pl.BlockSpec((1, Cout, TILE), lambda n, t: (n, 0, t)),
        compiler_params=_compiler_params(("parallel", "parallel")),
    )(xp, w1f, b1c, mask, w2f, b2c)

    # TODO(synk): this crop/reshape (and the following pool / pad of the next
    # block) still round-trips HBM via XLA; fusing it into the kernel is the
    # remaining relayout optimization.
    out = out[:, :, :L2].reshape(N, Cout, R2, Win)[:, :, :H2t, :W2t]
    return out


def _matmul_bias_act(x, w, b, act, out_dtype):
    # x: (N, Cin, P) bf16 ; w: (Cout, Cin) bf16 ; b: (Cout, 1) f32
    N, Cin, P = x.shape
    Cout = w.shape[0]
    Pp = _rup(P, 128)
    if Pp <= 2048:
        PT, Ppr = Pp, Pp
    else:
        PT = 2048
        Ppr = _rup(Pp, PT)
    nt = Ppr // PT
    if Ppr != P:
        x = jnp.pad(x, ((0, 0), (0, 0), (0, Ppr - P)))
    out = pl.pallas_call(
        functools.partial(_matmul_bias_act_kernel, act=act),
        out_shape=jax.ShapeDtypeStruct((N, Cout, Ppr), out_dtype),
        grid=(nt,),
        in_specs=[
            pl.BlockSpec((N, Cin, PT), lambda t: (0, 0, t)),
            pl.BlockSpec((Cout, Cin), lambda t: (0, 0)),
            pl.BlockSpec((Cout, 1), lambda t: (0, 0)),
        ],
        out_specs=pl.BlockSpec((N, Cout, PT), lambda t: (0, 0, t)),
        compiler_params=_compiler_params(("parallel",)),
    )(x, w, b)
    return out[:, :, :P]


def upconv2x2(x_nchw, w_t, b):
    # nn.ConvTranspose2d(k=2, s=2); w_t: (Cin, Cout, 2, 2)
    N, Cin, H, W = x_nchw.shape
    Cout = w_t.shape[1]
    wl = jnp.transpose(w_t, (2, 3, 1, 0)).reshape(4 * Cout, Cin).astype(jnp.bfloat16)
    b4 = jnp.tile(b, 4).reshape(4 * Cout, 1).astype(jnp.float32)
    x2 = x_nchw.reshape(N, Cin, H * W).astype(jnp.bfloat16)
    out = _matmul_bias_act(x2, wl, b4, act="none", out_dtype=jnp.bfloat16)
    # TODO(synk): pixel shuffle (dy,dx,co,a,b)->(co,2a+dy,2b+dx) still done by
    # XLA; folding it into the next double_conv's rhs build would remove one
    # activation HBM round trip per decoder level.
    out = out.reshape(N, 2, 2, Cout, H, W)
    out = jnp.transpose(out, (0, 3, 4, 1, 5, 2)).reshape(N, Cout, 2 * H, 2 * W)
    return out


def conv1x1_tanh5(x_nchw, w_t, b):
    # nn.Conv2d(k=1) followed by Tanh; the forward scales by 5.
    N, Cin, H, W = x_nchw.shape
    nclass = w_t.shape[0]
    wl = w_t[:, :, 0, 0].astype(jnp.bfloat16)                  # (nclass, Cin)
    x2 = x_nchw.reshape(N, Cin, H * W).astype(jnp.bfloat16)
    out = _matmul_bias_act(x2, wl, b.reshape(nclass, 1).astype(jnp.float32),
                           act="tanh5", out_dtype=jnp.float32)
    return out.reshape(N, nclass, H, W)


def cbam_max(x_nchw, mask_nchw, w1, w2):
    N, C, H, W = x_nchw.shape
    P = H * W
    Pp = _rup(P, 128)
    hid = w1.shape[0]
    xb = x_nchw.reshape(N, C, P).astype(jnp.bfloat16)
    mb = mask_nchw.reshape(N, 1, P).astype(jnp.float32)
    if Pp != P:
        xb = jnp.pad(xb, ((0, 0), (0, 0), (0, Pp - P)))
        mb = jnp.pad(mb, ((0, 0), (0, 0), (0, Pp - P)))
    xout, hl = pl.pallas_call(
        functools.partial(_cbam_kernel, true_p=P),
        out_shape=(jax.ShapeDtypeStruct((N, 1, Pp), jnp.float32),
                   jax.ShapeDtypeStruct((N, C, 2), jnp.float32)),
        grid=(1,),
        in_specs=[
            pl.BlockSpec((N, C, Pp), lambda i: (0, 0, 0)),
            pl.BlockSpec((N, 1, Pp), lambda i: (0, 0, 0)),
            pl.BlockSpec((hid, C), lambda i: (0, 0)),
            pl.BlockSpec((C, hid), lambda i: (0, 0)),
        ],
        out_specs=(pl.BlockSpec((N, 1, Pp), lambda i: (0, 0, 0)),
                   pl.BlockSpec((N, C, 2), lambda i: (0, 0, 0))),
        compiler_params=_compiler_params(("arbitrary",)),
    )(xb, mb, w1.astype(jnp.float32), w2.astype(jnp.float32))
    xout = xout[:, :, :P].reshape(N, 1, H, W)
    return xout, hl[:, :, 0], hl[:, :, 1]


def max_pool2(x_nchw):
    # Tiny reshape-max; XLA fuses it into the next Pallas block's input prep.
    N, C, H, W = x_nchw.shape
    return x_nchw.reshape(N, C, H // 2, 2, W // 2, 2).max(axis=(3, 5))


def center_crop(layer_nchw, target_hw):
    th, tw = target_hw
    _, _, H, W = layer_nchw.shape
    dy = (H - th) // 2
    dx = (W - tw) // 2
    return layer_nchw[:, :, dy:dy + th, dx:dx + tw]


# ----------------------------------------------------------------------------
# Model: parameter init + forward
# ----------------------------------------------------------------------------

def init_params(key, in_channels, reduction_ratio, n_classes, depth, wf):
    ks = iter(jax.random.split(key, 64))

    def conv_w(cout, cin, kh, kw):
        std = math.sqrt(2.0 / (cout * kh * kw))  # kaiming_normal_, fan_out, relu
        return std * jax.random.normal(next(ks), (cout, cin, kh, kw), jnp.float32)

    params = {}
    hid = max(in_channels // reduction_ratio, 1)
    params["cbam_w1"] = 0.01 * jax.random.normal(next(ks), (hid, in_channels), jnp.float32)
    params["cbam_w2"] = 0.01 * jax.random.normal(next(ks), (in_channels, hid), jnp.float32)

    down = []
    prev = 1
    for i in range(depth):
        cout = 2 ** (wf + i)
        down.append((conv_w(cout, prev, 3, 3), jnp.zeros((cout,), jnp.float32),
                     conv_w(cout, cout, 3, 3), jnp.zeros((cout,), jnp.float32)))
        prev = cout
    params["down"] = down

    up = []
    for i in reversed(range(depth - 1)):
        cout = 2 ** (wf + i)
        std = math.sqrt(2.0 / (prev * 2 * 2))
        uw = std * jax.random.normal(next(ks), (prev, cout, 2, 2), jnp.float32)
        up.append((uw, jnp.zeros((cout,), jnp.float32),
                   conv_w(cout, prev, 3, 3), jnp.zeros((cout,), jnp.float32),
                   conv_w(cout, cout, 3, 3), jnp.zeros((cout,), jnp.float32)))
        prev = cout
    params["up"] = up

    params["last_w"] = conv_w(n_classes, prev, 1, 1)
    params["last_b"] = jnp.zeros((n_classes,), jnp.float32)
    return params


def channel_attn_unet_forward(params, x, x_m, mask, *, depth, padding):
    # x, x_m, mask: NCHW float32 (matching the PyTorch interface)
    x_out, h, ssim_info = cbam_max(x, mask, params["cbam_w1"], params["cbam_w2"])
    x_h = x_out                                   # clone of the CBAM output (N,1,H,W)

    # torch does `x = torch.cat([x, x_m], 1)` here, but the result is never
    # used downstream, so it is skipped (no effect on outputs).

    blocks = []
    cur = x_out.astype(jnp.bfloat16)
    for i in range(depth):
        w1, b1, w2, b2 = params["down"][i]
        cur = double_conv_block(cur, w1, b1, w2, b2, padding)
        if i != depth - 1:
            blocks.append(cur)
            cur = max_pool2(cur)

    for i in range(depth - 1):
        uw, ub, w1, b1, w2, b2 = params["up"][i]
        up = upconv2x2(cur, uw, ub)
        bridge = center_crop(blocks[-i - 1], up.shape[2:])
        cur = jnp.concatenate([up, bridge], axis=1)
        cur = double_conv_block(cur, w1, b1, w2, b2, padding)

    out = conv1x1_tanh5(cur, params["last_w"], params["last_b"])  # includes 5*tanh
    return h, x_h, out, ssim_info


# ----------------------------------------------------------------------------
# main
# ----------------------------------------------------------------------------

if __name__ == "__main__":
    # Small deterministic configuration (UNet hyper-params scaled down):
    N, C_in, H, W = 2, 9, 16, 16
    depth, wf, n_classes = 3, 3, 1
    reduction_ratio = 3
    padding = True

    key = jax.random.PRNGKey(0)
    kx, km, kmask, kp = jax.random.split(key, 4)
    x = jax.random.normal(kx, (N, C_in, H, W), jnp.float32)
    x_m = jax.random.normal(km, (N, 1, H, W), jnp.float32)
    mask = (jax.random.uniform(kmask, (N, 1, H, W)) > 0.5).astype(jnp.float32)

    params = init_params(kp, C_in, reduction_ratio, n_classes, depth, wf)

    fwd = jax.jit(functools.partial(channel_attn_unet_forward,
                                    depth=depth, padding=padding))
    h, x_h, pred, ssim_info = fwd(params, x, x_m, mask)
    jax.block_until_ready((h, x_h, pred, ssim_info))

    assert h.shape == (N, C_in)
    assert x_h.shape == (N, 1, H, W)
    assert pred.shape == (N, n_classes, H, W)
    assert ssim_info.shape == (N, C_in)
    assert bool(jnp.isfinite(pred).all())
    assert bool(jnp.isfinite(h).all())
    print("KERNEL_OK")
</pallas_src>

<mosaic_0001>
module attributes {stable_mosaic.version = 11 : i64} {
  func.func @_cbam_kernel(%arg0: i32, %arg1: memref<2x9x256xbf16, #tpu.memory_space<vmem>>, %arg2: memref<2x1x256xf32, #tpu.memory_space<vmem>>, %arg3: memref<3x9xf32, #tpu.memory_space<vmem>>, %arg4: memref<9x3xf32, #tpu.memory_space<vmem>>, %arg5: memref<2x1x256xf32, #tpu.memory_space<vmem>>, %arg6: memref<2x9x2xf32, #tpu.memory_space<vmem>>) attributes {dimension_semantics = [#tpu.dimension_semantics<arbitrary>], iteration_bounds = array<i64: 1>, scalar_prefetch = 0 : i64, scratch_operands = 0 : i64, tpu.core_type = #tpu.core_type<tc>, window_params = [{pipeline_mode = #tpu.pipeline_mode<synchronous>, transform_indices = @transform_0, window_bounds = array<i64: 2, 9, 256>}, {pipeline_mode = #tpu.pipeline_mode<synchronous>, transform_indices = @transform_1, window_bounds = array<i64: 2, 1, 256>}, {pipeline_mode = #tpu.pipeline_mode<synchronous>, transform_indices = @transform_2, window_bounds = array<i64: 3, 9>}, {pipeline_mode = #tpu.pipeline_mode<synchronous>, transform_indices = @transform_3, window_bounds = array<i64: 9, 3>}, {pipeline_mode = #tpu.pipeline_mode<synchronous>, transform_indices = @transform_4, window_bounds = array<i64: 2, 1, 256>}, {pipeline_mode = #tpu.pipeline_mode<synchronous>, transform_indices = @transform_5, window_bounds = array<i64: 2, 9, 2>}]} {
    %c0 = arith.constant 0 : index
    %c0_0 = arith.constant 0 : index
    %c0_1 = arith.constant 0 : index
    %0 = vector.load %arg1[%c0, %c0_0, %c0_1] : memref<2x9x256xbf16, #tpu.memory_space<vmem>>, vector<1x9x256xbf16>
    %1 = vector.shape_cast %0 : vector<1x9x256xbf16> to vector<9x256xbf16>
    %2 = arith.extf %1 : vector<9x256xbf16> to vector<9x256xf32>
    %c0_2 = arith.constant 0 : index
    %c0_3 = arith.constant 0 : index
    %c0_4 = arith.constant 0 : index
    %3 = vector.load %arg2[%c0_2, %c0_3, %c0_4] : memref<2x1x256xf32, #tpu.memory_space<vmem>>, vector<1x1x256xf32>
    %4 = vector.shape_cast %3 : vector<1x1x256xf32> to vector<1x256xf32>
    %5 = vector.broadcast %4 : vector<1x256xf32> to vector<9x256xf32>
    %6 = arith.mulf %2, %5 : vector<9x256xf32>
    %cst = arith.constant dense<0.000000e+00> : vector<9xf32>
    %7 = vector.multi_reduction <add>, %6, %cst [1] : vector<9x256xf32> to vector<9xf32>
    %8 = vector.shape_cast %7 : vector<9xf32> to vector<9x1xf32>
    %cst_5 = arith.constant 3.906250e-03 : f32
    %9 = vector.broadcast %cst_5 : f32 to vector<9x1xf32>
    %10 = arith.mulf %8, %9 : vector<9x1xf32>
    %cst_6 = arith.constant dense<0xFF800000> : vector<9xf32>
    %11 = vector.multi_reduction <maximumf>, %6, %cst_6 [1] : vector<9x256xf32> to vector<9xf32>
    %12 = vector.shape_cast %11 : vector<9xf32> to vector<9x1xf32>
    %c1 = arith.constant 1 : index
    %c0_7 = arith.constant 0 : index
    %c0_8 = arith.constant 0 : index
    %13 = vector.load %arg1[%c1, %c0_7, %c0_8] : memref<2x9x256xbf16, #tpu.memory_space<vmem>>, vector<1x9x256xbf16>
    %14 = vector.shape_cast %13 : vector<1x9x256xbf16> to vector<9x256xbf16>
    %15 = arith.extf %14 : vector<9x256xbf16> to vector<9x256xf32>
    %c1_9 = arith.constant 1 : index
    %c0_10 = arith.constant 0 : index
    %c0_11 = arith.constant 0 : index
    %16 = vector.load %arg2[%c1_9, %c0_10, %c0_11] : memref<2x1x256xf32, #tpu.memory_space<vmem>>, vector<1x1x256xf32>
    %17 = vector.shape_cast %16 : vector<1x1x256xf32> to vector<1x256xf32>
    %18 = vector.broadcast %17 : vector<1x256xf32> to vector<9x256xf32>
    %19 = arith.mulf %15, %18 : vector<9x256xf32>
    %cst_12 = arith.constant dense<0.000000e+00> : vector<9xf32>
    %20 = vector.multi_reduction <add>, %19, %cst_12 [1] : vector<9x256xf32> to vector<9xf32>
    %21 = vector.shape_cast %20 : vector<9xf32> to vector<9x1xf32>
    %cst_13 = arith.constant 3.906250e-03 : f32
    %22 = vector.broadcast %cst_13 : f32 to vector<9x1xf32>
    %23 = arith.mulf %21, %22 : vector<9x1xf32>
    %cst_14 = arith.constant dense<0xFF800000> : vector<9xf32>
    %24 = vector.multi_reduction <maximumf>, %19, %cst_14 [1] : vector<9x256xf32> to vector<9xf32>
    %25 = vector.shape_cast %24 : vector<9xf32> to vector<9x1xf32>
    %26 = tpu.concatenate %10, %12, %23, %25 in 1 : vector<9x1xf32>, vector<9x1xf32>, vector<9x1xf32>, vector<9x1xf32> -> vector<9x4xf32>
    %c0_15 = arith.constant 0 : index
    %c0_16 = arith.constant 0 : index
    %27 = vector.load %arg3[%c0_15, %c0_16] : memref<3x9xf32, #tpu.memory_space<vmem>>, vector<3x9xf32>
    %cst_17 = arith.constant dense<0.000000e+00> : vector<3x4xf32>
    %28 = tpu.matmul %27, %26, %cst_17 {dimension_numbers = #tpu.dot_dimension_numbers<[1], [0], [0], [1], [0, 0, 1, 1], [], []>} : vector<3x9xf32>, vector<9x4xf32>, vector<3x4xf32> -> vector<3x4xf32>
    %cst_18 = arith.constant 0.000000e+00 : f32
    %29 = vector.broadcast %cst_18 : f32 to vector<3x4xf32>
    %30 = arith.maximumf %28, %29 : vector<3x4xf32>
    %c0_19 = arith.constant 0 : index
    %c0_20 = arith.constant 0 : index
    %31 = vector.load %arg4[%c0_19, %c0_20] : memref<9x3xf32, #tpu.memory_space<vmem>>, vector<9x3xf32>
    %cst_21 = arith.constant dense<0.000000e+00> : vector<9x4xf32>
    %32 = tpu.matmul %31, %30, %cst_21 {dimension_numbers = #tpu.dot_dimension_numbers<[1], [0], [0], [1], [0, 0, 1, 1], [], []>} : vector<9x3xf32>, vector<3x4xf32>, vector<9x4xf32> -> vector<9x4xf32>
    %33 = vector.extract_strided_slice %32 {offsets = [0, 0], sizes = [9, 1], strides = [1, 1]} : vector<9x4xf32> to vector<9x1xf32>
    %34 = vector.extract_strided_slice %32 {offsets = [0, 1], sizes = [9, 1], strides = [1, 1]} : vector<9x4xf32> to vector<9x1xf32>
    %35 = arith.addf %33, %34 : vector<9x1xf32>
    %36 = arith.negf %35 : vector<9x1xf32>
    %37 = math.exp %36 : vector<9x1xf32>
    %cst_22 = arith.constant 1.000000e+00 : f32
    %38 = vector.broadcast %cst_22 : f32 to vector<9x1xf32>
    %39 = arith.addf %38, %37 : vector<9x1xf32>
    %40 = arith.divf %38, %39 : vector<9x1xf32>
    %41 = vector.broadcast %40 : vector<9x1xf32> to vector<9x256xf32>
    %42 = arith.mulf %2, %41 : vector<9x256xf32>
    %cst_23 = arith.constant dense<0xFF800000> : vector<256xf32>
    %43 = vector.multi_reduction <maximumf>, %42, %cst_23 [0] : vector<9x256xf32> to vector<256xf32>
    %44 = vector.shape_cast %43 : vector<256xf32> to vector<1x256xf32>
    %c0_24 = arith.constant 0 : index
    %c0_25 = arith.constant 0 : index
    %c0_26 = arith.constant 0 : index
    %45 = vector.load %arg5[%c0_24, %c0_25, %c0_26] : memref<2x1x256xf32, #tpu.memory_space<vmem>>, vector<1x1x256xf32>
    %46 = vector.shape_cast %45 : vector<1x1x256xf32> to vector<1x256xf32>
    %47 = vector.shape_cast %44 : vector<1x256xf32> to vector<1x1x256xf32>
    tpu.vector_store %arg5[%c0_24, %c0_25, %c0_26], %47 {strides = array<i32>} : memref<2x1x256xf32, #tpu.memory_space<vmem>>, vector<1x1x256xf32>,
    %48 = tpu.concatenate %40, %35 in 1 : vector<9x1xf32>, vector<9x1xf32> -> vector<9x2xf32>
    %c0_27 = arith.constant 0 : index
    %c0_28 = arith.constant 0 : index
    %c0_29 = arith.constant 0 : index
    %49 = vector.load %arg6[%c0_27, %c0_28, %c0_29] : memref<2x9x2xf32, #tpu.memory_space<vmem>>, vector<1x9x2xf32>
    %50 = vector.shape_cast %49 : vector<1x9x2xf32> to vector<9x2xf32>
    %51 = vector.shape_cast %48 : vector<9x2xf32> to vector<1x9x2xf32>
    tpu.vector_store %arg6[%c0_27, %c0_28, %c0_29], %51 {strides = array<i32>} : memref<2x9x2xf32, #tpu.memory_space<vmem>>, vector<1x9x2xf32>,
    %52 = vector.extract_strided_slice %32 {offsets = [0, 2], sizes = [9, 1], strides = [1, 1]} : vector<9x4xf32> to vector<9x1xf32>
    %53 = vector.extract_strided_slice %32 {offsets = [0, 3], sizes = [9, 1], strides = [1, 1]} : vector<9x4xf32> to vector<9x1xf32>
    %54 = arith.addf %52, %53 : vector<9x1xf32>
    %55 = arith.negf %54 : vector<9x1xf32>
    %56 = math.exp %55 : vector<9x1xf32>
    %cst_30 = arith.constant 1.000000e+00 : f32
    %57 = vector.broadcast %cst_30 : f32 to vector<9x1xf32>
    %58 = arith.addf %57, %56 : vector<9x1xf32>
    %59 = arith.divf %57, %58 : vector<9x1xf32>
    %60 = vector.broadcast %59 : vector<9x1xf32> to vector<9x256xf32>
    %61 = arith.mulf %15, %60 : vector<9x256xf32>
    %cst_31 = arith.constant dense<0xFF800000> : vector<256xf32>
    %62 = vector.multi_reduction <maximumf>, %61, %cst_31 [0] : vector<9x256xf32> to vector<256xf32>
    %63 = vector.shape_cast %62 : vector<256xf32> to vector<1x256xf32>
    %c1_32 = arith.constant 1 : index
    %c0_33 = arith.constant 0 : index
    %c0_34 = arith.constant 0 : index
    %64 = vector.load %arg5[%c1_32, %c0_33, %c0_34] : memref<2x1x256xf32, #tpu.memory_space<vmem>>, vector<1x1x256xf32>
    %65 = vector.shape_cast %64 : vector<1x1x256xf32> to vector<1x256xf32>
    %66 = vector.shape_cast %63 : vector<1x256xf32> to vector<1x1x256xf32>
    tpu.vector_store %arg5[%c1_32, %c0_33, %c0_34], %66 {strides = array<i32>} : memref<2x1x256xf32, #tpu.memory_space<vmem>>, vector<1x1x256xf32>,
    %67 = tpu.concatenate %59, %54 in 1 : vector<9x1xf32>, vector<9x1xf32> -> vector<9x2xf32>
    %c1_35 = arith.constant 1 : index
    %c0_36 = arith.constant 0 : index
    %c0_37 = arith.constant 0 : index
    %68 = vector.load %arg6[%c1_35, %c0_36, %c0_37] : memref<2x9x2xf32, #tpu.memory_space<vmem>>, vector<1x9x2xf32>
    %69 = vector.shape_cast %68 : vector<1x9x2xf32> to vector<9x2xf32>
    %70 = vector.shape_cast %67 : vector<9x2xf32> to vector<1x9x2xf32>
    tpu.vector_store %arg6[%c1_35, %c0_36, %c0_37], %70 {strides = array<i32>} : memref<2x9x2xf32, #tpu.memory_space<vmem>>, vector<1x9x2xf32>,
    return
  }
  func.func @transform_0(%arg0: i32) -> (i32, i32, i32) {
    %c0_i32 = arith.constant 0 : i32
    %c0_i32_0 = arith.constant 0 : i32
    %c0_i32_1 = arith.constant 0 : i32
    %c0_i32_2 = arith.constant 0 : i32
    return %c0_i32, %c0_i32_0, %c0_i32_1 : i32, i32, i32
  }
  func.func @transform_1(%arg0: i32) -> (i32, i32, i32) {
    %c0_i32 = arith.constant 0 : i32
    %c0_i32_0 = arith.constant 0 : i32
    %c0_i32_1 = arith.constant 0 : i32
    %c0_i32_2 = arith.constant 0 : i32
    return %c0_i32, %c0_i32_0, %c0_i32_1 : i32, i32, i32
  }
  func.func @transform_2(%arg0: i32) -> (i32, i32) {
    %c0_i32 = arith.constant 0 : i32
    %c0_i32_0 = arith.constant 0 : i32
    %c0_i32_1 = arith.constant 0 : i32
    return %c0_i32, %c0_i32_0 : i32, i32
  }
  func.func @transform_3(%arg0: i32) -> (i32, i32) {
    %c0_i32 = arith.constant 0 : i32
    %c0_i32_0 = arith.constant 0 : i32
    %c0_i32_1 = arith.constant 0 : i32
    return %c0_i32, %c0_i32_0 : i32, i32
  }
  func.func @transform_4(%arg0: i32) -> (i32, i32, i32) {
    %c0_i32 = arith.constant 0 : i32
    %c0_i32_0 = arith.constant 0 : i32
    %c0_i32_1 = arith.constant 0 : i32
    %c0_i32_2 = arith.constant 0 : i32
    return %c0_i32, %c0_i32_0, %c0_i32_1 : i32, i32, i32
  }
  func.func @transform_5(%arg0: i32) -> (i32, i32, i32) {
    %c0_i32 = arith.constant 0 : i32
    %c0_i32_0 = arith.constant 0 : i32
    %c0_i32_1 = arith.constant 0 : i32
    %c0_i32_2 = arith.constant 0 : i32
    return %c0_i32, %c0_i32_0, %c0_i32_1 : i32, i32, i32
  }
}

module attributes {stable_mosaic.version = 11 : i64} {
  func.func @_double_conv_kernel(%arg0: i32, %arg1: i32, %arg2: memref<1x16x512xbf16, #tpu.memory_space<vmem>>, %arg3: memref<16x144xbf16, #tpu.memory_space<vmem>>, %arg4: memref<16x1xf32, #tpu.memory_space<vmem>>, %arg5: memref<1x512xf32, #tpu.memory_space<vmem>>, %arg6: memref<8x144xbf16, #tpu.memory_space<vmem>>, %arg7: memref<8x1xf32, #tpu.memory_space<vmem>>, %arg8: memref<1x8x384xbf16, #tpu.memory_space<vmem>>) attributes {dimension_semantics = [#tpu.dimension_semantics<parallel>, #tpu.dimension_semantics<parallel>], iteration_bounds = array<i64: 2, 1>, scalar_prefetch = 0 : i64, scratch_operands = 0 : i64, tpu.core_type = #tpu.core_type<tc>, window_params = [{transform_indices = @transform_0, window_bounds = array<i64: 1, 16, 512>}, {pipeline_mode = #tpu.pipeline_mode<synchronous>, transform_indices = @transform_1, window_bounds = array<i64: 16, 144>}, {pipeline_mode = #tpu.pipeline_mode<synchronous>, transform_indices = @transform_2, window_bounds = array<i64: 16, 1>}, {pipeline_mode = #tpu.pipeline_mode<synchronous>, transform_indices = @transform_3, window_bounds = array<i64: 1, 512>}, {pipeline_mode = #tpu.pipeline_mode<synchronous>, transform_indices = @transform_4, window_bounds = array<i64: 8, 144>}, {pipeline_mode = #tpu.pipeline_mode<synchronous>, transform_indices = @transform_5, window_bounds = array<i64: 8, 1>}, {transform_indices = @transform_6, window_bounds = array<i64: 1, 8, 384>}]} {
    %c0 = arith.constant 0 : index
    %c0_0 = arith.constant 0 : index
    %c0_1 = arith.constant 0 : index
    %0 = vector.load %arg2[%c0, %c0_0, %c0_1] : memref<1x16x512xbf16, #tpu.memory_space<vmem>>, vector<1x16x468xbf16>
    %1 = vector.shape_cast %0 : vector<1x16x468xbf16> to vector<16x468xbf16>
    %c0_2 = arith.constant 0 : index
    %c0_3 = arith.constant 0 : index
    %2 = vector.load %arg5[%c0_2, %c0_3] : memref<1x512xf32, #tpu.memory_space<vmem>>, vector<1x426xf32>
    %3 = vector.extract_strided_slice %1 {offsets = [0, 0], sizes = [16, 426], strides = [1, 1]} : vector<16x468xbf16> to vector<16x426xbf16>
    %4 = vector.extract_strided_slice %1 {offsets = [0, 1], sizes = [16, 426], strides = [1, 1]} : vector<16x468xbf16> to vector<16x426xbf16>
    %5 = vector.extract_strided_slice %1 {offsets = [0, 2], sizes = [16, 426], strides = [1, 1]} : vector<16x468xbf16> to vector<16x426xbf16>
    %6 = vector.extract_strided_slice %1 {offsets = [0, 20], sizes = [16, 426], strides = [1, 1]} : vector<16x468xbf16> to vector<16x426xbf16>
    %7 = vector.extract_strided_slice %1 {offsets = [0, 21], sizes = [16, 426], strides = [1, 1]} : vector<16x468xbf16> to vector<16x426xbf16>
    %8 = vector.extract_strided_slice %1 {offsets = [0, 22], sizes = [16, 426], strides = [1, 1]} : vector<16x468xbf16> to vector<16x426xbf16>
    %9 = vector.extract_strided_slice %1 {offsets = [0, 40], sizes = [16, 426], strides = [1, 1]} : vector<16x468xbf16> to vector<16x426xbf16>
    %10 = vector.extract_strided_slice %1 {offsets = [0, 41], sizes = [16, 426], strides = [1, 1]} : vector<16x468xbf16> to vector<16x426xbf16>
    %11 = vector.extract_strided_slice %1 {offsets = [0, 42], sizes = [16, 426], strides = [1, 1]} : vector<16x468xbf16> to vector<16x426xbf16>
    %12 = tpu.concatenate %3, %4, %5, %6, %7, %8, %9, %10, %11 in 0 : vector<16x426xbf16>, vector<16x426xbf16>, vector<16x426xbf16>, vector<16x426xbf16>, vector<16x426xbf16>, vector<16x426xbf16>, vector<16x426xbf16>, vector<16x426xbf16>, vector<16x426xbf16> -> vector<144x426xbf16>
    %c0_4 = arith.constant 0 : index
    %c0_5 = arith.constant 0 : index
    %13 = vector.load %arg3[%c0_4, %c0_5] : memref<16x144xbf16, #tpu.memory_space<vmem>>, vector<16x144xbf16>
    %cst = arith.constant dense<0.000000e+00> : vector<16x426xf32>
    %14 = tpu.matmul %13, %12, %cst {dimension_numbers = #tpu.dot_dimension_numbers<[1], [0], [0], [1], [0, 0, 1, 1], [], []>} : vector<16x144xbf16>, vector<144x426xbf16>, vector<16x426xf32> -> vector<16x426xf32>
    %c0_6 = arith.constant 0 : index
    %c0_7 = arith.constant 0 : index
    %15 = vector.load %arg4[%c0_6, %c0_7] : memref<16x1xf32, #tpu.memory_space<vmem>>, vector<16x1xf32>
    %16 = vector.broadcast %15 : vector<16x1xf32> to vector<16x426xf32>
    %17 = arith.addf %14, %16 : vector<16x426xf32>
    %cst_8 = arith.constant 0.000000e+00 : f32
    %18 = vector.broadcast %cst_8 : f32 to vector<16x426xf32>
    %19 = arith.maximumf %17, %18 : vector<16x426xf32>
    %20 = vector.broadcast %2 : vector<1x426xf32> to vector<16x426xf32>
    %21 = arith.mulf %19, %20 : vector<16x426xf32>
    %22 = arith.truncf %21 : vector<16x426xf32> to vector<16x426xbf16>
    %23 = vector.extract_strided_slice %22 {offsets = [0, 0], sizes = [16, 384], strides = [1, 1]} : vector<16x426xbf16> to vector<16x384xbf16>
    %24 = vector.extract_strided_slice %22 {offsets = [0, 1], sizes = [16, 384], strides = [1, 1]} : vector<16x426xbf16> to vector<16x384xbf16>
    %25 = vector.extract_strided_slice %22 {offsets = [0, 2], sizes = [16, 384], strides = [1, 1]} : vector<16x426xbf16> to vector<16x384xbf16>
    %26 = vector.extract_strided_slice %22 {offsets = [0, 20], sizes = [16, 384], strides = [1, 1]} : vector<16x426xbf16> to vector<16x384xbf16>
    %27 = vector.extract_strided_slice %22 {offsets = [0, 21], sizes = [16, 384], strides = [1, 1]} : vector<16x426xbf16> to vector<16x384xbf16>
    %28 = vector.extract_strided_slice %22 {offsets = [0, 22], sizes = [16, 384], strides = [1, 1]} : vector<16x426xbf16> to vector<16x384xbf16>
    %29 = vector.extract_strided_slice %22 {offsets = [0, 40], sizes = [16, 384], strides = [1, 1]} : vector<16x426xbf16> to vector<16x384xbf16>
    %30 = vector.extract_strided_slice %22 {offsets = [0, 41], sizes = [16, 384], strides = [1, 1]} : vector<16x426xbf16> to vector<16x384xbf16>
    %31 = vector.extract_strided_slice %22 {offsets = [0, 42], sizes = [16, 384], strides = [1, 1]} : vector<16x426xbf16> to vector<16x384xbf16>
    %32 = tpu.concatenate %23, %24, %25, %26, %27, %28, %29, %30, %31 in 0 : vector<16x384xbf16>, vector<16x384xbf16>, vector<16x384xbf16>, vector<16x384xbf16>, vector<16x384xbf16>, vector<16x384xbf16>, vector<16x384xbf16>, vector<16x384xbf16>, vector<16x384xbf16> -> vector<144x384xbf16>
    %c0_9 = arith.constant 0 : index
    %c0_10 = arith.constant 0 : index
    %33 = vector.load %arg6[%c0_9, %c0_10] : memref<8x144xbf16, #tpu.memory_space<vmem>>, vector<8x144xbf16>
    %cst_11 = arith.constant dense<0.000000e+00> : vector<8x384xf32>
    %34 = tpu.matmul %33, %32, %cst_11 {dimension_numbers = #tpu.dot_dimension_numbers<[1], [0], [0], [1], [0, 0, 1, 1], [], []>} : vector<8x144xbf16>, vector<144x384xbf16>, vector<8x384xf32> -> vector<8x384xf32>
    %c0_12 = arith.constant 0 : index
    %c0_13 = arith.constant 0 : index
    %35 = vector.load %arg7[%c0_12, %c0_13] : memref<8x1xf32, #tpu.memory_space<vmem>>, vector<8x1xf32>
    %36 = vector.broadcast %35 : vector<8x1xf32> to vector<8x384xf32>
    %37 = arith.addf %34, %36 : vector<8x384xf32>
    %cst_14 = arith.constant 0.000000e+00 : f32
    %38 = vector.broadcast %cst_14 : f32 to vector<8x384xf32>
    %39 = arith.maximumf %37, %38 : vector<8x384xf32>
    %40 = arith.truncf %39 : vector<8x384xf32> to vector<8x384xbf16>
    %c0_15 = arith.constant 0 : index
    %c0_16 = arith.constant 0 : index
    %c0_17 = arith.constant 0 : index
    %41 = vector.load %arg8[%c0_15, %c0_16, %c0_17] : memref<1x8x384xbf16, #tpu.memory_space<vmem>>, vector<1x8x384xbf16>
    %42 = vector.shape_cast %41 : vector<1x8x384xbf16> to vector<8x384xbf16>
    %43 = vector.shape_cast %40 : vector<8x384xbf16> to vector<1x8x384xbf16>
    tpu.vector_store %arg8[%c0_15, %c0_16, %c0_17], %43 {strides = array<i32>} : memref<1x8x384xbf16, #tpu.memory_space<vmem>>, vector<1x8x384xbf16>,
    return
  }
  func.func @transform_0(%arg0: i32, %arg1: i32) -> (i32, i32, i32) {
    %c0_i32 = arith.constant 0 : i32
    %c0_i32_0 = arith.constant 0 : i32
    %c0_i32_1 = arith.constant 0 : i32
    return %arg0, %c0_i32, %c0_i32_0 : i32, i32, i32
  }
  func.func @transform_1(%arg0: i32, %arg1: i32) -> (i32, i32) {
    %c0_i32 = arith.constant 0 : i32
    %c0_i32_0 = arith.constant 0 : i32
    %c0_i32_1 = arith.constant 0 : i32
    return %c0_i32, %c0_i32_0 : i32, i32
  }
  func.func @transform_2(%arg0: i32, %arg1: i32) -> (i32, i32) {
    %c0_i32 = arith.constant 0 : i32
    %c0_i32_0 = arith.constant 0 : i32
    %c0_i32_1 = arith.constant 0 : i32
    return %c0_i32, %c0_i32_0 : i32, i32
  }
  func.func @transform_3(%arg0: i32, %arg1: i32) -> (i32, i32) {
    %c0_i32 = arith.constant 0 : i32
    %c0_i32_0 = arith.constant 0 : i32
    %c0_i32_1 = arith.constant 0 : i32
    return %c0_i32, %c0_i32_0 : i32, i32
  }
  func.func @transform_4(%arg0: i32, %arg1: i32) -> (i32, i32) {
    %c0_i32 = arith.constant 0 : i32
    %c0_i32_0 = arith.constant 0 : i32
    %c0_i32_1 = arith.constant 0 : i32
    return %c0_i32, %c0_i32_0 : i32, i32
  }
  func.func @transform_5(%arg0: i32, %arg1: i32) -> (i32, i32) {
    %c0_i32 = arith.constant 0 : i32
    %c0_i32_0 = arith.constant 0 : i32
    %c0_i32_1 = arith.constant 0 : i32
    return %c0_i32, %c0_i32_0 : i32, i32
  }
  func.func @transform_6(%arg0: i32, %arg1: i32) -> (i32, i32, i32) {
    %c0_i32 = arith.constant 0 : i32
    %c0_i32_0 = arith.constant 0 : i32
    return %arg0, %c0_i32, %arg1 : i32, i32, i32
  }
}

module attributes {stable_mosaic.version = 11 : i64} {
  func.func @_double_conv_kernel(%arg0: i32, %arg1: i32, %arg2: memref<1x16x256xbf16, #tpu.memory_space<vmem>>, %arg3: memref<16x144xbf16, #tpu.memory_space<vmem>>, %arg4: memref<16x1xf32, #tpu.memory_space<vmem>>, %arg5: memref<1x256xf32, #tpu.memory_space<vmem>>, %arg6: memref<16x144xbf16, #tpu.memory_space<vmem>>, %arg7: memref<16x1xf32, #tpu.memory_space<vmem>>, %arg8: memref<1x16x128xbf16, #tpu.memory_space<vmem>>) attributes {dimension_semantics = [#tpu.dimension_semantics<parallel>, #tpu.dimension_semantics<parallel>], iteration_bounds = array<i64: 2, 1>, scalar_prefetch = 0 : i64, scratch_operands = 0 : i64, tpu.core_type = #tpu.core_type<tc>, window_params = [{transform_indices = @transform_0, window_bounds = array<i64: 1, 16, 256>}, {pipeline_mode = #tpu.pipeline_mode<synchronous>, transform_indices = @transform_1, window_bounds = array<i64: 16, 144>}, {pipeline_mode = #tpu.pipeline_mode<synchronous>, transform_indices = @transform_2, window_bounds = array<i64: 16, 1>}, {pipeline_mode = #tpu.pipeline_mode<synchronous>, transform_indices = @transform_3, window_bounds = array<i64: 1, 256>}, {pipeline_mode = #tpu.pipeline_mode<synchronous>, transform_indices = @transform_4, window_bounds = array<i64: 16, 144>}, {pipeline_mode = #tpu.pipeline_mode<synchronous>, transform_indices = @transform_5, window_bounds = array<i64: 16, 1>}, {transform_indices = @transform_6, window_bounds = array<i64: 1, 16, 128>}]} {
    %c0 = arith.constant 0 : index
    %c0_0 = arith.constant 0 : index
    %c0_1 = arith.constant 0 : index
    %0 = vector.load %arg2[%c0, %c0_0, %c0_1] : memref<1x16x256xbf16, #tpu.memory_space<vmem>>, vector<1x16x180xbf16>
    %1 = vector.shape_cast %0 : vector<1x16x180xbf16> to vector<16x180xbf16>
    %c0_2 = arith.constant 0 : index
    %c0_3 = arith.constant 0 : index
    %2 = vector.load %arg5[%c0_2, %c0_3] : memref<1x256xf32, #tpu.memory_space<vmem>>, vector<1x154xf32>
    %3 = vector.extract_strided_slice %1 {offsets = [0, 0], sizes = [16, 154], strides = [1, 1]} : vector<16x180xbf16> to vector<16x154xbf16>
    %4 = vector.extract_strided_slice %1 {offsets = [0, 1], sizes = [16, 154], strides = [1, 1]} : vector<16x180xbf16> to vector<16x154xbf16>
    %5 = vector.extract_strided_slice %1 {offsets = [0, 2], sizes = [16, 154], strides = [1, 1]} : vector<16x180xbf16> to vector<16x154xbf16>
    %6 = vector.extract_strided_slice %1 {offsets = [0, 12], sizes = [16, 154], strides = [1, 1]} : vector<16x180xbf16> to vector<16x154xbf16>
    %7 = vector.extract_strided_slice %1 {offsets = [0, 13], sizes = [16, 154], strides = [1, 1]} : vector<16x180xbf16> to vector<16x154xbf16>
    %8 = vector.extract_strided_slice %1 {offsets = [0, 14], sizes = [16, 154], strides = [1, 1]} : vector<16x180xbf16> to vector<16x154xbf16>
    %9 = vector.extract_strided_slice %1 {offsets = [0, 24], sizes = [16, 154], strides = [1, 1]} : vector<16x180xbf16> to vector<16x154xbf16>
    %10 = vector.extract_strided_slice %1 {offsets = [0, 25], sizes = [16, 154], strides = [1, 1]} : vector<16x180xbf16> to vector<16x154xbf16>
    %11 = vector.extract_strided_slice %1 {offsets = [0, 26], sizes = [16, 154], strides = [1, 1]} : vector<16x180xbf16> to vector<16x154xbf16>
    %12 = tpu.concatenate %3, %4, %5, %6, %7, %8, %9, %10, %11 in 0 : vector<16x154xbf16>, vector<16x154xbf16>, vector<16x154xbf16>, vector<16x154xbf16>, vector<16x154xbf16>, vector<16x154xbf16>, vector<16x154xbf16>, vector<16x154xbf16>, vector<16x154xbf16> -> vector<144x154xbf16>
    %c0_4 = arith.constant 0 : index
    %c0_5 = arith.constant 0 : index
    %13 = vector.load %arg3[%c0_4, %c0_5] : memref<16x144xbf16, #tpu.memory_space<vmem>>, vector<16x144xbf16>
    %cst = arith.constant dense<0.000000e+00> : vector<16x154xf32>
    %14 = tpu.matmul %13, %12, %cst {dimension_numbers = #tpu.dot_dimension_numbers<[1], [0], [0], [1], [0, 0, 1, 1], [], []>} : vector<16x144xbf16>, vector<144x154xbf16>, vector<16x154xf32> -> vector<16x154xf32>
    %c0_6 = arith.constant 0 : index
    %c0_7 = arith.constant 0 : index
    %15 = vector.load %arg4[%c0_6, %c0_7] : memref<16x1xf32, #tpu.memory_space<vmem>>, vector<16x1xf32>
    %16 = vector.broadcast %15 : vector<16x1xf32> to vector<16x154xf32>
    %17 = arith.addf %14, %16 : vector<16x154xf32>
    %cst_8 = arith.constant 0.000000e+00 : f32
    %18 = vector.broadcast %cst_8 : f32 to vector<16x154xf32>
    %19 = arith.maximumf %17, %18 : vector<16x154xf32>
    %20 = vector.broadcast %2 : vector<1x154xf32> to vector<16x154xf32>
    %21 = arith.mulf %19, %20 : vector<16x154xf32>
    %22 = arith.truncf %21 : vector<16x154xf32> to vector<16x154xbf16>
    %23 = vector.extract_strided_slice %22 {offsets = [0, 0], sizes = [16, 128], strides = [1, 1]} : vector<16x154xbf16> to vector<16x128xbf16>
    %24 = vector.extract_strided_slice %22 {offsets = [0, 1], sizes = [16, 128], strides = [1, 1]} : vector<16x154xbf16> to vector<16x128xbf16>
    %25 = vector.extract_strided_slice %22 {offsets = [0, 2], sizes = [16, 128], strides = [1, 1]} : vector<16x154xbf16> to vector<16x128xbf16>
    %26 = vector.extract_strided_slice %22 {offsets = [0, 12], sizes = [16, 128], strides = [1, 1]} : vector<16x154xbf16> to vector<16x128xbf16>
    %27 = vector.extract_strided_slice %22 {offsets = [0, 13], sizes = [16, 128], strides = [1, 1]} : vector<16x154xbf16> to vector<16x128xbf16>
    %28 = vector.extract_strided_slice %22 {offsets = [0, 14], sizes = [16, 128], strides = [1, 1]} : vector<16x154xbf16> to vector<16x128xbf16>
    %29 = vector.extract_strided_slice %22 {offsets = [0, 24], sizes = [16, 128], strides = [1, 1]} : vector<16x154xbf16> to vector<16x128xbf16>
    %30 = vector.extract_strided_slice %22 {offsets = [0, 25], sizes = [16, 128], strides = [1, 1]} : vector<16x154xbf16> to vector<16x128xbf16>
    %31 = vector.extract_strided_slice %22 {offsets = [0, 26], sizes = [16, 128], strides = [1, 1]} : vector<16x154xbf16> to vector<16x128xbf16>
    %32 = tpu.concatenate %23, %24, %25, %26, %27, %28, %29, %30, %31 in 0 : vector<16x128xbf16>, vector<16x128xbf16>, vector<16x128xbf16>, vector<16x128xbf16>, vector<16x128xbf16>, vector<16x128xbf16>, vector<16x128xbf16>, vector<16x128xbf16>, vector<16x128xbf16> -> vector<144x128xbf16>
    %c0_9 = arith.constant 0 : index
    %c0_10 = arith.constant 0 : index
    %33 = vector.load %arg6[%c0_9, %c0_10] : memref<16x144xbf16, #tpu.memory_space<vmem>>, vector<16x144xbf16>
    %cst_11 = arith.constant dense<0.000000e+00> : vector<16x128xf32>
    %34 = tpu.matmul %33, %32, %cst_11 {dimension_numbers = #tpu.dot_dimension_numbers<[1], [0], [0], [1], [0, 0, 1, 1], [], []>} : vector<16x144xbf16>, vector<144x128xbf16>, vector<16x128xf32> -> vector<16x128xf32>
    %c0_12 = arith.constant 0 : index
    %c0_13 = arith.constant 0 : index
    %35 = vector.load %arg7[%c0_12, %c0_13] : memref<16x1xf32, #tpu.memory_space<vmem>>, vector<16x1xf32>
    %36 = vector.broadcast %35 : vector<16x1xf32> to vector<16x128xf32>
    %37 = arith.addf %34, %36 : vector<16x128xf32>
    %cst_14 = arith.constant 0.000000e+00 : f32
    %38 = vector.broadcast %cst_14 : f32 to vector<16x128xf32>
    %39 = arith.maximumf %37, %38 : vector<16x128xf32>
    %40 = arith.truncf %39 : vector<16x128xf32> to vector<16x128xbf16>
    %c0_15 = arith.constant 0 : index
    %c0_16 = arith.constant 0 : index
    %c0_17 = arith.constant 0 : index
    %41 = vector.load %arg8[%c0_15, %c0_16, %c0_17] : memref<1x16x128xbf16, #tpu.memory_space<vmem>>, vector<1x16x128xbf16>
    %42 = vector.shape_cast %41 : vector<1x16x128xbf16> to vector<16x128xbf16>
    %43 = vector.shape_cast %40 : vector<16x128xbf16> to vector<1x16x128xbf16>
    tpu.vector_store %arg8[%c0_15, %c0_16, %c0_17], %43 {strides = array<i32>} : memref<1x16x128xbf16, #tpu.memory_space<vmem>>, vector<1x16x128xbf16>,
    return
  }
  func.func @transform_0(%arg0: i32, %arg1: i32) -> (i32, i32, i32) {
    %c0_i32 = arith.constant 0 : i32
    %c0_i32_0 = arith.constant 0 : i32
    %c0_i32_1 = arith.constant 0 : i32
    return %arg0, %c0_i32, %c0_i32_0 : i32, i32, i32
  }
  func.func @transform_1(%arg0: i32, %arg1: i32) -> (i32, i32) {
    %c0_i32 = arith.constant 0 : i32
    %c0_i32_0 = arith.constant 0 : i32
    %c0_i32_1 = arith.constant 0 : i32
    return %c0_i32, %c0_i32_0 : i32, i32
  }
  func.func @transform_2(%arg0: i32, %arg1: i32) -> (i32, i32) {
    %c0_i32 = arith.constant 0 : i32
    %c0_i32_0 = arith.constant 0 : i32
    %c0_i32_1 = arith.constant 0 : i32
    return %c0_i32, %c0_i32_0 : i32, i32
  }
  func.func @transform_3(%arg0: i32, %arg1: i32) -> (i32, i32) {
    %c0_i32 = arith.constant 0 : i32
    %c0_i32_0 = arith.constant 0 : i32
    %c0_i32_1 = arith.constant 0 : i32
    return %c0_i32, %c0_i32_0 : i32, i32
  }
  func.func @transform_4(%arg0: i32, %arg1: i32) -> (i32, i32) {
    %c0_i32 = arith.constant 0 : i32
    %c0_i32_0 = arith.constant 0 : i32
    %c0_i32_1 = arith.constant 0 : i32
    return %c0_i32, %c0_i32_0 : i32, i32
  }
  func.func @transform_5(%arg0: i32, %arg1: i32) -> (i32, i32) {
    %c0_i32 = arith.constant 0 : i32
    %c0_i32_0 = arith.constant 0 : i32
    %c0_i32_1 = arith.constant 0 : i32
    return %c0_i32, %c0_i32_0 : i32, i32
  }
  func.func @transform_6(%arg0: i32, %arg1: i32) -> (i32, i32, i32) {
    %c0_i32 = arith.constant 0 : i32
    %c0_i32_0 = arith.constant 0 : i32
    return %arg0, %c0_i32, %arg1 : i32, i32, i32
  }
}

module attributes {stable_mosaic.version = 11 : i64} {
  func.func @_double_conv_kernel(%arg0: i32, %arg1: i32, %arg2: memref<1x16x256xbf16, #tpu.memory_space<vmem>>, %arg3: memref<32x144xbf16, #tpu.memory_space<vmem>>, %arg4: memref<32x1xf32, #tpu.memory_space<vmem>>, %arg5: memref<1x256xf32, #tpu.memory_space<vmem>>, %arg6: memref<32x288xbf16, #tpu.memory_space<vmem>>, %arg7: memref<32x1xf32, #tpu.memory_space<vmem>>, %arg8: memref<1x32x128xbf16, #tpu.memory_space<vmem>>) attributes {dimension_semantics = [#tpu.dimension_semantics<parallel>, #tpu.dimension_semantics<parallel>], iteration_bounds = array<i64: 2, 1>, scalar_prefetch = 0 : i64, scratch_operands = 0 : i64, tpu.core_type = #tpu.core_type<tc>, window_params = [{transform_indices = @transform_0, window_bounds = array<i64: 1, 16, 256>}, {pipeline_mode = #tpu.pipeline_mode<synchronous>, transform_indices = @transform_1, window_bounds = array<i64: 32, 144>}, {pipeline_mode = #tpu.pipeline_mode<synchronous>, transform_indices = @transform_2, window_bounds = array<i64: 32, 1>}, {pipeline_mode = #tpu.pipeline_mode<synchronous>, transform_indices = @transform_3, window_bounds = array<i64: 1, 256>}, {pipeline_mode = #tpu.pipeline_mode<synchronous>, transform_indices = @transform_4, window_bounds = array<i64: 32, 288>}, {pipeline_mode = #tpu.pipeline_mode<synchronous>, transform_indices = @transform_5, window_bounds = array<i64: 32, 1>}, {transform_indices = @transform_6, window_bounds = array<i64: 1, 32, 128>}]} {
    %c0 = arith.constant 0 : index
    %c0_0 = arith.constant 0 : index
    %c0_1 = arith.constant 0 : index
    %0 = vector.load %arg2[%c0, %c0_0, %c0_1] : memref<1x16x256xbf16, #tpu.memory_space<vmem>>, vector<1x16x164xbf16>
    %1 = vector.shape_cast %0 : vector<1x16x164xbf16> to vector<16x164xbf16>
    %c0_2 = arith.constant 0 : index
    %c0_3 = arith.constant 0 : index
    %2 = vector.load %arg5[%c0_2, %c0_3] : memref<1x256xf32, #tpu.memory_space<vmem>>, vector<1x146xf32>
    %3 = vector.extract_strided_slice %1 {offsets = [0, 0], sizes = [16, 146], strides = [1, 1]} : vector<16x164xbf16> to vector<16x146xbf16>
    %4 = vector.extract_strided_slice %1 {offsets = [0, 1], sizes = [16, 146], strides = [1, 1]} : vector<16x164xbf16> to vector<16x146xbf16>
    %5 = vector.extract_strided_slice %1 {offsets = [0, 2], sizes = [16, 146], strides = [1, 1]} : vector<16x164xbf16> to vector<16x146xbf16>
    %6 = vector.extract_strided_slice %1 {offsets = [0, 8], sizes = [16, 146], strides = [1, 1]} : vector<16x164xbf16> to vector<16x146xbf16>
    %7 = vector.extract_strided_slice %1 {offsets = [0, 9], sizes = [16, 146], strides = [1, 1]} : vector<16x164xbf16> to vector<16x146xbf16>
    %8 = vector.extract_strided_slice %1 {offsets = [0, 10], sizes = [16, 146], strides = [1, 1]} : vector<16x164xbf16> to vector<16x146xbf16>
    %9 = vector.extract_strided_slice %1 {offsets = [0, 16], sizes = [16, 146], strides = [1, 1]} : vector<16x164xbf16> to vector<16x146xbf16>
    %10 = vector.extract_strided_slice %1 {offsets = [0, 17], sizes = [16, 146], strides = [1, 1]} : vector<16x164xbf16> to vector<16x146xbf16>
    %11 = vector.extract_strided_slice %1 {offsets = [0, 18], sizes = [16, 146], strides = [1, 1]} : vector<16x164xbf16> to vector<16x146xbf16>
    %12 = tpu.concatenate %3, %4, %5, %6, %7, %8, %9, %10, %11 in 0 : vector<16x146xbf16>, vector<16x146xbf16>, vector<16x146xbf16>, vector<16x146xbf16>, vector<16x146xbf16>, vector<16x146xbf16>, vector<16x146xbf16>, vector<16x146xbf16>, vector<16x146xbf16> -> vector<144x146xbf16>
    %c0_4 = arith.constant 0 : index
    %c0_5 = arith.constant 0 : index
    %13 = vector.load %arg3[%c0_4, %c0_5] : memref<32x144xbf16, #tpu.memory_space<vmem>>, vector<32x144xbf16>
    %cst = arith.constant dense<0.000000e+00> : vector<32x146xf32>
    %14 = tpu.matmul %13, %12, %cst {dimension_numbers = #tpu.dot_dimension_numbers<[1], [0], [0], [1], [0, 0, 1, 1], [], []>} : vector<32x144xbf16>, vector<144x146xbf16>, vector<32x146xf32> -> vector<32x146xf32>
    %c0_6 = arith.constant 0 : index
    %c0_7 = arith.constant 0 : index
    %15 = vector.load %arg4[%c0_6, %c0_7] : memref<32x1xf32, #tpu.memory_space<vmem>>, vector<32x1xf32>
    %16 = vector.broadcast %15 : vector<32x1xf32> to vector<32x146xf32>
    %17 = arith.addf %14, %16 : vector<32x146xf32>
    %cst_8 = arith.constant 0.000000e+00 : f32
    %18 = vector.broadcast %cst_8 : f32 to vector<32x146xf32>
    %19 = arith.maximumf %17, %18 : vector<32x146xf32>
    %20 = vector.broadcast %2 : vector<1x146xf32> to vector<32x146xf32>
    %21 = arith.mulf %19, %20 : vector<32x146xf32>
    %22 = arith.truncf %21 : vector<32x146xf32> to vector<32x146xbf16>
    %23 = vector.extract_strided_slice %22 {offsets = [0, 0], sizes = [32, 128], strides = [1, 1]} : vector<32x146xbf16> to vector<32x128xbf16>
    %24 = vector.extract_strided_slice %22 {offsets = [0, 1], sizes = [32, 128], strides = [1, 1]} : vector<32x146xbf16> to vector<32x128xbf16>
    %25 = vector.extract_strided_slice %22 {offsets = [0, 2], sizes = [32, 128], strides = [1, 1]} : vector<32x146xbf16> to vector<32x128xbf16>
    %26 = vector.extract_strided_slice %22 {offsets = [0, 8], sizes = [32, 128], strides = [1, 1]} : vector<32x146xbf16> to vector<32x128xbf16>
    %27 = vector.extract_strided_slice %22 {offsets = [0, 9], sizes = [32, 128], strides = [1, 1]} : vector<32x146xbf16> to vector<32x128xbf16>
    %28 = vector.extract_strided_slice %22 {offsets = [0, 10], sizes = [32, 128], strides = [1, 1]} : vector<32x146xbf16> to vector<32x128xbf16>
    %29 = vector.extract_strided_slice %22 {offsets = [0, 16], sizes = [32, 128], strides = [1, 1]} : vector<32x146xbf16> to vector<32x128xbf16>
    %30 = vector.extract_strided_slice %22 {offsets = [0, 17], sizes = [32, 128], strides = [1, 1]} : vector<32x146xbf16> to vector<32x128xbf16>
    %31 = vector.extract_strided_slice %22 {offsets = [0, 18], sizes = [32, 128], strides = [1, 1]} : vector<32x146xbf16> to vector<32x128xbf16>
    %32 = tpu.concatenate %23, %24, %25, %26, %27, %28, %29, %30, %31 in 0 : vector<32x128xbf16>, vector<32x128xbf16>, vector<32x128xbf16>, vector<32x128xbf16>, vector<32x128xbf16>, vector<32x128xbf16>, vector<32x128xbf16>, vector<32x128xbf16>, vector<32x128xbf16> -> vector<288x128xbf16>
    %c0_9 = arith.constant 0 : index
    %c0_10 = arith.constant 0 : index
    %33 = vector.load %arg6[%c0_9, %c0_10] : memref<32x288xbf16, #tpu.memory_space<vmem>>, vector<32x288xbf16>
    %cst_11 = arith.constant dense<0.000000e+00> : vector<32x128xf32>
    %34 = tpu.matmul %33, %32, %cst_11 {dimension_numbers = #tpu.dot_dimension_numbers<[1], [0], [0], [1], [0, 0, 1, 1], [], []>} : vector<32x288xbf16>, vector<288x128xbf16>, vector<32x128xf32> -> vector<32x128xf32>
    %c0_12 = arith.constant 0 : index
    %c0_13 = arith.constant 0 : index
    %35 = vector.load %arg7[%c0_12, %c0_13] : memref<32x1xf32, #tpu.memory_space<vmem>>, vector<32x1xf32>
    %36 = vector.broadcast %35 : vector<32x1xf32> to vector<32x128xf32>
    %37 = arith.addf %34, %36 : vector<32x128xf32>
    %cst_14 = arith.constant 0.000000e+00 : f32
    %38 = vector.broadcast %cst_14 : f32 to vector<32x128xf32>
    %39 = arith.maximumf %37, %38 : vector<32x128xf32>
    %40 = arith.truncf %39 : vector<32x128xf32> to vector<32x128xbf16>
    %c0_15 = arith.constant 0 : index
    %c0_16 = arith.constant 0 : index
    %c0_17 = arith.constant 0 : index
    %41 = vector.load %arg8[%c0_15, %c0_16, %c0_17] : memref<1x32x128xbf16, #tpu.memory_space<vmem>>, vector<1x32x128xbf16>
    %42 = vector.shape_cast %41 : vector<1x32x128xbf16> to vector<32x128xbf16>
    %43 = vector.shape_cast %40 : vector<32x128xbf16> to vector<1x32x128xbf16>
    tpu.vector_store %arg8[%c0_15, %c0_16, %c0_17], %43 {strides = array<i32>} : memref<1x32x128xbf16, #tpu.memory_space<vmem>>, vector<1x32x128xbf16>,
    return
  }
  func.func @transform_0(%arg0: i32, %arg1: i32) -> (i32, i32, i32) {
    %c0_i32 = arith.constant 0 : i32
    %c0_i32_0 = arith.constant 0 : i32
    %c0_i32_1 = arith.constant 0 : i32
    return %arg0, %c0_i32, %c0_i32_0 : i32, i32, i32
  }
  func.func @transform_1(%arg0: i32, %arg1: i32) -> (i32, i32) {
    %c0_i32 = arith.constant 0 : i32
    %c0_i32_0 = arith.constant 0 : i32
    %c0_i32_1 = arith.constant 0 : i32
    return %c0_i32, %c0_i32_0 : i32, i32
  }
  func.func @transform_2(%arg0: i32, %arg1: i32) -> (i32, i32) {
    %c0_i32 = arith.constant 0 : i32
    %c0_i32_0 = arith.constant 0 : i32
    %c0_i32_1 = arith.constant 0 : i32
    return %c0_i32, %c0_i32_0 : i32, i32
  }
  func.func @transform_3(%arg0: i32, %arg1: i32) -> (i32, i32) {
    %c0_i32 = arith.constant 0 : i32
    %c0_i32_0 = arith.constant 0 : i32
    %c0_i32_1 = arith.constant 0 : i32
    return %c0_i32, %c0_i32_0 : i32, i32
  }
  func.func @transform_4(%arg0: i32, %arg1: i32) -> (i32, i32) {
    %c0_i32 = arith.constant 0 : i32
    %c0_i32_0 = arith.constant 0 : i32
    %c0_i32_1 = arith.constant 0 : i32
    return %c0_i32, %c0_i32_0 : i32, i32
  }
  func.func @transform_5(%arg0: i32, %arg1: i32) -> (i32, i32) {
    %c0_i32 = arith.constant 0 : i32
    %c0_i32_0 = arith.constant 0 : i32
    %c0_i32_1 = arith.constant 0 : i32
    return %c0_i32, %c0_i32_0 : i32, i32
  }
  func.func @transform_6(%arg0: i32, %arg1: i32) -> (i32, i32, i32) {
    %c0_i32 = arith.constant 0 : i32
    %c0_i32_0 = arith.constant 0 : i32
    return %arg0, %c0_i32, %arg1 : i32, i32, i32
  }
}

module attributes {stable_mosaic.version = 11 : i64} {
  func.func @_matmul_bias_act_kernel(%arg0: i32, %arg1: memref<2x32x128xbf16, #tpu.memory_space<vmem>>, %arg2: memref<64x32xbf16, #tpu.memory_space<vmem>>, %arg3: memref<64x1xf32, #tpu.memory_space<vmem>>, %arg4: memref<2x64x128xbf16, #tpu.memory_space<vmem>>) attributes {dimension_semantics = [#tpu.dimension_semantics<parallel>], iteration_bounds = array<i64: 1>, scalar_prefetch = 0 : i64, scratch_operands = 0 : i64, tpu.core_type = #tpu.core_type<tc>, window_params = [{transform_indices = @transform_0, window_bounds = array<i64: 2, 32, 128>}, {pipeline_mode = #tpu.pipeline_mode<synchronous>, transform_indices = @transform_1, window_bounds = array<i64: 64, 32>}, {pipeline_mode = #tpu.pipeline_mode<synchronous>, transform_indices = @transform_2, window_bounds = array<i64: 64, 1>}, {transform_indices = @transform_3, window_bounds = array<i64: 2, 64, 128>}]} {
    %c0 = arith.constant 0 : index
    %c0_0 = arith.constant 0 : index
    %0 = vector.load %arg2[%c0, %c0_0] : memref<64x32xbf16, #tpu.memory_space<vmem>>, vector<64x32xbf16>
    %c0_1 = arith.constant 0 : index
    %c0_2 = arith.constant 0 : index
    %c0_3 = arith.constant 0 : index
    %1 = vector.load %arg1[%c0_1, %c0_2, %c0_3] : memref<2x32x128xbf16, #tpu.memory_space<vmem>>, vector<1x32x128xbf16>
    %2 = vector.shape_cast %1 : vector<1x32x128xbf16> to vector<32x128xbf16>
    %cst = arith.constant dense<0.000000e+00> : vector<64x128xf32>
    %3 = tpu.matmul %0, %2, %cst {dimension_numbers = #tpu.dot_dimension_numbers<[1], [0], [0], [1], [0, 0, 1, 1], [], []>} : vector<64x32xbf16>, vector<32x128xbf16>, vector<64x128xf32> -> vector<64x128xf32>
    %c0_4 = arith.constant 0 : index
    %c0_5 = arith.constant 0 : index
    %4 = vector.load %arg3[%c0_4, %c0_5] : memref<64x1xf32, #tpu.memory_space<vmem>>, vector<64x1xf32>
    %5 = vector.broadcast %4 : vector<64x1xf32> to vector<64x128xf32>
    %6 = arith.addf %3, %5 : vector<64x128xf32>
    %7 = arith.truncf %6 : vector<64x128xf32> to vector<64x128xbf16>
    %c0_6 = arith.constant 0 : index
    %c0_7 = arith.constant 0 : index
    %c0_8 = arith.constant 0 : index
    %8 = vector.load %arg4[%c0_6, %c0_7, %c0_8] : memref<2x64x128xbf16, #tpu.memory_space<vmem>>, vector<1x64x128xbf16>
    %9 = vector.shape_cast %8 : vector<1x64x128xbf16> to vector<64x128xbf16>
    %10 = vector.shape_cast %7 : vector<64x128xbf16> to vector<1x64x128xbf16>
    tpu.vector_store %arg4[%c0_6, %c0_7, %c0_8], %10 {strides = array<i32>} : memref<2x64x128xbf16, #tpu.memory_space<vmem>>, vector<1x64x128xbf16>,
    %c0_9 = arith.constant 0 : index
    %c0_10 = arith.constant 0 : index
    %11 = vector.load %arg2[%c0_9, %c0_10] : memref<64x32xbf16, #tpu.memory_space<vmem>>, vector<64x32xbf16>
    %c1 = arith.constant 1 : index
    %c0_11 = arith.constant 0 : index
    %c0_12 = arith.constant 0 : index
    %12 = vector.load %arg1[%c1, %c0_11, %c0_12] : memref<2x32x128xbf16, #tpu.memory_space<vmem>>, vector<1x32x128xbf16>
    %13 = vector.shape_cast %12 : vector<1x32x128xbf16> to vector<32x128xbf16>
    %cst_13 = arith.constant dense<0.000000e+00> : vector<64x128xf32>
    %14 = tpu.matmul %11, %13, %cst_13 {dimension_numbers = #tpu.dot_dimension_numbers<[1], [0], [0], [1], [0, 0, 1, 1], [], []>} : vector<64x32xbf16>, vector<32x128xbf16>, vector<64x128xf32> -> vector<64x128xf32>
    %c0_14 = arith.constant 0 : index
    %c0_15 = arith.constant 0 : index
    %15 = vector.load %arg3[%c0_14, %c0_15] : memref<64x1xf32, #tpu.memory_space<vmem>>, vector<64x1xf32>
    %16 = vector.broadcast %15 : vector<64x1xf32> to vector<64x128xf32>
    %17 = arith.addf %14, %16 : vector<64x128xf32>
    %18 = arith.truncf %17 : vector<64x128xf32> to vector<64x128xbf16>
    %c1_16 = arith.constant 1 : index
    %c0_17 = arith.constant 0 : index
    %c0_18 = arith.constant 0 : index
    %19 = vector.load %arg4[%c1_16, %c0_17, %c0_18] : memref<2x64x128xbf16, #tpu.memory_space<vmem>>, vector<1x64x128xbf16>
    %20 = vector.shape_cast %19 : vector<1x64x128xbf16> to vector<64x128xbf16>
    %21 = vector.shape_cast %18 : vector<64x128xbf16> to vector<1x64x128xbf16>
    tpu.vector_store %arg4[%c1_16, %c0_17, %c0_18], %21 {strides = array<i32>} : memref<2x64x128xbf16, #tpu.memory_space<vmem>>, vector<1x64x128xbf16>,
    return
  }
  func.func @transform_0(%arg0: i32) -> (i32, i32, i32) {
    %c0_i32 = arith.constant 0 : i32
    %c0_i32_0 = arith.constant 0 : i32
    %c0_i32_1 = arith.constant 0 : i32
    return %c0_i32, %c0_i32_0, %arg0 : i32, i32, i32
  }
  func.func @transform_1(%arg0: i32) -> (i32, i32) {
    %c0_i32 = arith.constant 0 : i32
    %c0_i32_0 = arith.constant 0 : i32
    %c0_i32_1 = arith.constant 0 : i32
    return %c0_i32, %c0_i32_0 : i32, i32
  }
  func.func @transform_2(%arg0: i32) -> (i32, i32) {
    %c0_i32 = arith.constant 0 : i32
    %c0_i32_0 = arith.constant 0 : i32
    %c0_i32_1 = arith.constant 0 : i32
    return %c0_i32, %c0_i32_0 : i32, i32
  }
  func.func @transform_3(%arg0: i32) -> (i32, i32, i32) {
    %c0_i32 = arith.constant 0 : i32
    %c0_i32_0 = arith.constant 0 : i32
    %c0_i32_1 = arith.constant 0 : i32
    return %c0_i32, %c0_i32_0, %arg0 : i32, i32, i32
  }
}

module attributes {stable_mosaic.version = 11 : i64} {
  func.func @_double_conv_kernel(%arg0: i32, %arg1: i32, %arg2: memref<1x32x256xbf16, #tpu.memory_space<vmem>>, %arg3: memref<16x288xbf16, #tpu.memory_space<vmem>>, %arg4: memref<16x1xf32, #tpu.memory_space<vmem>>, %arg5: memref<1x256xf32, #tpu.memory_space<vmem>>, %arg6: memref<16x144xbf16, #tpu.memory_space<vmem>>, %arg7: memref<16x1xf32, #tpu.memory_space<vmem>>, %arg8: memref<1x16x128xbf16, #tpu.memory_space<vmem>>) attributes {dimension_semantics = [#tpu.dimension_semantics<parallel>, #tpu.dimension_semantics<parallel>], iteration_bounds = array<i64: 2, 1>, scalar_prefetch = 0 : i64, scratch_operands = 0 : i64, tpu.core_type = #tpu.core_type<tc>, window_params = [{transform_indices = @transform_0, window_bounds = array<i64: 1, 32, 256>}, {pipeline_mode = #tpu.pipeline_mode<synchronous>, transform_indices = @transform_1, window_bounds = array<i64: 16, 288>}, {pipeline_mode = #tpu.pipeline_mode<synchronous>, transform_indices = @transform_2, window_bounds = array<i64: 16, 1>}, {pipeline_mode = #tpu.pipeline_mode<synchronous>, transform_indices = @transform_3, window_bounds = array<i64: 1, 256>}, {pipeline_mode = #tpu.pipeline_mode<synchronous>, transform_indices = @transform_4, window_bounds = array<i64: 16, 144>}, {pipeline_mode = #tpu.pipeline_mode<synchronous>, transform_indices = @transform_5, window_bounds = array<i64: 16, 1>}, {transform_indices = @transform_6, window_bounds = array<i64: 1, 16, 128>}]} {
    %c0 = arith.constant 0 : index
    %c0_0 = arith.constant 0 : index
    %c0_1 = arith.constant 0 : index
    %0 = vector.load %arg2[%c0, %c0_0, %c0_1] : memref<1x32x256xbf16, #tpu.memory_space<vmem>>, vector<1x32x180xbf16>
    %1 = vector.shape_cast %0 : vector<1x32x180xbf16> to vector<32x180xbf16>
    %c0_2 = arith.constant 0 : index
    %c0_3 = arith.constant 0 : index
    %2 = vector.load %arg5[%c0_2, %c0_3] : memref<1x256xf32, #tpu.memory_space<vmem>>, vector<1x154xf32>
    %3 = vector.extract_strided_slice %1 {offsets = [0, 0], sizes = [32, 154], strides = [1, 1]} : vector<32x180xbf16> to vector<32x154xbf16>
    %4 = vector.extract_strided_slice %1 {offsets = [0, 1], sizes = [32, 154], strides = [1, 1]} : vector<32x180xbf16> to vector<32x154xbf16>
    %5 = vector.extract_strided_slice %1 {offsets = [0, 2], sizes = [32, 154], strides = [1, 1]} : vector<32x180xbf16> to vector<32x154xbf16>
    %6 = vector.extract_strided_slice %1 {offsets = [0, 12], sizes = [32, 154], strides = [1, 1]} : vector<32x180xbf16> to vector<32x154xbf16>
    %7 = vector.extract_strided_slice %1 {offsets = [0, 13], sizes = [32, 154], strides = [1, 1]} : vector<32x180xbf16> to vector<32x154xbf16>
    %8 = vector.extract_strided_slice %1 {offsets = [0, 14], sizes = [32, 154], strides = [1, 1]} : vector<32x180xbf16> to vector<32x154xbf16>
    %9 = vector.extract_strided_slice %1 {offsets = [0, 24], sizes = [32, 154], strides = [1, 1]} : vector<32x180xbf16> to vector<32x154xbf16>
    %10 = vector.extract_strided_slice %1 {offsets = [0, 25], sizes = [32, 154], strides = [1, 1]} : vector<32x180xbf16> to vector<32x154xbf16>
    %11 = vector.extract_strided_slice %1 {offsets = [0, 26], sizes = [32, 154], strides = [1, 1]} : vector<32x180xbf16> to vector<32x154xbf16>
    %12 = tpu.concatenate %3, %4, %5, %6, %7, %8, %9, %10, %11 in 0 : vector<32x154xbf16>, vector<32x154xbf16>, vector<32x154xbf16>, vector<32x154xbf16>, vector<32x154xbf16>, vector<32x154xbf16>, vector<32x154xbf16>, vector<32x154xbf16>, vector<32x154xbf16> -> vector<288x154xbf16>
    %c0_4 = arith.constant 0 : index
    %c0_5 = arith.constant 0 : index
    %13 = vector.load %arg3[%c0_4, %c0_5] : memref<16x288xbf16, #tpu.memory_space<vmem>>, vector<16x288xbf16>
    %cst = arith.constant dense<0.000000e+00> : vector<16x154xf32>
    %14 = tpu.matmul %13, %12, %cst {dimension_numbers = #tpu.dot_dimension_numbers<[1], [0], [0], [1], [0, 0, 1, 1], [], []>} : vector<16x288xbf16>, vector<288x154xbf16>, vector<16x154xf32> -> vector<16x154xf32>
    %c0_6 = arith.constant 0 : index
    %c0_7 = arith.constant 0 : index
    %15 = vector.load %arg4[%c0_6, %c0_7] : memref<16x1xf32, #tpu.memory_space<vmem>>, vector<16x1xf32>
    %16 = vector.broadcast %15 : vector<16x1xf32> to vector<16x154xf32>
    %17 = arith.addf %14, %16 : vector<16x154xf32>
    %cst_8 = arith.constant 0.000000e+00 : f32
    %18 = vector.broadcast %cst_8 : f32 to vector<16x154xf32>
    %19 = arith.maximumf %17, %18 : vector<16x154xf32>
    %20 = vector.broadcast %2 : vector<1x154xf32> to vector<16x154xf32>
    %21 = arith.mulf %19, %20 : vector<16x154xf32>
    %22 = arith.truncf %21 : vector<16x154xf32> to vector<16x154xbf16>
    %23 = vector.extract_strided_slice %22 {offsets = [0, 0], sizes = [16, 128], strides = [1, 1]} : vector<16x154xbf16> to vector<16x128xbf16>
    %24 = vector.extract_strided_slice %22 {offsets = [0, 1], sizes = [16, 128], strides = [1, 1]} : vector<16x154xbf16> to vector<16x128xbf16>
    %25 = vector.extract_strided_slice %22 {offsets = [0, 2], sizes = [16, 128], strides = [1, 1]} : vector<16x154xbf16> to vector<16x128xbf16>
    %26 = vector.extract_strided_slice %22 {offsets = [0, 12], sizes = [16, 128], strides = [1, 1]} : vector<16x154xbf16> to vector<16x128xbf16>
    %27 = vector.extract_strided_slice %22 {offsets = [0, 13], sizes = [16, 128], strides = [1, 1]} : vector<16x154xbf16> to vector<16x128xbf16>
    %28 = vector.extract_strided_slice %22 {offsets = [0, 14], sizes = [16, 128], strides = [1, 1]} : vector<16x154xbf16> to vector<16x128xbf16>
    %29 = vector.extract_strided_slice %22 {offsets = [0, 24], sizes = [16, 128], strides = [1, 1]} : vector<16x154xbf16> to vector<16x128xbf16>
    %30 = vector.extract_strided_slice %22 {offsets = [0, 25], sizes = [16, 128], strides = [1, 1]} : vector<16x154xbf16> to vector<16x128xbf16>
    %31 = vector.extract_strided_slice %22 {offsets = [0, 26], sizes = [16, 128], strides = [1, 1]} : vector<16x154xbf16> to vector<16x128xbf16>
    %32 = tpu.concatenate %23, %24, %25, %26, %27, %28, %29, %30, %31 in 0 : vector<16x128xbf16>, vector<16x128xbf16>, vector<16x128xbf16>, vector<16x128xbf16>, vector<16x128xbf16>, vector<16x128xbf16>, vector<16x128xbf16>, vector<16x128xbf16>, vector<16x128xbf16> -> vector<144x128xbf16>
    %c0_9 = arith.constant 0 : index
    %c0_10 = arith.constant 0 : index
    %33 = vector.load %arg6[%c0_9, %c0_10] : memref<16x144xbf16, #tpu.memory_space<vmem>>, vector<16x144xbf16>
    %cst_11 = arith.constant dense<0.000000e+00> : vector<16x128xf32>
    %34 = tpu.matmul %33, %32, %cst_11 {dimension_numbers = #tpu.dot_dimension_numbers<[1], [0], [0], [1], [0, 0, 1, 1], [], []>} : vector<16x144xbf16>, vector<144x128xbf16>, vector<16x128xf32> -> vector<16x128xf32>
    %c0_12 = arith.constant 0 : index
    %c0_13 = arith.constant 0 : index
    %35 = vector.load %arg7[%c0_12, %c0_13] : memref<16x1xf32, #tpu.memory_space<vmem>>, vector<16x1xf32>
    %36 = vector.broadcast %35 : vector<16x1xf32> to vector<16x128xf32>
    %37 = arith.addf %34, %36 : vector<16x128xf32>
    %cst_14 = arith.constant 0.000000e+00 : f32
    %38 = vector.broadcast %cst_14 : f32 to vector<16x128xf32>
    %39 = arith.maximumf %37, %38 : vector<16x128xf32>
    %40 = arith.truncf %39 : vector<16x128xf32> to vector<16x128xbf16>
    %c0_15 = arith.constant 0 : index
    %c0_16 = arith.constant 0 : index
    %c0_17 = arith.constant 0 : index
    %41 = vector.load %arg8[%c0_15, %c0_16, %c0_17] : memref<1x16x128xbf16, #tpu.memory_space<vmem>>, vector<1x16x128xbf16>
    %42 = vector.shape_cast %41 : vector<1x16x128xbf16> to vector<16x128xbf16>
    %43 = vector.shape_cast %40 : vector<16x128xbf16> to vector<1x16x128xbf16>
    tpu.vector_store %arg8[%c0_15, %c0_16, %c0_17], %43 {strides = array<i32>} : memref<1x16x128xbf16, #tpu.memory_space<vmem>>, vector<1x16x128xbf16>,
    return
  }
  func.func @transform_0(%arg0: i32, %arg1: i32) -> (i32, i32, i32) {
    %c0_i32 = arith.constant 0 : i32
    %c0_i32_0 = arith.constant 0 : i32
    %c0_i32_1 = arith.constant 0 : i32
    return %arg0, %c0_i32, %c0_i32_0 : i32, i32, i32
  }
  func.func @transform_1(%arg0: i32, %arg1: i32) -> (i32, i32) {
    %c0_i32 = arith.constant 0 : i32
    %c0_i32_0 = arith.constant 0 : i32
    %c0_i32_1 = arith.constant 0 : i32
    return %c0_i32, %c0_i32_0 : i32, i32
  }
  func.func @transform_2(%arg0: i32, %arg1: i32) -> (i32, i32) {
    %c0_i32 = arith.constant 0 : i32
    %c0_i32_0 = arith.constant 0 : i32
    %c0_i32_1 = arith.constant 0 : i32
    return %c0_i32, %c0_i32_0 : i32, i32
  }
  func.func @transform_3(%arg0: i32, %arg1: i32) -> (i32, i32) {
    %c0_i32 = arith.constant 0 : i32
    %c0_i32_0 = arith.constant 0 : i32
    %c0_i32_1 = arith.constant 0 : i32
    return %c0_i32, %c0_i32_0 : i32, i32
  }
  func.func @transform_4(%arg0: i32, %arg1: i32) -> (i32, i32) {
    %c0_i32 = arith.constant 0 : i32
    %c0_i32_0 = arith.constant 0 : i32
    %c0_i32_1 = arith.constant 0 : i32
    return %c0_i32, %c0_i32_0 : i32, i32
  }
  func.func @transform_5(%arg0: i32, %arg1: i32) -> (i32, i32) {
    %c0_i32 = arith.constant 0 : i32
    %c0_i32_0 = arith.constant 0 : i32
    %c0_i32_1 = arith.constant 0 : i32
    return %c0_i32, %c0_i32_0 : i32, i32
  }
  func.func @transform_6(%arg0: i32, %arg1: i32) -> (i32, i32, i32) {
    %c0_i32 = arith.constant 0 : i32
    %c0_i32_0 = arith.constant 0 : i32
    return %arg0, %c0_i32, %arg1 : i32, i32, i32
  }
}

module attributes {stable_mosaic.version = 11 : i64} {
  func.func @_matmul_bias_act_kernel(%arg0: i32, %arg1: memref<2x16x128xbf16, #tpu.memory_space<vmem>>, %arg2: memref<32x16xbf16, #tpu.memory_space<vmem>>, %arg3: memref<32x1xf32, #tpu.memory_space<vmem>>, %arg4: memref<2x32x128xbf16, #tpu.memory_space<vmem>>) attributes {dimension_semantics = [#tpu.dimension_semantics<parallel>], iteration_bounds = array<i64: 1>, scalar_prefetch = 0 : i64, scratch_operands = 0 : i64, tpu.core_type = #tpu.core_type<tc>, window_params = [{transform_indices = @transform_0, window_bounds = array<i64: 2, 16, 128>}, {pipeline_mode = #tpu.pipeline_mode<synchronous>, transform_indices = @transform_1, window_bounds = array<i64: 32, 16>}, {pipeline_mode = #tpu.pipeline_mode<synchronous>, transform_indices = @transform_2, window_bounds = array<i64: 32, 1>}, {transform_indices = @transform_3, window_bounds = array<i64: 2, 32, 128>}]} {
    %c0 = arith.constant 0 : index
    %c0_0 = arith.constant 0 : index
    %0 = vector.load %arg2[%c0, %c0_0] : memref<32x16xbf16, #tpu.memory_space<vmem>>, vector<32x16xbf16>
    %c0_1 = arith.constant 0 : index
    %c0_2 = arith.constant 0 : index
    %c0_3 = arith.constant 0 : index
    %1 = vector.load %arg1[%c0_1, %c0_2, %c0_3] : memref<2x16x128xbf16, #tpu.memory_space<vmem>>, vector<1x16x128xbf16>
    %2 = vector.shape_cast %1 : vector<1x16x128xbf16> to vector<16x128xbf16>
    %cst = arith.constant dense<0.000000e+00> : vector<32x128xf32>
    %3 = tpu.matmul %0, %2, %cst {dimension_numbers = #tpu.dot_dimension_numbers<[1], [0], [0], [1], [0, 0, 1, 1], [], []>} : vector<32x16xbf16>, vector<16x128xbf16>, vector<32x128xf32> -> vector<32x128xf32>
    %c0_4 = arith.constant 0 : index
    %c0_5 = arith.constant 0 : index
    %4 = vector.load %arg3[%c0_4, %c0_5] : memref<32x1xf32, #tpu.memory_space<vmem>>, vector<32x1xf32>
    %5 = vector.broadcast %4 : vector<32x1xf32> to vector<32x128xf32>
    %6 = arith.addf %3, %5 : vector<32x128xf32>
    %7 = arith.truncf %6 : vector<32x128xf32> to vector<32x128xbf16>
    %c0_6 = arith.constant 0 : index
    %c0_7 = arith.constant 0 : index
    %c0_8 = arith.constant 0 : index
    %8 = vector.load %arg4[%c0_6, %c0_7, %c0_8] : memref<2x32x128xbf16, #tpu.memory_space<vmem>>, vector<1x32x128xbf16>
    %9 = vector.shape_cast %8 : vector<1x32x128xbf16> to vector<32x128xbf16>
    %10 = vector.shape_cast %7 : vector<32x128xbf16> to vector<1x32x128xbf16>
    tpu.vector_store %arg4[%c0_6, %c0_7, %c0_8], %10 {strides = array<i32>} : memref<2x32x128xbf16, #tpu.memory_space<vmem>>, vector<1x32x128xbf16>,
    %c0_9 = arith.constant 0 : index
    %c0_10 = arith.constant 0 : index
    %11 = vector.load %arg2[%c0_9, %c0_10] : memref<32x16xbf16, #tpu.memory_space<vmem>>, vector<32x16xbf16>
    %c1 = arith.constant 1 : index
    %c0_11 = arith.constant 0 : index
    %c0_12 = arith.constant 0 : index
    %12 = vector.load %arg1[%c1, %c0_11, %c0_12] : memref<2x16x128xbf16, #tpu.memory_space<vmem>>, vector<1x16x128xbf16>
    %13 = vector.shape_cast %12 : vector<1x16x128xbf16> to vector<16x128xbf16>
    %cst_13 = arith.constant dense<0.000000e+00> : vector<32x128xf32>
    %14 = tpu.matmul %11, %13, %cst_13 {dimension_numbers = #tpu.dot_dimension_numbers<[1], [0], [0], [1], [0, 0, 1, 1], [], []>} : vector<32x16xbf16>, vector<16x128xbf16>, vector<32x128xf32> -> vector<32x128xf32>
    %c0_14 = arith.constant 0 : index
    %c0_15 = arith.constant 0 : index
    %15 = vector.load %arg3[%c0_14, %c0_15] : memref<32x1xf32, #tpu.memory_space<vmem>>, vector<32x1xf32>
    %16 = vector.broadcast %15 : vector<32x1xf32> to vector<32x128xf32>
    %17 = arith.addf %14, %16 : vector<32x128xf32>
    %18 = arith.truncf %17 : vector<32x128xf32> to vector<32x128xbf16>
    %c1_16 = arith.constant 1 : index
    %c0_17 = arith.constant 0 : index
    %c0_18 = arith.constant 0 : index
    %19 = vector.load %arg4[%c1_16, %c0_17, %c0_18] : memref<2x32x128xbf16, #tpu.memory_space<vmem>>, vector<1x32x128xbf16>
    %20 = vector.shape_cast %19 : vector<1x32x128xbf16> to vector<32x128xbf16>
    %21 = vector.shape_cast %18 : vector<32x128xbf16> to vector<1x32x128xbf16>
    tpu.vector_store %arg4[%c1_16, %c0_17, %c0_18], %21 {strides = array<i32>} : memref<2x32x128xbf16, #tpu.memory_space<vmem>>, vector<1x32x128xbf16>,
    return
  }
  func.func @transform_0(%arg0: i32) -> (i32, i32, i32) {
    %c0_i32 = arith.constant 0 : i32
    %c0_i32_0 = arith.constant 0 : i32
    %c0_i32_1 = arith.constant 0 : i32
    return %c0_i32, %c0_i32_0, %arg0 : i32, i32, i32
  }
  func.func @transform_1(%arg0: i32) -> (i32, i32) {
    %c0_i32 = arith.constant 0 : i32
    %c0_i32_0 = arith.constant 0 : i32
    %c0_i32_1 = arith.constant 0 : i32
    return %c0_i32, %c0_i32_0 : i32, i32
  }
  func.func @transform_2(%arg0: i32) -> (i32, i32) {
    %c0_i32 = arith.constant 0 : i32
    %c0_i32_0 = arith.constant 0 : i32
    %c0_i32_1 = arith.constant 0 : i32
    return %c0_i32, %c0_i32_0 : i32, i32
  }
  func.func @transform_3(%arg0: i32) -> (i32, i32, i32) {
    %c0_i32 = arith.constant 0 : i32
    %c0_i32_0 = arith.constant 0 : i32
    %c0_i32_1 = arith.constant 0 : i32
    return %c0_i32, %c0_i32_0, %arg0 : i32, i32, i32
  }
}

module attributes {stable_mosaic.version = 11 : i64} {
  func.func @_matmul_bias_act_kernel(%arg0: i32, %arg1: memref<2x8x256xbf16, #tpu.memory_space<vmem>>, %arg2: memref<1x8xbf16, #tpu.memory_space<vmem>>, %arg3: memref<1x1xf32, #tpu.memory_space<vmem>>, %arg4: memref<2x1x256xf32, #tpu.memory_space<vmem>>) attributes {dimension_semantics = [#tpu.dimension_semantics<parallel>], iteration_bounds = array<i64: 1>, scalar_prefetch = 0 : i64, scratch_operands = 0 : i64, tpu.core_type = #tpu.core_type<tc>, window_params = [{transform_indices = @transform_0, window_bounds = array<i64: 2, 8, 256>}, {pipeline_mode = #tpu.pipeline_mode<synchronous>, transform_indices = @transform_1, window_bounds = array<i64: 1, 8>}, {pipeline_mode = #tpu.pipeline_mode<synchronous>, transform_indices = @transform_2, window_bounds = array<i64: 1, 1>}, {transform_indices = @transform_3, window_bounds = array<i64: 2, 1, 256>}]} {
    %c0 = arith.constant 0 : index
    %c0_0 = arith.constant 0 : index
    %0 = vector.load %arg2[%c0, %c0_0] : memref<1x8xbf16, #tpu.memory_space<vmem>>, vector<1x8xbf16>
    %c0_1 = arith.constant 0 : index
    %c0_2 = arith.constant 0 : index
    %c0_3 = arith.constant 0 : index
    %1 = vector.load %arg1[%c0_1, %c0_2, %c0_3] : memref<2x8x256xbf16, #tpu.memory_space<vmem>>, vector<1x8x256xbf16>
    %2 = vector.shape_cast %1 : vector<1x8x256xbf16> to vector<8x256xbf16>
    %cst = arith.constant dense<0.000000e+00> : vector<1x256xf32>
    %3 = tpu.matmul %0, %2, %cst {dimension_numbers = #tpu.dot_dimension_numbers<[1], [0], [0], [1], [0, 0, 1, 1], [], []>} : vector<1x8xbf16>, vector<8x256xbf16>, vector<1x256xf32> -> vector<1x256xf32>
    %c0_4 = arith.constant 0 : index
    %c0_5 = arith.constant 0 : index
    %4 = vector.load %arg3[%c0_4, %c0_5] : memref<1x1xf32, #tpu.memory_space<vmem>>, vector<1x1xf32>
    %5 = vector.broadcast %4 : vector<1x1xf32> to vector<1x256xf32>
    %6 = arith.addf %3, %5 : vector<1x256xf32>
    %7 = math.tanh %6 : vector<1x256xf32>
    %cst_6 = arith.constant 5.000000e+00 : f32
    %8 = vector.broadcast %cst_6 : f32 to vector<1x256xf32>
    %9 = arith.mulf %8, %7 : vector<1x256xf32>
    %c0_7 = arith.constant 0 : index
    %c0_8 = arith.constant 0 : index
    %c0_9 = arith.constant 0 : index
    %10 = vector.load %arg4[%c0_7, %c0_8, %c0_9] : memref<2x1x256xf32, #tpu.memory_space<vmem>>, vector<1x1x256xf32>
    %11 = vector.shape_cast %10 : vector<1x1x256xf32> to vector<1x256xf32>
    %12 = vector.shape_cast %9 : vector<1x256xf32> to vector<1x1x256xf32>
    tpu.vector_store %arg4[%c0_7, %c0_8, %c0_9], %12 {strides = array<i32>} : memref<2x1x256xf32, #tpu.memory_space<vmem>>, vector<1x1x256xf32>,
    %c0_10 = arith.constant 0 : index
    %c0_11 = arith.constant 0 : index
    %13 = vector.load %arg2[%c0_10, %c0_11] : memref<1x8xbf16, #tpu.memory_space<vmem>>, vector<1x8xbf16>
    %c1 = arith.constant 1 : index
    %c0_12 = arith.constant 0 : index
    %c0_13 = arith.constant 0 : index
    %14 = vector.load %arg1[%c1, %c0_12, %c0_13] : memref<2x8x256xbf16, #tpu.memory_space<vmem>>, vector<1x8x256xbf16>
    %15 = vector.shape_cast %14 : vector<1x8x256xbf16> to vector<8x256xbf16>
    %cst_14 = arith.constant dense<0.000000e+00> : vector<1x256xf32>
    %16 = tpu.matmul %13, %15, %cst_14 {dimension_numbers = #tpu.dot_dimension_numbers<[1], [0], [0], [1], [0, 0, 1, 1], [], []>} : vector<1x8xbf16>, vector<8x256xbf16>, vector<1x256xf32> -> vector<1x256xf32>
    %c0_15 = arith.constant 0 : index
    %c0_16 = arith.constant 0 : index
    %17 = vector.load %arg3[%c0_15, %c0_16] : memref<1x1xf32, #tpu.memory_space<vmem>>, vector<1x1xf32>
    %18 = vector.broadcast %17 : vector<1x1xf32> to vector<1x256xf32>
    %19 = arith.addf %16, %18 : vector<1x256xf32>
    %20 = math.tanh %19 : vector<1x256xf32>
    %cst_17 = arith.constant 5.000000e+00 : f32
    %21 = vector.broadcast %cst_17 : f32 to vector<1x256xf32>
    %22 = arith.mulf %21, %20 : vector<1x256xf32>
    %c1_18 = arith.constant 1 : index
    %c0_19 = arith.constant 0 : index
    %c0_20 = arith.constant 0 : index
    %23 = vector.load %arg4[%c1_18, %c0_19, %c0_20] : memref<2x1x256xf32, #tpu.memory_space<vmem>>, vector<1x1x256xf32>
    %24 = vector.shape_cast %23 : vector<1x1x256xf32> to vector<1x256xf32>
    %25 = vector.shape_cast %22 : vector<1x256xf32> to vector<1x1x256xf32>
    tpu.vector_store %arg4[%c1_18, %c0_19, %c0_20], %25 {strides = array<i32>} : memref<2x1x256xf32, #tpu.memory_space<vmem>>, vector<1x1x256xf32>,
    return
  }
  func.func @transform_0(%arg0: i32) -> (i32, i32, i32) {
    %c0_i32 = arith.constant 0 : i32
    %c0_i32_0 = arith.constant 0 : i32
    %c0_i32_1 = arith.constant 0 : i32
    return %c0_i32, %c0_i32_0, %arg0 : i32, i32, i32
  }
  func.func @transform_1(%arg0: i32) -> (i32, i32) {
    %c0_i32 = arith.constant 0 : i32
    %c0_i32_0 = arith.constant 0 : i32
    %c0_i32_1 = arith.constant 0 : i32
    return %c0_i32, %c0_i32_0 : i32, i32
  }
  func.func @transform_2(%arg0: i32) -> (i32, i32) {
    %c0_i32 = arith.constant 0 : i32
    %c0_i32_0 = arith.constant 0 : i32
    %c0_i32_1 = arith.constant 0 : i32
    return %c0_i32, %c0_i32_0 : i32, i32
  }
  func.func @transform_3(%arg0: i32) -> (i32, i32, i32) {
    %c0_i32 = arith.constant 0 : i32
    %c0_i32_0 = arith.constant 0 : i32
    %c0_i32_1 = arith.constant 0 : i32
    return %c0_i32, %c0_i32_0, %arg0 : i32, i32, i32
  }
}

</mosaic_0001>

<bundles_post_ra>
// kernel: channel_attn_unet_forward.9
= control target key start
LH: loop header
LB: loop body
LE: loop exit
PB: predicated region body
PF: predicated region fallthrough
CT: control target
= control target key end

     0   :  { %11 = vsyncpa [#allocation3], 0  ;;  %s963_s0 = inlined_call_operand.hbm [shape: bf16[2,9,256], index: 0, kind: input, shape index: {}]   ;;  %s964_s1 = inlined_call_operand.hbm [shape: f32[2,1,256], index: 1, kind: input, shape index: {}]   ;;  %s965_s2 = inlined_call_operand.hbm [shape: f32[3,9], index: 2, kind: input, shape index: {}]   ;;  %s966_s3 = inlined_call_operand.hbm [shape: f32[9,3], index: 3, kind: input, shape index: {}]   ;;  %s967_s4 = inlined_call_operand.hbm [shape: f32[2,1,256], index: 4, kind: output, shape index: {0}]   ;;  %s968_s5 = inlined_call_operand.hbm [shape: f32[2,9,2], index: 5, kind: output, shape index: {1}]  }
   0x1   :  { %12 = vsyncpa [#allocation6], 0 }
   0x2   :  { %13 = vsyncpa [#allocation9], 0 }
   0x3   :  { %14 = vsyncpa [#allocation4], 0 }
   0x4   :  { %15 = vsyncpa [#allocation12], 0  ;;  %s723_s18 = smov [#allocation5]   ;;  %s581_s22 = scalar_lea.hbm %s964_s1, 64 }
   0x5   :  { %s33_s19 = sshll.u32 %s723_s18, 4  ;;  %p582_p0 = scmp.ne.s32.totalorder %s964_s1, %s581_s22  ;;  %s34_s19 = int_to_ptr.vmem [resolvable:$true] %s33_s19 }
   0x6   :  { %p585_p1 = scmp.lt.u32.totalorder %s581_s22, %s964_s1 }
   0x8   :  { %p587_p2 = pnand %p585_p1, %p582_p0 }
   0xa   :  { %590 = shalt.err (!%p587_p2)
}
   0xb   :  { %s591_s27 = scalar_lea.vmem %s34_s19, 64  ;;  %p596_p4 = scmp.lt.s32.totalorder %s34_s19, %s34_s19 }
   0xc   :  { %p592_p3 = scmp.ne.s32.totalorder %s34_s19, %s591_s27  ;;  %p597_p5 = scmp.lt.s32.totalorder %s591_s27, %s591_s27 }
   0xe   :  { %p598_p6 = por %p597_p5, %p596_p4 }
  0x10   :  { %p599_p7 = pnand %p598_p6, %p592_p3 }
  0x12   :  { %602 = shalt.err (!%p599_p7)
}
  0x13   :  { %s724_s28 = smov 32   ;;  %s725_s29 = smov 2  }
  0x14   :  { %39 = dma.hbm_to_vmem [thread:$0]  %s964_s1, 64, %s34_s19, [#allocation6], %s724_s28, %s724_s28, %s725_s29  }
  0x15   :  { %s726_s7 = smov [#allocation2]   ;;  %s603_s11 = scalar_lea.hbm %s963_s0, 512 }
  0x16   :  { %s21_s8 = sshll.u32 %s726_s7, 4  ;;  %p604_p8 = scmp.ne.s32.totalorder %s963_s0, %s603_s11  ;;  %s22_s8 = int_to_ptr.vmem [resolvable:$true] %s21_s8 }
  0x17   :  { %p607_p9 = scmp.lt.u32.totalorder %s603_s11, %s963_s0 }
  0x19   :  { %p609_p10 = pnand %p607_p9, %p604_p8 }
  0x1b   :  { %612 = shalt.err (!%p609_p10)
}
  0x1c   :  { %s613_s16 = scalar_lea.vmem %s22_s8, 512  ;;  %p618_p12 = scmp.lt.s32.totalorder %s22_s8, %s22_s8 }
  0x1d   :  { %p614_p11 = scmp.ne.s32.totalorder %s22_s8, %s613_s16  ;;  %p619_p13 = scmp.lt.s32.totalorder %s613_s16, %s613_s16 }
  0x1f   :  { %p620_p0 = por %p619_p13, %p618_p12 }
  0x21   :  { %p621_p1 = pnand %p620_p0, %p614_p11 }
  0x23   :  { %624 = shalt.err (!%p621_p1)
}
  0x24   :  { %s727_s1 = smov 128   ;;  %s728_s17 = smov 8  }
  0x25   :  { %27 = dma.hbm_to_vmem [thread:$0]  %s963_s0, 512, %s22_s8, [#allocation3], %s727_s1, %s727_s1, %s728_s17  }
  0x26   :  { %s729_s20 = smov [#allocation7]   ;;  %s730_s22 = smov [#allocation8]  }
  0x27   :  { %s46_s21 = sshll.u32 %s729_s20, 4  ;;  %s55_s23 = sshll.u32 %s730_s22, 4  ;;  %s47_s21 = int_to_ptr.vmem [resolvable:$true] %s46_s21  ;;  %s803_s23 = int_to_ptr.vmem [resolvable:$true] %s55_s23 }
  0x28   :  { %s625_s26 = scalar_lea.hbm %s965_s2, 64 }
  0x29   :  { %p626_p2 = scmp.ne.s32.totalorder %s965_s2, %s625_s26  ;;  %p629_p3 = scmp.lt.u32.totalorder %s625_s26, %s965_s2 }
  0x2b   :  { %p631_p4 = pnand %p629_p3, %p626_p2 }
  0x2d   :  { %634 = shalt.err (!%p631_p4)
}
  0x2e   :  { %s635_s0 = scalar_lea.vmem %s47_s21, 64  ;;  %p640_p6 = scmp.lt.s32.totalorder %s47_s21, %s47_s21 }
  0x2f   :  { %p636_p5 = scmp.ne.s32.totalorder %s47_s21, %s635_s0  ;;  %p641_p7 = scmp.lt.s32.totalorder %s635_s0, %s635_s0 }
  0x31   :  { %p642_p8 = por %p641_p7, %p640_p6 }
  0x33   :  { %p643_p9 = pnand %p642_p8, %p636_p5 }
  0x35   :  { %646 = shalt.err (!%p643_p9)
}
  0x36   :  { %49 = dma.hbm_to_vmem [thread:$0]  %s965_s2, 64, %s47_s21, [#allocation6]  }
  0x37   :  { %s647_s12 = scalar_lea.hbm %s966_s3, 256 }
  0x38   :  { %p648_p10 = scmp.ne.s32.totalorder %s966_s3, %s647_s12  ;;  %p651_p11 = scmp.lt.u32.totalorder %s647_s12, %s966_s3 }
  0x3a   :  { %p653_p12 = pnand %p651_p11, %p648_p10 }
  0x3c   :  { %656 = shalt.err (!%p653_p12)
}
  0x3d   :  { %s657_s18 = scalar_lea.vmem %s803_s23, 256  ;;  %p662_p0 = scmp.lt.s32.totalorder %s803_s23, %s803_s23 }
  0x3e   :  { %p658_p13 = scmp.ne.s32.totalorder %s803_s23, %s657_s18  ;;  %p663_p1 = scmp.lt.s32.totalorder %s657_s18, %s657_s18 }
  0x40   :  { %p664_p2 = por %p663_p1, %p662_p0 }
  0x42   :  { %p665_p3 = pnand %p664_p2, %p658_p13 }
  0x44   :  { %668 = shalt.err (!%p665_p3)
}
  0x45   :  { %61 = dma.hbm_to_vmem [thread:$0]  %s966_s3, 256, %s803_s23, [#allocation9], %s727_s1, %s727_s1, %s728_s17  }
  0x46   :  { %713 = dma.done.wait [#allocation3], 512  }
  0x47   :  { %714 = vsyncadd [#allocation3], 4294966784 }
  0x48   :  { %715 = dma.done.wait [#allocation6], 128  }
  0x49   :  { %716 = vsyncadd [#allocation6], 4294967168 }
  0x4a   :  { %717 = dma.done.wait [#allocation9], 256  }
  0x4b   :  { %718 = vsyncadd [#allocation9], 4294967040  ;;  %v82_v0 = vlaneseq  ;;  %v842_v4 = vld [vmem:[#allocation2 + $0x10] sm:$0xff]  ;;  %v123_v5 = vld [vmem:[#allocation5 + $0x2] sm:$0x3]  ;;  %vm99_vm0 = vcmask 1040384  }
  0x4c   :  { %v844_v6 = vld [vmem:[#allocation2] sm:$0xff]  ;;  %v118_v7 = vunpack.c.l.bf16 %v842_v4  ;;  %v119_v8 = vunpack.c.h.bf16 %v842_v4  ;;  %v848_v12 = vld [vmem:[#allocation2 + $0x18] sm:$0x11]  ;;  %v850_v13 = vld [vmem:[#allocation2 + $0x8] sm:$0x11]  ;;  %v731_v46 = vmov 0.0|0.0  }
  0x4d   :  { %v838_v1 = vshrl.u32 %v82_v0, 7  ;;  %v80_v11 = vld [vmem:[#allocation5] sm:$0x3]  ;;  %v76_v14 = vunpack.c.l.bf16 %v844_v6  ;;  %v77_v15 = vunpack.c.h.bf16 %v844_v6  ;;  %v120_v20 = vunpack.c.l.bf16 %v848_v12  ;;  %545 = vmatprep.subr.bf16.mxu0 %v731_v46  ;;  %s735_s3 = smov 127   ;;  %s738_s20 = smov 1  }
  0x4e   :  { %v121_v21 = vunpack.c.h.bf16 %v848_v12  ;;  %v78_v24 = vunpack.c.l.bf16 %v850_v13  ;;  %v79_v25 = vunpack.c.h.bf16 %v850_v13  ;;  %vm732_vm1 = vmmov 0   ;;  %s739_s21 = smov 126   ;;  %s741_s22 = smov [#allocation11]  }
  0x4f   :  { %v84_v2 = vsub.s32 0, %v838_v1  ;;  %v88_v3 = vsub.s32 1, %v838_v1  ;;  %v733_v47 = vmov 0.0   ;;  %vm157_vm2 = vcmask 7168   ;;  %s502_s23 = sshll.u32 %s741_s22, 4  ;;  %s503_s23 = int_to_ptr.vmem [resolvable:$true] %s502_s23 }
  0x50   :  { %537 = vmatprep.mubr.msk.f32.mxu0 %vm732_vm1, %v733_v47  ;;  %vm160_vm3 = vcmask 15360   ;;  %vm163_vm4 = vcmask 23552   ;;  %vm734_vm5 = vmmov 1   ;;  %vm167_vm7 = vcmask 72704   ;;  %s669_s24 = scalar_lea.vmem %s503_s23, 512  ;;  %p674_p5 = scmp.lt.s32.totalorder %s503_s23, %s503_s23 }
  0x51   :  { %v128_v9 = vrot.slane %v123_v5, %v84_v2  ;;  %v132_v10 = vrot.slane %v123_v5, %v88_v3  ;;  %v85_v16 = vrot.slane %v80_v11, %v84_v2  ;;  %v89_v17 = vrot.slane %v80_v11, %v88_v3  ;;  %vm547_vm6 = vmpackc.low %vm99_vm0, %vm734_vm5  ;;  %p670_p4 = scmp.ne.s32.totalorder %s503_s23, %s669_s24  ;;  %p675_p6 = scmp.lt.s32.totalorder %s669_s24, %s669_s24 }
  0x52   :  { %vm253_vm8 = vcmask 1042432   ;;  %vm418_vm9 = vcmask 8192   ;;  %vm923_vm10 = vcmp.lt.s32.totalorder %v82_v0, 256 }
  0x53   :  { %v135_v18 = vmul.f32 %v128_v9, %v118_v7  ;;  %v136_v19 = vmul.f32 %v132_v10, %v119_v8  ;;  %v92_v22 = vmul.f32 %v85_v16, %v76_v14  ;;  %v93_v23 = vmul.f32 %v89_v17, %v77_v15  ;;  %p676_p7 = por %p675_p6, %p674_p5 }
  0x54   :  { %v137_v27 = vmul.f32 %v128_v9, %v120_v20  ;;  %v138_v28 = vmul.f32 %v132_v10, %v121_v21  ;;  %v94_v30 = vmul.f32 %v85_v16, %v78_v24  ;;  %v95_v31 = vmul.f32 %v89_v17, %v79_v25  ;;  %v166_v9 = vld [vmem:[#allocation7] sm:$0x7]  ;;  %v245_v10 = vld [vmem:[#allocation8] sm:$0xff] }
  0x55   :  { %v139_v26 = vadd.f32 %v136_v19, %v135_v18  ;;  %v96_v29 = vadd.f32 %v93_v23, %v92_v22  ;;  %v107_v35 = vmax.f32 %v92_v22, %v93_v23  ;;  %v149_v45 = vmax.f32 %v135_v18, %v136_v19  ;;  %542 = vmatprep.mubr.msk.f32.mxu1 %vm163_vm4, %v245_v10  ;;  %v246_v18 = vld [vmem:[#allocation8 + $0x8] sm:$0x1]  ;;  %p677_p8 = pnand %p676_p7, %p670_p4 }
  0x56   :  { %v142_v32 = vsel %vm99_vm0, %v137_v27, 0.0  ;;  %v143_v33 = vsel %vm99_vm0, %v138_v28, 0.0  ;;  %v110_v36 = vsel %vm99_vm0, %v94_v30, -inf  ;;  %v111_v37 = vsel %vm99_vm0, %v95_v31, -inf }
  0x57   :  { %140 = vadd.xlane.f32.xlu1 %v139_v26  ;;  %97 = vadd.xlane.f32.xlu0 %v96_v29  ;;  %v144_v34 = vadd.f32 %v143_v33, %v142_v32  ;;  %v100_v38 = vsel %vm99_vm0, %v94_v30, 0.0  ;;  %v101_v39 = vsel %vm99_vm0, %v95_v31, 0.0  ;;  %v112_v40 = vmax.f32 %v110_v36, %v111_v37 }
  0x58   :  { %v102_v41 = vadd.f32 %v101_v39, %v100_v38  ;;  %v152_v42 = vsel %vm99_vm0, %v137_v27, -inf  ;;  %v153_v43 = vsel %vm99_vm0, %v138_v28, -inf  ;;  %v736_v23 = vmov 0  }
  0x59   :  { %v154_v44 = vmax.f32 %v152_v42, %v153_v43  ;;  %569 = vset.pattern.permute.xlu1 %v736_v23  ;;  %571 = vset.pattern.permute.xlu0 %v736_v23  ;;  %v737_v38 = vmov 2  }
  0x5b   :  { %145 = vadd.xlane.f32.xlu1 %v144_v34  ;;  %108 = vmax.xlane.f32.xlu0 %v107_v35 }
  0x5f   :  { %113 = vmax.xlane.f32.xlu1 %v112_v40  ;;  %103 = vadd.xlane.f32.xlu0 %v102_v41 }
  0x63   :  { %155 = vmax.xlane.f32.xlu1 %v154_v44  ;;  %150 = vmax.xlane.f32.xlu0 %v149_v45 }
  0xe4   :  { %v141_v48 = vpop.xlane.xlu1 %140  ;;  %v98_v49 = vpop.xlane.xlu0 %97 }
  0xe5   :  { %v105_v52 = vmul.f32 0.00390625, %v98_v49  ;;  %v147_v57 = vmul.f32 0.00390625, %v141_v48 }
  0xe8   :  { %v146_v50 = vpop.xlane.xlu1 %145  ;;  %v109_v51 = vpop.xlane.xlu0 %108 }
  0xe9   :  { %v158_v55 = vsel %vm157_vm2, %v105_v52, %v109_v51  ;;  %v148_v58 = vmul.f32 0.00390625, %v146_v50 }
  0xea   :  { %v161_v62 = vsel %vm160_vm3, %v158_v55, %v147_v57 }
  0xec   :  { %v114_v53 = vpop.xlane.xlu1 %113  ;;  %v104_v54 = vpop.xlane.xlu0 %103 }
  0xed   :  { %v106_v56 = vmul.f32 0.00390625, %v104_v54 }
  0xef   :  { %v159_v59 = vsel %vm157_vm2, %v106_v56, %v114_v53 }
  0xf0   :  { %v156_v60 = vpop.xlane.xlu1 %155  ;;  %v162_v61 = vsel %vm160_vm3, %v159_v59, %v148_v58  ;;  %v151_v63 = vpop.xlane.xlu0 %150 }
  0xf1   :  { %v165_v2 = vsel %vm163_vm4, %v162_v61, %v156_v60  ;;  %v164_v3 = vsel %vm163_vm4, %v161_v62, %v151_v63 }
  0xf2   :  { %v546_v5 = vpack.c.bf16 %v165_v2, %v164_v3 }
  0xf4   :  { %548 = vmatpush3.bf16.msk.msra.mxu0 %vm547_vm6, %v546_v5 }
  0xf7   :  { %538 = vmatmul.mubr.msk.f32.vlgmr.msra.gmra.mrb[0].mxu0 %vm167_vm7, %v166_v9 }
 0x1ca   :  { %v240_v11 = vpop.f32.mrb[0].mxu0 }
 0x1cb   :  { %v244_v16 = vmax.f32 %v240_v11, 0.0  ;;  %v539_v17 = vpop.f32.mrb[1].mxu0 }
 0x1cd   :  { %540 = vmatprep.subr.msk.mxu1 %vm253_vm8, %v244_v16 }
 0x1ce   :  { %541 = vmatpush3.msk.msra.mxu1 %vm253_vm8, %v244_v16 }
 0x1cf   :  { %543 = vmatmul.mubr.msk.f32.vlgmr.msra.gmra.mrb[0].mxu1 %vm163_vm4, %v246_v18 }
 0x2a2   :  { %v544_v19 = vpop.f32.mrb[0].mxu1 }
 0x2a3   :  { %336 = vrot.lane.b32.xlu0 %v544_v19, %s735_s3  ;;  %v323_v22 = vpop.f32.mrb[1].mxu1 }
 0x2a4   :  { %334 = vrot.lane.b32.xlu1 %v323_v22, %s735_s3 }
 0x315   :  { %v337_v26 = vpop.permute.xlu0 %336 }
 0x316   :  { %v341_v27 = vadd.f32 %v544_v19, %v337_v26  ;;  %v335_v28 = vpop.permute.xlu1 %334 }
 0x317   :  { %v340_v29 = vadd.f32 %v335_v28, %v323_v22 }
 0x318   :  { %v526_v30 = vmul.f32 -1.442695, %v341_v27 }
 0x319   :  { %v525_v31 = vmul.f32 -1.442695, %v340_v29 }
 0x31a   :  { %573 = vpow2.f32 %v526_v30 }
 0x31b   :  { %575 = vpow2.f32 %v525_v31 }
 0x324   :  { %v574_v32 = vpop.eup %573 }
 0x325   :  { %v576_v33 = vpop.eup %575  ;;  %v349_v34 = vadd.f32 1.0, %v574_v32 }
 0x326   :  { %v348_v35 = vadd.f32 1.0, %v576_v33 }
 0x327   :  { %577 = vrcp.f32 %v349_v34 }
 0x328   :  { %579 = vrcp.f32 %v348_v35 }
 0x331   :  { %v578_v36 = vpop.eup %577 }
 0x332   :  { %v580_v37 = vpop.eup %579  ;;  %361 = vperm.xlu1 %569, %v578_v36  }
 0x333   :  { %356 = vperm.xlu0 %571, %v580_v37  }
 0x336   :  { %570 = vset.pattern.permute.xlu1 %v737_v38 }
 0x337   :  { %425 = vperm.xlu1 %570, %v578_v36   ;;  %411 = vrot.lane.b32.xlu0 %v341_v27, %s738_s20 }
 0x338   :  { %572 = vset.pattern.permute.xlu0 %v737_v38 }
 0x33b   :  { %421 = vperm.xlu1 %570, %v580_v37   ;;  %470 = vrot.lane.b32.xlu0 %v578_v36, %s739_s21 }
 0x33f   :  { %409 = vrot.lane.b32.xlu1 %v340_v29, %s738_s20  ;;  %476 = vrot.lane.b32.xlu0 %v341_v27, %s735_s3 }
 0x343   :  { %468 = vrot.lane.b32.xlu1 %v580_v37, %s739_s21 }
 0x347   :  { %474 = vrot.lane.b32.xlu1 %v340_v29, %s735_s3 }
 0x3b1   :  { %v362_v39 = vpop.permute.xlu1 %361 }
 0x3b2   :  { %v366_v40 = vmul.f32 %v362_v39, %v78_v24  ;;  %v367_v41 = vmul.f32 %v362_v39, %v79_v25  ;;  %v357_v42 = vpop.permute.xlu0 %356  ;;  %v740_v25 = vmov 1966171168  }
 0x3b3   :  { %v364_v43 = vmul.f32 %v357_v42, %v76_v14  ;;  %v365_v44 = vmul.f32 %v357_v42, %v77_v15  ;;  %v388_v52 = vunpack.c.l.s4 %v740_v25 }
 0x3b4   :  { %v368_v45 = vsel %vm99_vm0, %v366_v40, -inf  ;;  %v376_v46 = vsel %vm99_vm0, %v367_v41, -inf }
 0x3b5   :  { %v369_v47 = vmax.f32 %v364_v43, %v368_v45  ;;  %v377_v48 = vmax.f32 %v365_v44, %v376_v46  ;;  %v389_v60 = vunpack.c.0.s8 %v388_v52 }
 0x3b6   :  { %v412_v49 = vpop.permute.xlu0 %411  ;;  %v426_v50 = vpop.permute.xlu1 %425 }
 0x3b7   :  { %v370_v24 = vrot.slane %v369_v47, 4  ;;  %v378_v51 = vrot.slane %v377_v48, 4  ;;  %v416_v13 = vsel %vm157_vm2, %v578_v36, %v412_v49  ;;  %v430_v6 = vmul.f32 %v426_v50, %v120_v20 }
 0x3b8   :  { %419 = vst.msk [vmem:[#allocation11 + $0x8] sm:$0x1] %vm418_vm9, %v416_v13  ;;  %v431_v14 = vmul.f32 %v426_v50, %v121_v21 }
 0x3b9   :  { %v371_v15 = vmax.f32 %v369_v47, %v370_v24  ;;  %v379_v53 = vmax.f32 %v377_v48, %v378_v51  ;;  %v432_v61 = vsel %vm99_vm0, %v430_v6, -inf }
 0x3ba   :  { %v471_v54 = vpop.permute.xlu0 %470  ;;  %v422_v55 = vpop.permute.xlu1 %421  ;;  %v440_v20 = vsel %vm99_vm0, %v431_v14, -inf }
 0x3bb   :  { %v372_v56 = vrot.slane %v371_v15, 2  ;;  %v380_v57 = vrot.slane %v379_v53, 2  ;;  %v428_v58 = vmul.f32 %v422_v55, %v118_v7  ;;  %v429_v59 = vmul.f32 %v422_v55, %v119_v8 }
 0x3bc   :  { %v392_v7 = vsub.s32 %v389_v60, %v838_v1 }
 0x3bd   :  { %v373_v62 = vmax.f32 %v371_v15, %v372_v56  ;;  %v381_v12 = vmax.f32 %v379_v53, %v380_v57  ;;  %v433_v21 = vmax.f32 %v428_v58, %v432_v61  ;;  %v441_v63 = vmax.f32 %v429_v59, %v440_v20 }
 0x3be   :  { %v477_v2 = vpop.permute.xlu0 %476  ;;  %v410_v3 = vpop.permute.xlu1 %409 }
 0x3bf   :  { %v374_v5 = vrot.slane %v373_v62, 1  ;;  %v382_v9 = vrot.slane %v381_v12, 1  ;;  %v434_v10 = vrot.slane %v433_v21, 4  ;;  %v442_v11 = vrot.slane %v441_v63, 4 }
 0x3c0   :  { %v481_v4 = vsel %vm157_vm2, %v471_v54, %v477_v2  ;;  %v415_v8 = vsel %vm157_vm2, %v580_v37, %v410_v3 }
 0x3c1   :  { %v375_v16 = vmax.f32 %v373_v62, %v374_v5  ;;  %v383_v17 = vmax.f32 %v381_v12, %v382_v9  ;;  %v435_v18 = vmax.f32 %v433_v21, %v434_v10  ;;  %v443_v19 = vmax.f32 %v441_v63, %v442_v11  ;;  %484 = vst.msk [vmem:[#allocation11 + $0x18] sm:$0x1] %vm418_vm9, %v481_v4 }
 0x3c2   :  { %417 = vst.msk [vmem:[#allocation11] sm:$0xff] %vm160_vm3, %v415_v8  ;;  %v469_v22 = vpop.permute.xlu1 %468 }
 0x3c3   :  { %v386_v23 = vcombine.low %v375_v16, %v383_v17  ;;  %v436_v26 = vrot.slane %v435_v18, 2  ;;  %v444_v27 = vrot.slane %v443_v19, 2 }
 0x3c5   :  { %v437_v28 = vmax.f32 %v435_v18, %v436_v26  ;;  %v445_v1 = vmax.f32 %v443_v19, %v444_v27  ;;  %v393_v29 = vrot.slane %v386_v23, %v392_v7 }
 0x3c6   :  { %v475_v30 = vpop.permute.xlu1 %474 }
 0x3c7   :  { %v438_v32 = vrot.slane %v437_v28, 1  ;;  %v446_v33 = vrot.slane %v445_v1, 1  ;;  %v480_v34 = vsel %vm157_vm2, %v469_v22, %v475_v30  ;;  %v400_v35 = vrot.slane %v393_v29, %v392_v7 }
 0x3c8   :  { %483 = vst.msk [vmem:[#allocation11 + $0x10] sm:$0xff] %vm160_vm3, %v480_v34 }
 0x3c9   :  { %v439_v36 = vmax.f32 %v437_v28, %v438_v32  ;;  %v447_v37 = vmax.f32 %v445_v1, %v446_v33  ;;  %406 = vst.msk [vmem:[#allocation10] sm:$0x3] %vm923_vm10, %v400_v35 }
 0x3ca   :  { %680 = shalt.err (!%p677_p8)
}
 0x3cb   :  { %s681_s27 = scalar_lea.hbm %s968_s5, 512 }
 0x3cc   :  { %p682_p9 = scmp.ne.s32.totalorder %s968_s5, %s681_s27  ;;  %p685_p10 = scmp.lt.u32.totalorder %s681_s27, %s968_s5 }
 0x3ce   :  { %p687_p11 = pnand %p685_p10, %p682_p9 }
 0x3d0   :  { %690 = shalt.err (!%p687_p11)
}
 0x3d1   :  { %508 = dma.vmem_to_hbm [thread:$0]  %s503_s23, 512, %s968_s5, [#allocation12], %s727_s1, %s727_s1, %s728_s17   ;;  %v450_v0 = vcombine.low %v439_v36, %v447_v37 }
 0x3d2   :  { %s742_s10 = smov [#allocation10]  }
 0x3d3   :  { %s490_s11 = sshll.u32 %s742_s10, 4  ;;  %v457_v38 = vrot.slane %v450_v0, %v392_v7  ;;  %s491_s11 = int_to_ptr.vmem [resolvable:$true] %s490_s11 }
 0x3d4   :  { %s691_s12 = scalar_lea.vmem %s491_s11, 64  ;;  %p696_p13 = scmp.lt.s32.totalorder %s491_s11, %s491_s11 }
 0x3d5   :  { %v464_v39 = vrot.slane %v457_v38, %v392_v7  ;;  %p692_p12 = scmp.ne.s32.totalorder %s491_s11, %s691_s12  ;;  %p697_p0 = scmp.lt.s32.totalorder %s691_s12, %s691_s12 }
 0x3d7   :  { %467 = vst.msk [vmem:[#allocation10 + $0x2] sm:$0x3] %vm923_vm10, %v464_v39  ;;  %p698_p1 = por %p697_p0, %p696_p13 }
 0x3d9   :  { %p699_p2 = pnand %p698_p1, %p692_p12 }
 0x3db   :  { %702 = shalt.err (!%p699_p2)
}
 0x3dc   :  { %s703_s5 = scalar_lea.hbm %s967_s4, 64 }
 0x3dd   :  { %p704_p3 = scmp.ne.s32.totalorder %s967_s4, %s703_s5  ;;  %p707_p4 = scmp.lt.u32.totalorder %s703_s5, %s967_s4 }
 0x3df   :  { %p709_p5 = pnand %p707_p4, %p704_p3 }
 0x3e1   :  { %712 = shalt.err (!%p709_p5)
}
 0x3e2   :  { %496 = dma.vmem_to_hbm [thread:$0]  %s491_s11, 64, %s967_s4, [#allocation4], %s724_s28, %s724_s28, %s725_s29  }
 0x3e3   :  { %719 = dma.done.wait [#allocation4], 64  }
 0x3e4   :  { %720 = vsyncadd [#allocation4], 4294967232 }
 0x3e5   :  { %721 = dma.done.wait [#allocation12], 512  }
 0x3e6   :  { %722 = vsyncadd [#allocation12], 4294966784 }
 0x3e7   :  { %515 = vsyncpa [#allocation3], 1 }
 0x3e8   :  { %516 = vsyncpa [#allocation6], 1 }
 0x3e9   :  { %517 = vsyncpa [#allocation9], 1 }
 0x3ea   :  { %518 = vsyncpa [#allocation4], 1 }
 0x3eb   :  { %519 = vsyncpa [#allocation12], 1 }

// kernel: channel_attn_unet_forward.10
= control target key start
LH: loop header
LB: loop body
LE: loop exit
PB: predicated region body
PF: predicated region fallthrough
CT: control target
= control target key end

     0   :  { %s2006_s0 = inlined_call_operand.hbm [shape: bf16[2,16,512], index: 0, kind: input, shape index: {}]   ;;  %s2007_s1 = inlined_call_operand.hbm [shape: bf16[16,144], index: 1, kind: input, shape index: {}]   ;;  %s2008_s2 = inlined_call_operand.hbm [shape: f32[16,1], index: 2, kind: input, shape index: {}]   ;;  %s2009_s3 = inlined_call_operand.hbm [shape: f32[1,512], index: 3, kind: input, shape index: {}]   ;;  %s2010_s4 = inlined_call_operand.hbm [shape: bf16[8,144], index: 4, kind: input, shape index: {}]   ;;  %s2011_s5 = inlined_call_operand.hbm [shape: f32[8,1], index: 5, kind: input, shape index: {}]   ;;  %s2012_s6 = inlined_call_operand.hbm [shape: bf16[2,8,384], index: 6, kind: output, shape index: {}]  }
   0x1   :  { %2018 = sst [smem:[#allocation19_spill]] %s2007_s1 }
   0x2   :  { %11 = vsyncpa [#allocation3], 0 }
   0x3   :  { %13 = vsyncpa [#allocation3 + $0x1], 0 }
   0x4   :  { %14 = vsyncpa [#allocation6], 0 }
   0x5   :  { %15 = vsyncpa [#allocation9], 0 }
   0x6   :  { %16 = vsyncpa [#allocation12], 0 }
   0x7   :  { %17 = vsyncpa [#allocation4], 0 }
   0x8   :  { %19 = vsyncpa [#allocation4 + $0x1], 0  ;;  %s1538_s21 = smov 0   ;;  %s1540_s22 = smov 0  }
   0x9   :  { %s1542_s23 = smov 0   ;;  %s1544_s24 = smov 0  }
   0xa   :  { %s1546_s25 = smov 0   ;;  %s1548_s26 = smov 0  }
   0xb LB: > { %s2013_s27 = sadd.s32 4294967295, %s1481_s26   ;;  %p1039_p0 = scmp.ge.s32.totalorder %s1481_s26, 1  ;;  %s1481_s26 = sphi %s1548_s26, %s25_s26   ;;  %s1477_s25 = sphi %s1546_s25, %s2040_s25   ;;  %s1473_s24 = sphi %s1544_s24, %s2039_s24   ;;  %s1469_s23 = sphi %s1542_s23, %s2038_s23   ;;  %s1465_s22 = sphi %s1540_s22, %s2037_s22   ;;  %s1461_s21 = sphi %s1538_s21, %s2036_s21  }
   0xc   : > { %p1572_p1 = scmp.eq.s32.totalorder %s2013_s27, 0  ;;  %p201_p2 = scmp.lt.s32.totalorder %s1481_s26, 3 }
   0xd   : > { %s1483_s30 = smov [#allocation5]   ;;  %s1484_s9 = smov [#allocation8]  }
   0xe   : > { %s2019_s28 = scalar_select %p1572_p1, 1, 0 }
   0xf   : > { %p1577_p3 = pnand %p1039_p0, %p201_p2  ;;  %s213_s7 = sshll.u32 %s1483_s30, 4  ;;  %s1581_s7 = int_to_ptr.vmem [resolvable:$true] %s213_s7 }
  0x10   : > { %s240_s10 = sshll.u32 %s1484_s9, 4  ;;  %s1485_s11 = smov [#allocation7]   ;;  %s1592_s10 = int_to_ptr.vmem [resolvable:$true] %s240_s10 }
  0x11   : > { %s2020_s29 = scalar_select %p1577_p3, 1, 0 }
  0x12   : > { %p1102_p4 = pneg %p1577_p3  ;;  %s1594_s12 = sshll.u32 %s1485_s11, 4  ;;  %s227_s12 = int_to_ptr.vmem [resolvable:$true] %s1594_s12 }
  0x13   : > { %s2022_s1 = sld [smem:[#allocation19_spill]] }
  0x14   : > { %p1588_p6 = pnand %p1102_p4, %p1572_p1 }
  0x16   : > { %p1604_p8 = pneg %p1588_p6 }
  0x19   : > { %s1217_s15 = scalar_lea.hbm %s2022_s1, 256 }
  0x1a   : > { %p1218_p7 = scmp.ne.s32.totalorder %s2022_s1, %s1217_s15  ;;  %p1224_p11 = scmp.lt.u32.totalorder %s1217_s15, %s2022_s1 }
  0x1c   : > { %p1220_p9 = pnand %p1604_p8, %p1218_p7 }
  0x1e   : > { %p1221_p10 = pneg %p1220_p9 }
  0x20   : > { %p1226_p12 = pnand %p1224_p11, %p1221_p10 }
  0x22   : > { %1229 = shalt.err (!%p1226_p12)
}
  0x23   : > { %s1230_s30 = scalar_lea.vmem %s1581_s7, 256  ;;  %p1238_p4 = scmp.lt.s32.totalorder %s1581_s7, %s1581_s7 }
  0x24   : > { %p1231_p13 = scmp.ne.s32.totalorder %s1581_s7, %s1230_s30  ;;  %p1239_p5 = scmp.lt.s32.totalorder %s1230_s30, %s1230_s30 }
  0x26   : > { %p1233_p0 = pnand %p1231_p13, %p1604_p8  ;;  %p1240_p7 = por %p1239_p5, %p1238_p4 }
  0x28   : > { %p1234_p2 = pneg %p1233_p0 }
  0x2a   : > { %p1241_p9 = pnand %p1240_p7, %p1234_p2 }
  0x2c   : > { %1244 = shalt.err (!%p1241_p9)
}
  0x2d   : > { %s1486_s9 = smov 128   ;;  %s1487_s11 = smov 8  }
  0x2e   : > { %1105 = dma.hbm_to_vmem [thread:$0]  (!%p1588_p6), %s2022_s1, 256, %s1581_s7, [#allocation6], %s1486_s9, %s1486_s9, %s1487_s11  }
  0x2f   : > { %s1245_s17 = scalar_lea.hbm %s2009_s3, 64 }
  0x30   : > { %p1246_p5 = scmp.ne.s32.totalorder %s2009_s3, %s1245_s17  ;;  %p1252_p12 = scmp.lt.u32.totalorder %s1245_s17, %s2009_s3 }
  0x32   : > { %p1248_p10 = pnand %p1246_p5, %p1604_p8 }
  0x34   : > { %p1249_p11 = pneg %p1248_p10 }
  0x36   : > { %p1254_p13 = pnand %p1252_p12, %p1249_p11 }
  0x38   : > { %1257 = shalt.err (!%p1254_p13)
}
  0x39   : > { %s1258_s7 = scalar_lea.vmem %s1592_s10, 64  ;;  %p1266_p7 = scmp.lt.s32.totalorder %s1592_s10, %s1592_s10 }
  0x3a   : > { %p1259_p0 = scmp.ne.s32.totalorder %s1592_s10, %s1258_s7  ;;  %p1267_p9 = scmp.lt.s32.totalorder %s1258_s7, %s1258_s7 }
  0x3c   : > { %p1261_p2 = pnand %p1259_p0, %p1604_p8  ;;  %p1268_p5 = por %p1267_p9, %p1266_p7 }
  0x3e   : > { %p1262_p4 = pneg %p1261_p2 }
  0x40   : > { %p1269_p10 = pnand %p1268_p5, %p1262_p4 }
  0x42   : > { %1272 = shalt.err (!%p1269_p10)
}
  0x43   : > { %1111 = dma.hbm_to_vmem [thread:$0]  (!%p1588_p6), %s2009_s3, 64, %s1592_s10, [#allocation9]  }
  0x44   : > { %s1273_s16 = scalar_lea.hbm %s2008_s2, 256 }
  0x45   : > { %p1274_p11 = scmp.ne.s32.totalorder %s2008_s2, %s1273_s16  ;;  %p1280_p0 = scmp.lt.u32.totalorder %s1273_s16, %s2008_s2 }
  0x47   : > { %p1276_p12 = pnand %p1274_p11, %p1604_p8 }
  0x49   : > { %p1277_p13 = pneg %p1276_p12 }
  0x4b   : > { %p1282_p2 = pnand %p1280_p0, %p1277_p13 }
  0x4d   : > { %1285 = shalt.err (!%p1282_p2)
}
  0x4e   : > { %s1286_s7 = scalar_lea.vmem %s227_s12, 256  ;;  %p1294_p5 = scmp.lt.s32.totalorder %s227_s12, %s227_s12 }
  0x4f   : > { %p1287_p4 = scmp.ne.s32.totalorder %s227_s12, %s1286_s7  ;;  %p1295_p10 = scmp.lt.s32.totalorder %s1286_s7, %s1286_s7 }
  0x51   : > { %p1289_p7 = pnand %p1287_p4, %p1604_p8  ;;  %p1296_p3 = por %p1295_p10, %p1294_p5 }
  0x53   : > { %p1290_p9 = pneg %p1289_p7 }
  0x55   : > { %p1297_p1 = pnand %p1296_p3, %p1290_p9 }
  0x57   : > { %1300 = shalt.err (!%p1297_p1)
}
  0x58   : > { %1108 = dma.hbm_to_vmem [thread:$0]  (!%p1588_p6), %s2008_s2, 256, %s227_s12, [#allocation6], %s1486_s9, %s1486_s9, %s1487_s11  }
  0x59   : > { %s1488_s13 = smov [#allocation10]   ;;  %s1489_s15 = smov [#allocation11]  }
  0x5a   : > { %s251_s14 = sshll.u32 %s1488_s13, 4  ;;  %s262_s16 = sshll.u32 %s1489_s15, 4  ;;  %s252_s14 = int_to_ptr.vmem [resolvable:$true] %s251_s14  ;;  %s263_s16 = int_to_ptr.vmem [resolvable:$true] %s262_s16 }
  0x5b   : > { %s1301_s20 = scalar_lea.hbm %s2010_s4, 128 }
  0x5c   : > { %p1302_p1 = scmp.ne.s32.totalorder %s2010_s4, %s1301_s20  ;;  %p1308_p12 = scmp.lt.u32.totalorder %s1301_s20, %s2010_s4 }
  0x5e   : > { %p1304_p3 = pnand %p1302_p1, %p1604_p8 }
  0x60   : > { %p1305_p11 = pneg %p1304_p3 }
  0x62   : > { %p1310_p13 = pnand %p1308_p12, %p1305_p11 }
  0x64   : > { %1313 = shalt.err (!%p1310_p13)
}
  0x65   : > { %s1314_s12 = scalar_lea.vmem %s252_s14, 128  ;;  %p1322_p7 = scmp.lt.s32.totalorder %s252_s14, %s252_s14 }
  0x66   : > { %p1315_p0 = scmp.ne.s32.totalorder %s252_s14, %s1314_s12  ;;  %p1323_p9 = scmp.lt.s32.totalorder %s1314_s12, %s1314_s12 }
  0x68   : > { %p1317_p2 = pnand %p1315_p0, %p1604_p8  ;;  %p1324_p5 = por %p1323_p9, %p1322_p7 }
  0x6a   : > { %p1318_p4 = pneg %p1317_p2 }
  0x6c   : > { %p1325_p10 = pnand %p1324_p5, %p1318_p4 }
  0x6e   : > { %1328 = shalt.err (!%p1325_p10)
}
  0x6f   : > { %1114 = dma.hbm_to_vmem [thread:$0]  (!%p1588_p6), %s2010_s4, 128, %s252_s14, [#allocation9]  }
  0x70   : > { %s1329_s13 = scalar_lea.hbm %s2011_s5, 128 }
  0x71   : > { %p1330_p1 = scmp.ne.s32.totalorder %s2011_s5, %s1329_s13  ;;  %p1336_p12 = scmp.lt.u32.totalorder %s1329_s13, %s2011_s5 }
  0x73   : > { %p1332_p3 = pnand %p1330_p1, %p1604_p8 }
  0x75   : > { %p1333_p11 = pneg %p1332_p3 }
  0x77   : > { %p1338_p13 = pnand %p1336_p12, %p1333_p11 }
  0x79   : > { %1341 = shalt.err (!%p1338_p13)
}
  0x7a   : > { %s1342_s30 = scalar_lea.vmem %s263_s16, 128  ;;  %p1350_p7 = scmp.lt.s32.totalorder %s263_s16, %s263_s16 }
  0x7b   : > { %p1343_p0 = scmp.ne.s32.totalorder %s263_s16, %s1342_s30  ;;  %p1351_p9 = scmp.lt.s32.totalorder %s1342_s30, %s1342_s30 }
  0x7d   : > { %p1345_p2 = pnand %p1343_p0, %p1604_p8  ;;  %p1352_p5 = por %p1351_p9, %p1350_p7 }
  0x7f   : > { %p1346_p4 = pneg %p1345_p2 }
  0x81   : > { %p1353_p10 = pnand %p1352_p5, %p1346_p4 }
  0x83   : > { %1356 = shalt.err (!%p1353_p10)
}
  0x84   : > { %1117 = dma.hbm_to_vmem [thread:$0]  (!%p1588_p6), %s2011_s5, 128, %s263_s16, [#allocation12]  }
  0x85   : > { %s1038_s18 = sadd.s32 4294967294, %s1481_s26   ;;  %s37_s10 = sadd.s32 1, %s1477_s25 }
  0x86   : > { %s44_s8 = sadd.s32 1, %s1469_s23  ;;  %p39_p8 = scmp.ge.s32.totalorder %s37_s10, 2 }
  0x87   : > { %p51_p1 = scmp.ne.s32.totalorder %s1469_s23, %s1465_s22  ;;  %p52_p3 = scmp.eq.s32.totalorder %s1481_s26, 0 }
  0x88   : > { %p57_p11 = scmp.ne.s32.totalorder %s1465_s22, %s1461_s21  ;;  %s2042_s10 = smov (%p39_p8, %s37_s10), 0 }
  0x89   : > { %p1719_p12 = por %p52_p3, %p51_p1  ;;  %p2025_p13 = scmp.ne.s32.totalorder %s2019_s28, 0 }
  0x8a   : > { %s41_s9 = ssub.s32 %s1477_s25, %s2042_s10  ;;  %s2027_s11 = sadd.s32 4294967295, %s1481_s26  }
  0x8b   : > { %p1725_p6 = por %p2025_p13, %p57_p11  ;;  %p188_p0 = scmp.eq.s32.totalorder %s2027_s11, 1 }
  0x8c   : > { %p42_p2 = scmp.eq.s32.totalorder %s41_s9, 0  ;;  %p194_p4 = scmp.eq.s32.totalorder %s1038_s18, 1 }
  0x8d   : > { %p1733_p7 = por %p188_p0, %p51_p1  ;;  %p1131_p9 = scmp.lt.s32.totalorder %s1481_s26, 2 }
  0x8e   : > { %s1739_s27 = scalar_select %p42_p2, %s1469_s23, %s44_s8  }
  0x8f   : > { %s2028_s1 = scalar_select %p1733_p7, 1, 0 }
  0x90   : > { %p1741_p5 = por %p194_p4, %p57_p11  ;;  %s273_s15 = sand.u32 1, %s1469_s23  }
  0x91   : > { %s1046_s17 = sshll.u32 %s273_s15, 5  ;;  %s1073_s19 = sshll.u32 %s1477_s25, 9 }
  0x92   : > { %s2029_s13 = scalar_select %p1741_p5, 1, 0 }
  0x93   : > { %s1750_s14 = scalar_lea.hbm %s2006_s0, %s1073_s19  ;;  %s277_s7 = scalar_lea.vmem [#allocation2], %s1046_s17 }
  0x94   : > { %s284_s18 = sshll.u32 %s277_s7, 4  ;;  %p1756_p10 = pnand %p1131_p9, %p1719_p12  ;;  %s1752_s18 = int_to_ptr.vmem [resolvable:$true] %s284_s18 }
  0x95   : > { %s1760_s9 = scalar_lea.sflag [#allocation3], %s273_s15  ;;  %s1357_s11 = scalar_lea.hbm %s1750_s14, 512 }
  0x96   : > { %p1358_p8 = scmp.ne.s32.totalorder %s1750_s14, %s1357_s11  ;;  %p1359_p1 = pneg %p1756_p10 }
  0x97   : > { %s1362_s12 = scalar_lea.hbm %s2006_s0, 1024  ;;  %p1363_p12 = scmp.lt.u32.totalorder %s1750_s14, %s2006_s0 }
  0x98   : > { %p1360_p3 = pnand %p1359_p1, %p1358_p8  ;;  %p1364_p13 = scmp.lt.u32.totalorder %s1362_s12, %s1357_s11 }
  0x99   : > { %p1366_p2 = scmp.lt.u32.totalorder %s1357_s11, %s1750_s14 }
  0x9a   : > { %p1361_p11 = pneg %p1360_p3  ;;  %p1365_p0 = por %p1364_p13, %p1363_p12 }
  0x9c   : > { %p1367_p4 = por %p1366_p2, %p1365_p0 }
  0x9e   : > { %p1368_p9 = pnand %p1367_p4, %p1361_p11 }
  0xa0   : > { %1371 = shalt.err (!%p1368_p9)
}
  0xa1   : > { %s1372_s15 = scalar_lea.vmem %s1752_s18, 512  ;;  %s1490_s7 = smov [#allocation2]  }
  0xa2   : > { %p1373_p8 = scmp.ne.s32.totalorder %s1752_s18, %s1372_s15  ;;  %s1377_s17 = sshll.u32 %s1490_s7, 4  ;;  %s1378_s17 = int_to_ptr.vmem [resolvable:$false] %s1377_s17 }
  0xa3   : > { %s1379_s19 = scalar_lea.vmem %s1378_s17, 1024  ;;  %p1380_p7 = scmp.lt.s32.totalorder %s1752_s18, %s1378_s17 }
  0xa4   : > { %p1375_p3 = pnand %p1373_p8, %p1359_p1  ;;  %p1381_p12 = scmp.lt.s32.totalorder %s1379_s19, %s1372_s15 }
  0xa6   : > { %p1376_p5 = pneg %p1375_p3  ;;  %p1382_p13 = por %p1381_p12, %p1380_p7 }
  0xa8   : > { %p1383_p0 = pnand %p1382_p13, %p1376_p5 }
  0xaa   : > { %1386 = shalt.err (!%p1383_p0)
}
  0xab   : > { %s1491_s11 = smov 256   ;;  %s1492_s12 = smov 16  }
  0xac   : > { %1121 = dma.hbm_to_vmem [thread:$0]  (!%p1756_p10), %s1750_s14, 512, %s1752_s18, %s1760_s9, %s1491_s11, %s1491_s11, %s1492_s12  }
  0xad   : > { %p2031_p1 = scmp.ne.s32.totalorder %s2020_s29, 0 }
  0xae   : > { %s1791_s20 = sand.u32 (!%p2031_p1), 1, %s1465_s22  }
  0xaf   : > { %296 = sbr.rel (%p2031_p1) target bundleno = 1005 (0x3ed), region = 44  ;;  %s1050_s30 = sshll.u32 (!%p2031_p1), %s1791_s20, 5 }
  0xb0   : > { %s299_s15 = scalar_lea.sflag (!%p2031_p1), [#allocation3], %s1791_s20  ;;  %s302_s7 = scalar_lea.vmem (!%p2031_p1), [#allocation2], %s1050_s30 }
  0xb6   : > { %1440 = dma.done.wait (%p1725_p6), %s299_s15, 512  }
  0xb7   : > { %1442 = vsyncadd (%p1725_p6), %s299_s15, 4294966784  ;;  %p2032_p7 = scmp.ne.s32.totalorder %s2019_s28, 0 }
  0xb9   : > { %1444 = dma.done.wait (%p2032_p7), [#allocation6], 512  }
  0xba   : > { %1446 = vsyncadd (%p2032_p7), [#allocation6], 4294966784 }
  0xbb   : > { %1448 = dma.done.wait (%p2032_p7), [#allocation9], 192  }
  0xbc   : > { %1450 = vsyncadd (%p2032_p7), [#allocation9], 4294967104 }
  0xbd   : > { %1452 = dma.done.wait (%p2032_p7), [#allocation12], 128  }
  0xbe   : > { %1454 = vsyncadd (%p2032_p7), [#allocation12], 4294967168  ;;  %v1206_v0 = vld [vmem:[%s302_s7 + $0x4] ss:$16 sps:$4 sm:$0xff]   ;;  %v1208_v1 = vld [vmem:[%s302_s7] ss:$16 sps:$4 sm:$0xff]  }
  0xbf   : > { %s1493_s29 = smov 127   ;;  %v1209_v2 = vld [vmem:[%s302_s7 + $0x8] ss:$16 sps:$4 sm:$0xff]   ;;  %v1211_v3 = vld [vmem:[%s302_s7 + $0xc] ss:$16 sps:$4 sm:$0xff]   ;;  %533 = vmatprep.subr.bf16.mxu0 %v1206_v0  ;;  %s1494_s16 = smov 126  }
  0xc0   : > { %380 = vrot.lane.b32.xlu0 %v1206_v0, %s1493_s29  ;;  %378 = vrot.lane.b32.xlu1 %v1208_v1, %s1493_s29  ;;  %s1495_s28 = smov 108   ;;  %s1496_s14 = smov 107   ;;  %v1214_v4 = vld [vmem:[#allocation5 + $0x4] ss:$8 sps:$4 sm:$0xff]   ;;  %vm529_vm0 = vcmask 130048   ;;  %v1500_v5 = vmov 0  }
  0xc1   : > { %534 = vmatpush1.bf16.msra.mxu0 %v1208_v1  ;;  %576 = vmatprep.subr.bf16.mxu1 %v1211_v3  ;;  %s1497_s18 = smov 106   ;;  %s1498_s8 = smov 88   ;;  %v508_v6 = vld [vmem:[#allocation7] sm:$0xff]  ;;  %v509_v7 = vld [vmem:[#allocation7 + $0x8] sm:$0xff]  ;;  %vm386_vm1 = vcmask 1039360   ;;  %vm402_vm2 = vcmask 1031168  }
  0xc2   : > { %577 = vmatpush1.bf16.msra.mxu1 %v1209_v2  ;;  %s1499_s9 = smov 87   ;;  %1062 = vmatprep.mubr.msk.bf16.mxu0 %vm529_vm0, %v1214_v4  ;;  %s1501_s17 = smov 86   ;;  %vm418_vm3 = vcmask 883712   ;;  %vm434_vm4 = vcmask 875520   ;;  %vm450_vm5 = vcmask 867328   ;;  %vm466_vm6 = vcmask 719872  }
  0xc3   : > { %1063 = vmatprep.mubr.msk.bf16.mxu1 %vm529_vm0, %v1214_v4  ;;  %1204 = vset.pattern.permute.xlu0 %v1500_v5  ;;  %vm482_vm7 = vcmask 711680   ;;  %vm498_vm8 = vcmask 703488   ;;  %v1212_v63 = vld [vmem:[#allocation5] ss:$8 sps:$4 sm:$0xff]   ;;  %s1076_s19 = smul.u32 12, %s1791_s20  ;;  %p2033_p5 = scmp.ne.s32.totalorder %s2028_s1, 0 }
  0xc4   : > { %382 = vrot.lane.b32.xlu0 %v1209_v2, %s1493_s29  ;;  %384 = vrot.lane.b32.xlu1 %v1211_v3, %s1493_s29  ;;  %s1077_s11 = smul.u32 192, %s1473_s24  ;;  %s892_s24 = scalar_lea.sflag [#allocation4], %s1791_s20 }
  0xc5   : > { %1205 = vset.pattern.permute.xlu1 %v1500_v5  ;;  %s350_s12 = scalar_lea.vmem [#allocation13], %s1076_s19 }
  0xc6   : > { %s908_s30 = sshll.u32 %s350_s12, 4  ;;  %s1959_s30 = int_to_ptr.vmem [resolvable:$true] %s908_s30 }
  0xc8   : > { %396 = vrot.lane.b32.xlu0 %v1206_v0, %s1494_s16  ;;  %398 = vrot.lane.b32.xlu1 %v1209_v2, %s1494_s16 }
  0xcc   : > { %394 = vrot.lane.b32.xlu0 %v1208_v1, %s1494_s16  ;;  %400 = vrot.lane.b32.xlu1 %v1211_v3, %s1494_s16 }
  0xd0   : > { %412 = vrot.lane.b32.xlu0 %v1206_v0, %s1495_s28  ;;  %414 = vrot.lane.b32.xlu1 %v1209_v2, %s1495_s28 }
  0xd4   : > { %410 = vrot.lane.b32.xlu0 %v1208_v1, %s1495_s28  ;;  %416 = vrot.lane.b32.xlu1 %v1211_v3, %s1495_s28 }
  0xd8   : > { %428 = vrot.lane.b32.xlu0 %v1206_v0, %s1496_s14  ;;  %430 = vrot.lane.b32.xlu1 %v1209_v2, %s1496_s14 }
  0xdc   : > { %426 = vrot.lane.b32.xlu0 %v1208_v1, %s1496_s14  ;;  %432 = vrot.lane.b32.xlu1 %v1211_v3, %s1496_s14 }
  0xe0   : > { %444 = vrot.lane.b32.xlu0 %v1206_v0, %s1497_s18  ;;  %446 = vrot.lane.b32.xlu1 %v1209_v2, %s1497_s18 }
  0xe4   : > { %442 = vrot.lane.b32.xlu0 %v1208_v1, %s1497_s18  ;;  %448 = vrot.lane.b32.xlu1 %v1211_v3, %s1497_s18 }
  0xe8   : > { %460 = vrot.lane.b32.xlu0 %v1206_v0, %s1498_s8  ;;  %462 = vrot.lane.b32.xlu1 %v1209_v2, %s1498_s8 }
  0xec   : > { %458 = vrot.lane.b32.xlu0 %v1208_v1, %s1498_s8  ;;  %464 = vrot.lane.b32.xlu1 %v1211_v3, %s1498_s8 }
  0xf0   : > { %476 = vrot.lane.b32.xlu0 %v1206_v0, %s1499_s9  ;;  %478 = vrot.lane.b32.xlu1 %v1209_v2, %s1499_s9 }
  0xf4   : > { %474 = vrot.lane.b32.xlu0 %v1208_v1, %s1499_s9  ;;  %480 = vrot.lane.b32.xlu1 %v1211_v3, %s1499_s9 }
  0xf8   : > { %492 = vrot.lane.b32.xlu0 %v1206_v0, %s1501_s17  ;;  %494 = vrot.lane.b32.xlu1 %v1209_v2, %s1501_s17 }
  0xfc   : > { %490 = vrot.lane.b32.xlu0 %v1208_v1, %s1501_s17  ;;  %496 = vrot.lane.b32.xlu1 %v1211_v3, %s1501_s17  ;;  %v628_v1 = vlaneseq }
  0xfe   : > { %v629_v2 = vshrl.u32 %v628_v1, 7 }
 0x100   : > { %512 = vperm.xlu0 %1204, %v508_v6   ;;  %517 = vperm.xlu1 %1205, %v509_v7   ;;  %v630_v4 = vsub.s32 0, %v629_v2  ;;  %v638_v6 = vsub.s32 2, %v629_v2  ;;  %v357_v7 = vld [vmem:[#allocation8] sm:$0xf] }
 0x132   : > { %v381_v8 = vpop.permute.xlu0 %380  ;;  %v379_v9 = vpop.permute.xlu1 %378 }
 0x133   : > { %v387_v14 = vsel %vm386_vm1, %v379_v9, %v381_v8 }
 0x136   : > { %v383_v10 = vpop.permute.xlu0 %382  ;;  %v385_v11 = vpop.permute.xlu1 %384 }
 0x137   : > { %v388_v12 = vsel %vm386_vm1, %v381_v8, %v383_v10  ;;  %578 = vmatprep.subr.bf16.mxu1 %v385_v11  ;;  %v389_v13 = vsel %vm386_vm1, %v383_v10, %v385_v11  ;;  %v634_v8 = vsub.s32 1, %v629_v2 }
 0x138   : > { %535 = vmatprep.subr.bf16.mxu0 %v388_v12  ;;  %579 = vmatpush1.bf16.msra.mxu1 %v389_v13 }
 0x139   : > { %536 = vmatpush1.bf16.msra.mxu0 %v387_v14  ;;  %v642_v14 = vsub.s32 3, %v629_v2 }
 0x13a   : > { %v397_v15 = vpop.permute.xlu0 %396  ;;  %v399_v16 = vpop.permute.xlu1 %398 }
 0x13b   : > { %v404_v17 = vsel %vm402_vm2, %v397_v15, %v399_v16 }
 0x13c   : > { %537 = vmatprep.subr.bf16.mxu0 %v404_v17  ;;  %v639_v17 = vrot.slane %v357_v7, %v638_v6 }
 0x13e   : > { %v395_v18 = vpop.permute.xlu0 %394  ;;  %v401_v19 = vpop.permute.xlu1 %400 }
 0x13f   : > { %v403_v20 = vsel %vm402_vm2, %v395_v18, %v397_v15  ;;  %580 = vmatprep.subr.bf16.mxu1 %v401_v19  ;;  %v405_v21 = vsel %vm402_vm2, %v399_v16, %v401_v19  ;;  %v631_v15 = vrot.slane %v357_v7, %v630_v4 }
 0x140   : > { %538 = vmatpush1.bf16.msra.mxu0 %v403_v20  ;;  %581 = vmatpush1.bf16.msra.mxu1 %v405_v21 }
 0x142   : > { %v413_v22 = vpop.permute.xlu0 %412  ;;  %v415_v23 = vpop.permute.xlu1 %414 }
 0x143   : > { %v420_v24 = vsel %vm418_vm3, %v413_v22, %v415_v23 }
 0x144   : > { %539 = vmatprep.subr.bf16.mxu0 %v420_v24 }
 0x146   : > { %v411_v25 = vpop.permute.xlu0 %410  ;;  %v417_v26 = vpop.permute.xlu1 %416 }
 0x147   : > { %v419_v27 = vsel %vm418_vm3, %v411_v25, %v413_v22  ;;  %582 = vmatprep.subr.bf16.mxu1 %v417_v26  ;;  %v421_v28 = vsel %vm418_vm3, %v415_v23, %v417_v26  ;;  %v635_v22 = vrot.slane %v357_v7, %v634_v8 }
 0x148   : > { %540 = vmatpush1.bf16.msra.mxu0 %v419_v27  ;;  %583 = vmatpush1.bf16.msra.mxu1 %v421_v28 }
 0x14a   : > { %v429_v29 = vpop.permute.xlu0 %428  ;;  %v431_v30 = vpop.permute.xlu1 %430 }
 0x14b   : > { %v436_v31 = vsel %vm434_vm4, %v429_v29, %v431_v30 }
 0x14c   : > { %541 = vmatprep.subr.bf16.mxu0 %v436_v31 }
 0x14e   : > { %v427_v32 = vpop.permute.xlu0 %426  ;;  %v433_v33 = vpop.permute.xlu1 %432 }
 0x14f   : > { %v435_v34 = vsel %vm434_vm4, %v427_v32, %v429_v29  ;;  %584 = vmatprep.subr.bf16.mxu1 %v433_v33  ;;  %v437_v35 = vsel %vm434_vm4, %v431_v30, %v433_v33  ;;  %v643_v33 = vrot.slane %v357_v7, %v642_v14 }
 0x150   : > { %542 = vmatpush1.bf16.msra.mxu0 %v435_v34  ;;  %585 = vmatpush1.bf16.msra.mxu1 %v437_v35 }
 0x152   : > { %v445_v36 = vpop.permute.xlu0 %444  ;;  %v447_v37 = vpop.permute.xlu1 %446 }
 0x153   : > { %v452_v38 = vsel %vm450_vm5, %v445_v36, %v447_v37 }
 0x154   : > { %543 = vmatprep.subr.bf16.mxu0 %v452_v38 }
 0x156   : > { %v443_v39 = vpop.permute.xlu0 %442  ;;  %v449_v40 = vpop.permute.xlu1 %448 }
 0x157   : > { %v451_v41 = vsel %vm450_vm5, %v443_v39, %v445_v36  ;;  %586 = vmatprep.subr.bf16.mxu1 %v449_v40  ;;  %v453_v42 = vsel %vm450_vm5, %v447_v37, %v449_v40 }
 0x158   : > { %544 = vmatpush1.bf16.msra.mxu0 %v451_v41  ;;  %587 = vmatpush1.bf16.msra.mxu1 %v453_v42 }
 0x15a   : > { %v461_v43 = vpop.permute.xlu0 %460  ;;  %v463_v44 = vpop.permute.xlu1 %462 }
 0x15b   : > { %v468_v45 = vsel %vm466_vm6, %v461_v43, %v463_v44 }
 0x15c   : > { %545 = vmatprep.subr.bf16.mxu0 %v468_v45 }
 0x15e   : > { %v459_v46 = vpop.permute.xlu0 %458  ;;  %v465_v47 = vpop.permute.xlu1 %464 }
 0x15f   : > { %v467_v48 = vsel %vm466_vm6, %v459_v46, %v461_v43  ;;  %588 = vmatprep.subr.bf16.mxu1 %v465_v47  ;;  %v469_v49 = vsel %vm466_vm6, %v463_v44, %v465_v47 }
 0x160   : > { %546 = vmatpush1.bf16.msra.mxu0 %v467_v48  ;;  %589 = vmatpush1.bf16.msra.mxu1 %v469_v49 }
 0x162   : > { %v477_v50 = vpop.permute.xlu0 %476  ;;  %v479_v51 = vpop.permute.xlu1 %478 }
 0x163   : > { %v484_v52 = vsel %vm482_vm7, %v477_v50, %v479_v51 }
 0x164   : > { %547 = vmatprep.subr.bf16.mxu0 %v484_v52 }
 0x166   : > { %v475_v53 = vpop.permute.xlu0 %474  ;;  %v481_v54 = vpop.permute.xlu1 %480 }
 0x167   : > { %v483_v55 = vsel %vm482_vm7, %v475_v53, %v477_v50  ;;  %590 = vmatprep.subr.bf16.mxu1 %v481_v54  ;;  %v485_v56 = vsel %vm482_vm7, %v479_v51, %v481_v54  ;;  %v1898_v51 = vld [vmem:[#allocation10] sm:$0xff]  ;;  %v777_v53 = vld [vmem:[#allocation11] sm:$0xff] }
 0x168   : > { %548 = vmatpush1.bf16.msra.mxu0 %v483_v55  ;;  %591 = vmatpush1.bf16.msra.mxu1 %v485_v56  ;;  %v1065_v52 = vcombine.high %v1898_v51, %v1898_v51 }
 0x16a   : > { %v493_v57 = vpop.permute.xlu0 %492  ;;  %v495_v58 = vpop.permute.xlu1 %494 }
 0x16b   : > { %v500_v59 = vsel %vm498_vm8, %v493_v57, %v495_v58 }
 0x16c   : > { %549 = vmatprep.subr.bf16.mxu0 %v500_v59 }
 0x16e   : > { %v491_v60 = vpop.permute.xlu0 %490  ;;  %v497_v61 = vpop.permute.xlu1 %496 }
 0x16f   : > { %v499_v62 = vsel %vm498_vm8, %v491_v60, %v493_v57  ;;  %592 = vmatprep.subr.bf16.mxu1 %v497_v61  ;;  %v501_v0 = vsel %vm498_vm8, %v495_v58, %v497_v61 }
 0x170   : > { %550 = vmatpush1.bf16.msra.mxu0 %v499_v62  ;;  %593 = vmatpush1.bf16.msra.mxu1 %v501_v0 }
 0x171   : > { %833 = vmatprep.subr.bf16.mxu1 %v1500_v5 }
 0x173   : > { %566 = vmatmul.mubr.bf16.vlgmr.msra.gmra.mrb[0].mxu0 %v1212_v63  ;;  %609 = vmatmul.mubr.bf16.vlgmr.msra.gmra.mrb[0].mxu1 %v1212_v63 }
 0x174   : > { %1066 = vmatprep.mubr.msk.bf16.mxu0 %vm529_vm0, %v1065_v52  ;;  %1067 = vmatprep.mubr.msk.bf16.mxu1 %vm529_vm0, %v1065_v52 }
 0x17f   : > { %v513_v3 = vpop.permute.xlu0 %512  ;;  %v518_v10 = vpop.permute.xlu1 %517 }
 0x246   : > { %v567_v9 = vpop.f32.mrb[0].mxu0  ;;  %v610_v12 = vpop.f32.mrb[0].mxu1 }
 0x247   : > { %v568_v11 = vadd.f32 %v567_v9, %v513_v3  ;;  %v569_v13 = vpop.f32.mrb[1].mxu0  ;;  %v611_v16 = vadd.f32 %v610_v12, %v513_v3  ;;  %v612_v19 = vpop.f32.mrb[1].mxu1 }
 0x248   : > { %v570_v18 = vadd.f32 %v569_v13, %v513_v3  ;;  %v571_v20 = vpop.f32.mrb[2].mxu0  ;;  %v613_v23 = vadd.f32 %v612_v19, %v513_v3  ;;  %v614_v24 = vpop.f32.mrb[2].mxu1 }
 0x249   : > { %v619_v21 = vmax.f32 %v568_v11, 0.0  ;;  %v572_v25 = vadd.f32 %v571_v20, %v518_v10  ;;  %v573_v26 = vpop.f32.mrb[3].mxu0  ;;  %v621_v27 = vmax.f32 %v611_v16, 0.0  ;;  %v615_v29 = vadd.f32 %v614_v24, %v518_v10  ;;  %v616_v31 = vpop.f32.mrb[3].mxu1 }
 0x24a   : > { %v620_v28 = vmax.f32 %v570_v18, 0.0  ;;  %v574_v30 = vadd.f32 %v573_v26, %v518_v10  ;;  %v622_v32 = vmax.f32 %v613_v23, 0.0  ;;  %v617_v35 = vadd.f32 %v616_v31, %v518_v10 }
 0x24b   : > { %v623_v34 = vmax.f32 %v572_v25, 0.0  ;;  %v650_v36 = vmul.f32 %v639_v17, %v621_v27  ;;  %v625_v37 = vmax.f32 %v615_v29, 0.0  ;;  %v648_v39 = vmul.f32 %v631_v15, %v619_v21 }
 0x24c   : > { %v624_v38 = vmax.f32 %v574_v30, 0.0  ;;  %v626_v41 = vmax.f32 %v617_v35, 0.0  ;;  %v649_v42 = vmul.f32 %v635_v22, %v620_v28  ;;  %v651_v45 = vmul.f32 %v643_v33, %v622_v32 }
 0x24d   : > { %v652_v40 = vmul.f32 %v631_v15, %v623_v34  ;;  %v654_v43 = vmul.f32 %v639_v17, %v625_v37 }
 0x24e   : > { %v653_v44 = vmul.f32 %v635_v22, %v624_v38  ;;  %v655_v47 = vmul.f32 %v643_v33, %v626_v41 }
 0x24f   : > { %v656_v46 = vpack.c.bf16 %v652_v40, %v648_v39  ;;  %v658_v48 = vpack.c.bf16 %v654_v43, %v650_v36 }
 0x250   : > { %v657_v49 = vpack.c.bf16 %v653_v44, %v649_v42  ;;  %v659_v50 = vpack.c.bf16 %v655_v47, %v651_v45 }
 0x251   : > { %664 = vrot.lane.b32.xlu1 %v656_v46, %s1493_s29  ;;  %668 = vrot.lane.b32.xlu0 %v658_v48, %s1493_s29 }
 0x252   : > { %834 = vmatpush1.bf16.msra.mxu1 %v658_v48  ;;  %792 = vmatprep.subr.bf16.mxu0 %v657_v49 }
 0x253   : > { %835 = vmatprep.subr.bf16.mxu1 %v1500_v5  ;;  %793 = vmatpush1.bf16.msra.mxu0 %v656_v46 }
 0x255   : > { %678 = vrot.lane.b32.xlu1 %v656_v46, %s1494_s16  ;;  %682 = vrot.lane.b32.xlu0 %v658_v48, %s1494_s16 }
 0x259   : > { %692 = vrot.lane.b32.xlu1 %v656_v46, %s1495_s28  ;;  %696 = vrot.lane.b32.xlu0 %v658_v48, %s1495_s28 }
 0x25d   : > { %706 = vrot.lane.b32.xlu1 %v656_v46, %s1496_s14  ;;  %710 = vrot.lane.b32.xlu0 %v658_v48, %s1496_s14 }
 0x261   : > { %720 = vrot.lane.b32.xlu1 %v656_v46, %s1497_s18  ;;  %724 = vrot.lane.b32.xlu0 %v658_v48, %s1497_s18 }
 0x265   : > { %734 = vrot.lane.b32.xlu1 %v656_v46, %s1498_s8  ;;  %738 = vrot.lane.b32.xlu0 %v658_v48, %s1498_s8 }
 0x269   : > { %748 = vrot.lane.b32.xlu1 %v656_v46, %s1499_s9  ;;  %752 = vrot.lane.b32.xlu0 %v658_v48, %s1499_s9 }
 0x26d   : > { %666 = vrot.lane.b32.xlu1 %v657_v49, %s1493_s29  ;;  %766 = vrot.lane.b32.xlu0 %v658_v48, %s1501_s17 }
 0x271   : > { %680 = vrot.lane.b32.xlu1 %v657_v49, %s1494_s16  ;;  %670 = vrot.lane.b32.xlu0 %v659_v50, %s1493_s29  ;;  %s1957_s29 = scalar_lea.hbm %s2012_s6, %s1077_s11 }
 0x275   : > { %694 = vrot.lane.b32.xlu1 %v657_v49, %s1495_s28  ;;  %684 = vrot.lane.b32.xlu0 %v659_v50, %s1494_s16  ;;  %s1387_s16 = scalar_lea.vmem %s1959_s30, 192 }
 0x276   : > { %p1388_p6 = scmp.ne.s32.totalorder %s1959_s30, %s1387_s16 }
 0x278   : > { %p1389_p10 = pnand %p1388_p6, %p2033_p5 }
 0x279   : > { %708 = vrot.lane.b32.xlu1 %v657_v49, %s1496_s14  ;;  %698 = vrot.lane.b32.xlu0 %v659_v50, %s1495_s28  ;;  %s1502_s28 = smov [#allocation13]  }
 0x27a   : > { %p1390_p11 = pneg %p1389_p10 }
 0x27d   : > { %722 = vrot.lane.b32.xlu1 %v657_v49, %s1497_s18  ;;  %712 = vrot.lane.b32.xlu0 %v659_v50, %s1496_s14  ;;  %s1391_s14 = sshll.u32 %s1502_s28, 4  ;;  %s1392_s14 = int_to_ptr.vmem [resolvable:$false] %s1391_s14 }
 0x27e   : > { %p1394_p2 = scmp.lt.s32.totalorder %s1959_s30, %s1392_s14 }
 0x281   : > { %736 = vrot.lane.b32.xlu1 %v657_v49, %s1498_s8  ;;  %726 = vrot.lane.b32.xlu0 %v659_v50, %s1497_s18  ;;  %s1393_s18 = scalar_lea.vmem %s1392_s14, 384 }
 0x282   : > { %p1395_p4 = scmp.lt.s32.totalorder %s1393_s18, %s1387_s16 }
 0x284   : > { %p1396_p9 = por %p1395_p4, %p1394_p2 }
 0x285   : > { %750 = vrot.lane.b32.xlu1 %v657_v49, %s1499_s9  ;;  %740 = vrot.lane.b32.xlu0 %v659_v50, %s1498_s8 }
 0x286   : > { %p1397_p8 = pnand %p1396_p9, %p1390_p11 }
 0x289   : > { %764 = vrot.lane.b32.xlu1 %v657_v49, %s1501_s17  ;;  %754 = vrot.lane.b32.xlu0 %v659_v50, %s1499_s9 }
 0x28d   : > { %762 = vrot.lane.b32.xlu1 %v656_v46, %s1501_s17  ;;  %768 = vrot.lane.b32.xlu0 %v659_v50, %s1501_s17  ;;  %v1064_v46 = vcombine.low %v1898_v51, %v1898_v51 }
 0x291   : > { %780 = vperm.xlu1 %1205, %v777_v53  }
 0x2c3   : > { %v665_v54 = vpop.permute.xlu1 %664  ;;  %v669_v55 = vpop.permute.xlu0 %668 }
 0x2c7   : > { %v679_v56 = vpop.permute.xlu1 %678  ;;  %v683_v57 = vpop.permute.xlu0 %682 }
 0x2cb   : > { %v693_v58 = vpop.permute.xlu1 %692  ;;  %v697_v59 = vpop.permute.xlu0 %696 }
 0x2cf   : > { %v707_v60 = vpop.permute.xlu1 %706  ;;  %v711_v61 = vpop.permute.xlu0 %710 }
 0x2d3   : > { %v721_v62 = vpop.permute.xlu1 %720  ;;  %v725_v63 = vpop.permute.xlu0 %724 }
 0x2d7   : > { %v735_v0 = vpop.permute.xlu1 %734  ;;  %v739_v1 = vpop.permute.xlu0 %738 }
 0x2db   : > { %v749_v2 = vpop.permute.xlu1 %748  ;;  %v1911_v3 = vpop.permute.xlu0 %752 }
 0x2df   : > { %v667_v4 = vpop.permute.xlu1 %666  ;;  %v1913_v6 = vpop.permute.xlu0 %766 }
 0x2e0   : > { %v672_v7 = vsel %vm386_vm1, %v665_v54, %v667_v4  ;;  %v673_v8 = vsel %vm386_vm1, %v667_v4, %v669_v55 }
 0x2e1   : > { %794 = vmatprep.subr.bf16.mxu0 %v673_v8 }
 0x2e2   : > { %795 = vmatpush1.bf16.msra.mxu0 %v672_v7 }
 0x2e3   : > { %v681_v9 = vpop.permute.xlu1 %680  ;;  %v671_v10 = vpop.permute.xlu0 %670 }
 0x2e4   : > { %v686_v11 = vsel %vm402_vm2, %v679_v56, %v681_v9  ;;  %v687_v12 = vsel %vm402_vm2, %v681_v9, %v683_v57  ;;  %v674_v13 = vsel %vm386_vm1, %v669_v55, %v671_v10 }
 0x2e5   : > { %796 = vmatprep.subr.bf16.mxu0 %v687_v12  ;;  %836 = vmatpush1.bf16.msra.mxu1 %v674_v13 }
 0x2e6   : > { %797 = vmatpush1.bf16.msra.mxu0 %v686_v11  ;;  %837 = vmatprep.subr.bf16.mxu1 %v1500_v5 }
 0x2e7   : > { %v695_v14 = vpop.permute.xlu1 %694  ;;  %v685_v15 = vpop.permute.xlu0 %684 }
 0x2e8   : > { %v700_v16 = vsel %vm418_vm3, %v693_v58, %v695_v14  ;;  %v701_v17 = vsel %vm418_vm3, %v695_v14, %v697_v59  ;;  %v688_v18 = vsel %vm402_vm2, %v683_v57, %v685_v15 }
 0x2e9   : > { %798 = vmatprep.subr.bf16.mxu0 %v701_v17  ;;  %838 = vmatpush1.bf16.msra.mxu1 %v688_v18 }
 0x2ea   : > { %799 = vmatpush1.bf16.msra.mxu0 %v700_v16  ;;  %839 = vmatprep.subr.bf16.mxu1 %v1500_v5 }
 0x2eb   : > { %v709_v19 = vpop.permute.xlu1 %708  ;;  %v699_v20 = vpop.permute.xlu0 %698 }
 0x2ec   : > { %v714_v21 = vsel %vm434_vm4, %v707_v60, %v709_v19  ;;  %v715_v22 = vsel %vm434_vm4, %v709_v19, %v711_v61  ;;  %v702_v23 = vsel %vm418_vm3, %v697_v59, %v699_v20 }
 0x2ed   : > { %800 = vmatprep.subr.bf16.mxu0 %v715_v22  ;;  %840 = vmatpush1.bf16.msra.mxu1 %v702_v23 }
 0x2ee   : > { %801 = vmatpush1.bf16.msra.mxu0 %v714_v21  ;;  %841 = vmatprep.subr.bf16.mxu1 %v1500_v5 }
 0x2ef   : > { %v723_v24 = vpop.permute.xlu1 %722  ;;  %v713_v25 = vpop.permute.xlu0 %712 }
 0x2f0   : > { %v728_v26 = vsel %vm450_vm5, %v721_v62, %v723_v24  ;;  %v729_v27 = vsel %vm450_vm5, %v723_v24, %v725_v63  ;;  %v716_v28 = vsel %vm434_vm4, %v711_v61, %v713_v25 }
 0x2f1   : > { %802 = vmatprep.subr.bf16.mxu0 %v729_v27  ;;  %842 = vmatpush1.bf16.msra.mxu1 %v716_v28 }
 0x2f2   : > { %803 = vmatpush1.bf16.msra.mxu0 %v728_v26  ;;  %843 = vmatprep.subr.bf16.mxu1 %v1500_v5 }
 0x2f3   : > { %v737_v29 = vpop.permute.xlu1 %736  ;;  %v727_v30 = vpop.permute.xlu0 %726 }
 0x2f4   : > { %v742_v31 = vsel %vm466_vm6, %v735_v0, %v737_v29  ;;  %v743_v32 = vsel %vm466_vm6, %v737_v29, %v739_v1  ;;  %v730_v33 = vsel %vm450_vm5, %v725_v63, %v727_v30 }
 0x2f5   : > { %804 = vmatprep.subr.bf16.mxu0 %v743_v32  ;;  %844 = vmatpush1.bf16.msra.mxu1 %v730_v33 }
 0x2f6   : > { %805 = vmatpush1.bf16.msra.mxu0 %v742_v31  ;;  %845 = vmatprep.subr.bf16.mxu1 %v1500_v5 }
 0x2f7   : > { %v751_v34 = vpop.permute.xlu1 %750  ;;  %v741_v35 = vpop.permute.xlu0 %740 }
 0x2f8   : > { %v756_v36 = vsel %vm482_vm7, %v749_v2, %v751_v34  ;;  %v757_v37 = vsel %vm482_vm7, %v751_v34, %v1911_v3  ;;  %v744_v38 = vsel %vm466_vm6, %v739_v1, %v741_v35 }
 0x2f9   : > { %806 = vmatprep.subr.bf16.mxu0 %v757_v37  ;;  %846 = vmatpush1.bf16.msra.mxu1 %v744_v38 }
 0x2fa   : > { %807 = vmatpush1.bf16.msra.mxu0 %v756_v36  ;;  %847 = vmatprep.subr.bf16.mxu1 %v1500_v5 }
 0x2fb   : > { %v765_v39 = vpop.permute.xlu1 %764  ;;  %v755_v40 = vpop.permute.xlu0 %754 }
 0x2fc   : > { %v771_v41 = vsel %vm498_vm8, %v765_v39, %v1913_v6  ;;  %v758_v42 = vsel %vm482_vm7, %v1911_v3, %v755_v40 }
 0x2fd   : > { %808 = vmatprep.subr.bf16.mxu0 %v771_v41  ;;  %848 = vmatpush1.bf16.msra.mxu1 %v758_v42 }
 0x2fe   : > { %849 = vmatprep.subr.bf16.mxu1 %v1500_v5 }
 0x2ff   : > { %v763_v43 = vpop.permute.xlu1 %762  ;;  %v769_v44 = vpop.permute.xlu0 %768 }
 0x300   : > { %v770_v45 = vsel %vm498_vm8, %v763_v43, %v765_v39  ;;  %v772_v47 = vsel %vm498_vm8, %v1913_v6, %v769_v44 }
 0x301   : > { %809 = vmatpush1.bf16.msra.mxu0 %v770_v45  ;;  %850 = vmatpush1.bf16.msra.mxu1 %v772_v47 }
 0x304   : > { %825 = vmatmul.mubr.bf16.vlgmr.msra.gmra.mrb[4].mxu0 %v1064_v46  ;;  %866 = vmatmul.mubr.bf16.vlgmr.msra.gmra.mrb[4].mxu1 %v1064_v46 }
 0x310   : > { %v781_v48 = vpop.permute.xlu1 %780 }
 0x3d7   : > { %v826_v49 = vpop.f32.mrb[4].mxu0  ;;  %v867_v52 = vpop.f32.mrb[4].mxu1 }
 0x3d8   : > { %v827_v50 = vadd.f32 %v826_v49, %v781_v48  ;;  %v828_v5 = vpop.f32.mrb[5].mxu0  ;;  %v868_v53 = vadd.f32 %v867_v52, %v781_v48  ;;  %v869_v55 = vpop.f32.mrb[5].mxu1 }
 0x3d9   : > { %v829_v54 = vadd.f32 %v828_v5, %v781_v48  ;;  %v830_v56 = vpop.f32.mrb[6].mxu0  ;;  %v870_v57 = vpop.f32.mrb[6].mxu1 }
 0x3da   : > { %v873_v51 = vmax.f32 %v827_v50, 0.0  ;;  %v831_v58 = vpop.f32.mrb[7].mxu0  ;;  %v875_v59 = vmax.f32 %v868_v53, 0.0  ;;  %v871_v61 = vpop.f32.mrb[7].mxu1 }
 0x3db   : > { %v874_v60 = vmax.f32 %v829_v54, 0.0 }
 0x3dc   : > { %v1075_v62 = vpack.c.bf16 %v875_v59, %v875_v59 }
 0x3dd   : > { %v1074_v63 = vpack.c.bf16 %v874_v60, %v873_v51 }
 0x3de   : > { %890 = vst [vmem:[%s350_s12 + $0x8] sm:$0xf] %v1075_v62 }
 0x3df   : > { %889 = vst [vmem:[%s350_s12] sm:$0xff] %v1074_v63 }
 0x3e0   : > { %1400 = shalt.err (!%p1397_p8)
}
 0x3e1   : > { %s1401_s20 = scalar_lea.hbm %s1957_s29, 192  ;;  %s1405_s17 = scalar_lea.hbm %s2012_s6, 384 }
 0x3e2   : > { %p1402_p3 = scmp.ne.s32.totalorder %s1957_s29, %s1401_s20  ;;  %p1406_p0 = scmp.lt.u32.totalorder %s1957_s29, %s2012_s6 }
 0x3e3   : > { %p1407_p1 = scmp.lt.u32.totalorder %s1405_s17, %s1401_s20  ;;  %p1409_p6 = scmp.lt.u32.totalorder %s1401_s20, %s1957_s29 }
 0x3e4   : > { %p1403_p12 = pnand %p1402_p3, %p2033_p5 }
 0x3e5   : > { %p1408_p7 = por %p1407_p1, %p1406_p0 }
 0x3e6   : > { %p1404_p13 = pneg %p1403_p12 }
 0x3e7   : > { %p1410_p10 = por %p1409_p6, %p1408_p7 }
 0x3e9   : > { %p1411_p11 = pnand %p1410_p10, %p1404_p13 }
 0x3eb   : > { %1414 = shalt.err (!%p1411_p11)
}
 0x3ec   : > { %1100 = dma.vmem_to_hbm [thread:$0]  (%p2033_p5), %s1959_s30, 192, %s1957_s29, %s892_s24  }
 0x3ed PF: > { %s920_s12 = sand.u32 1, %s1461_s21   ;;  %p2034_p2 = scmp.ne.s32.totalorder %s2029_s13, 0 }
 0x3ee   : > { %p2035_p4 = scmp.ge.s32.totalorder %s1481_s26, 2  ;;  %s921_s15 = scalar_lea.sflag [#allocation4], %s920_s12 }
 0x3f0   : > { %p1123_p9 = pnand %p2035_p4, %p2034_p2 }
 0x3f2   : > { %1456 = dma.done.wait (!%p1123_p9), %s921_s15, 192  }
 0x3f3   : > { %1458 = vsyncadd (!%p1123_p9), %s921_s15, 4294967104  ;;  %s25_s26 = sadd.s32 1, %s1481_s26   ;;  %s2036_s21 = smov %s1465_s22 }
 0x3f4   : > { %p22_p8 = scmp.ge.s32.totalorder %s25_s26, 4   ;;  %s2037_s22 = smov %s1469_s23 }
 0x3f5   : > { %s2038_s23 = smov %s1739_s27  ;;  %s2039_s24 = smov %s1477_s25 }
 0x3f6   : > { %s2040_s25 = smov %s2042_s10  ;;  %24 = sbr.rel (!%p22_p8) target bundleno = 11 (0xb), region = 109 }
 0x3fd   :  { %926 = vsyncpa [#allocation3], 1 }
 0x3fe   :  { %928 = vsyncpa [#allocation3 + $0x1], 1 }
 0x3ff   :  { %929 = vsyncpa [#allocation6], 1 }
 0x400   :  { %930 = vsyncpa [#allocation9], 1 }
 0x401   :  { %931 = vsyncpa [#allocation12], 1 }
 0x402   :  { %932 = vsyncpa [#allocation4], 1 }
 0x403   :  { %934 = vsyncpa [#allocation4 + $0x1], 1 }

// kernel: channel_attn_unet_forward.11
= control target key start
LH: loop header
LB: loop body
LE: loop exit
PB: predicated region body
PF: predicated region fallthrough
CT: control target
= control target key end

     0   :  { %s1700_s0 = inlined_call_operand.hbm [shape: bf16[2,16,256], index: 0, kind: input, shape index: {}]   ;;  %s1701_s1 = inlined_call_operand.hbm [shape: bf16[16,144], index: 1, kind: input, shape index: {}]   ;;  %s1702_s2 = inlined_call_operand.hbm [shape: f32[16,1], index: 2, kind: input, shape index: {}]   ;;  %s1703_s3 = inlined_call_operand.hbm [shape: f32[1,256], index: 3, kind: input, shape index: {}]   ;;  %s1704_s4 = inlined_call_operand.hbm [shape: bf16[16,144], index: 4, kind: input, shape index: {}]   ;;  %s1705_s5 = inlined_call_operand.hbm [shape: f32[16,1], index: 5, kind: input, shape index: {}]   ;;  %s1706_s6 = inlined_call_operand.hbm [shape: bf16[2,16,128], index: 6, kind: output, shape index: {}]  }
   0x1   :  { %1713 = sst [smem:[#allocation19_spill]] %s1701_s1 }
   0x2   :  { %11 = vsyncpa [#allocation3], 0 }
   0x3   :  { %13 = vsyncpa [#allocation3 + $0x1], 0 }
   0x4   :  { %14 = vsyncpa [#allocation6], 0 }
   0x5   :  { %15 = vsyncpa [#allocation9], 0 }
   0x6   :  { %16 = vsyncpa [#allocation12], 0 }
   0x7   :  { %17 = vsyncpa [#allocation4], 0 }
   0x8   :  { %19 = vsyncpa [#allocation4 + $0x1], 0  ;;  %s1301_s21 = smov 0   ;;  %s1303_s22 = smov 0  }
   0x9   :  { %s1305_s23 = smov 0   ;;  %s1307_s24 = smov 0  }
   0xa   :  { %s1309_s25 = smov 0   ;;  %s1311_s26 = smov 0  }
   0xb LB: > { %s1707_s27 = sadd.s32 4294967295, %s1244_s26   ;;  %p801_p0 = scmp.ge.s32.totalorder %s1244_s26, 1  ;;  %s1244_s26 = sphi %s1311_s26, %s25_s26   ;;  %s1240_s25 = sphi %s1309_s25, %s1736_s25   ;;  %s1236_s24 = sphi %s1307_s24, %s1735_s24   ;;  %s1232_s23 = sphi %s1305_s23, %s1734_s23   ;;  %s1228_s22 = sphi %s1303_s22, %s1733_s22   ;;  %s1224_s21 = sphi %s1301_s21, %s1732_s21  }
   0xc   : > { %p1335_p1 = scmp.eq.s32.totalorder %s1707_s27, 0  ;;  %p201_p2 = scmp.lt.s32.totalorder %s1244_s26, 3 }
   0xd   : > { %s1246_s30 = smov [#allocation5]   ;;  %s1247_s9 = smov [#allocation8]  }
   0xe   : > { %s1714_s28 = scalar_select %p1335_p1, 1, 0 }
   0xf   : > { %p1340_p3 = pnand %p801_p0, %p201_p2  ;;  %s213_s7 = sshll.u32 %s1246_s30, 4  ;;  %s1344_s7 = int_to_ptr.vmem [resolvable:$true] %s213_s7 }
  0x10   : > { %s240_s10 = sshll.u32 %s1247_s9, 4  ;;  %s1248_s11 = smov [#allocation7]   ;;  %s1355_s10 = int_to_ptr.vmem [resolvable:$true] %s240_s10 }
  0x11   : > { %s1715_s29 = scalar_select %p1340_p3, 1, 0 }
  0x12   : > { %p867_p4 = pneg %p1340_p3  ;;  %s1357_s12 = sshll.u32 %s1248_s11, 4  ;;  %s227_s12 = int_to_ptr.vmem [resolvable:$true] %s1357_s12 }
  0x13   : > { %s1717_s1 = sld [smem:[#allocation19_spill]] }
  0x14   : > { %p1351_p6 = pnand %p867_p4, %p1335_p1 }
  0x16   : > { %p1367_p8 = pneg %p1351_p6 }
  0x19   : > { %s980_s15 = scalar_lea.hbm %s1717_s1, 256 }
  0x1a   : > { %p981_p7 = scmp.ne.s32.totalorder %s1717_s1, %s980_s15  ;;  %p987_p11 = scmp.lt.u32.totalorder %s980_s15, %s1717_s1 }
  0x1c   : > { %p983_p9 = pnand %p1367_p8, %p981_p7 }
  0x1e   : > { %p984_p10 = pneg %p983_p9 }
  0x20   : > { %p989_p12 = pnand %p987_p11, %p984_p10 }
  0x22   : > { %992 = shalt.err (!%p989_p12)
}
  0x23   : > { %s993_s30 = scalar_lea.vmem %s1344_s7, 256  ;;  %p1001_p4 = scmp.lt.s32.totalorder %s1344_s7, %s1344_s7 }
  0x24   : > { %p994_p13 = scmp.ne.s32.totalorder %s1344_s7, %s993_s30  ;;  %p1002_p5 = scmp.lt.s32.totalorder %s993_s30, %s993_s30 }
  0x26   : > { %p996_p0 = pnand %p994_p13, %p1367_p8  ;;  %p1003_p7 = por %p1002_p5, %p1001_p4 }
  0x28   : > { %p997_p2 = pneg %p996_p0 }
  0x2a   : > { %p1004_p9 = pnand %p1003_p7, %p997_p2 }
  0x2c   : > { %1007 = shalt.err (!%p1004_p9)
}
  0x2d   : > { %s1711_s9 = smov 128   ;;  %s1250_s11 = smov 8  }
  0x2e   : > { %870 = dma.hbm_to_vmem [thread:$0]  (!%p1351_p6), %s1717_s1, 256, %s1344_s7, [#allocation6], %s1711_s9, %s1711_s9, %s1250_s11  }
  0x2f   : > { %s1008_s17 = scalar_lea.hbm %s1703_s3, 32 }
  0x30   : > { %p1009_p5 = scmp.ne.s32.totalorder %s1703_s3, %s1008_s17  ;;  %p1015_p12 = scmp.lt.u32.totalorder %s1008_s17, %s1703_s3 }
  0x32   : > { %p1011_p10 = pnand %p1009_p5, %p1367_p8 }
  0x34   : > { %p1012_p11 = pneg %p1011_p10 }
  0x36   : > { %p1017_p13 = pnand %p1015_p12, %p1012_p11 }
  0x38   : > { %1020 = shalt.err (!%p1017_p13)
}
  0x39   : > { %s1021_s7 = scalar_lea.vmem %s1355_s10, 32  ;;  %p1029_p7 = scmp.lt.s32.totalorder %s1355_s10, %s1355_s10 }
  0x3a   : > { %p1022_p0 = scmp.ne.s32.totalorder %s1355_s10, %s1021_s7  ;;  %p1030_p9 = scmp.lt.s32.totalorder %s1021_s7, %s1021_s7 }
  0x3c   : > { %p1024_p2 = pnand %p1022_p0, %p1367_p8  ;;  %p1031_p5 = por %p1030_p9, %p1029_p7 }
  0x3e   : > { %p1025_p4 = pneg %p1024_p2 }
  0x40   : > { %p1032_p10 = pnand %p1031_p5, %p1025_p4 }
  0x42   : > { %1035 = shalt.err (!%p1032_p10)
}
  0x43   : > { %876 = dma.hbm_to_vmem [thread:$0]  (!%p1351_p6), %s1703_s3, 32, %s1355_s10, [#allocation9]  }
  0x44   : > { %s1036_s16 = scalar_lea.hbm %s1702_s2, 256 }
  0x45   : > { %p1037_p11 = scmp.ne.s32.totalorder %s1702_s2, %s1036_s16  ;;  %p1043_p0 = scmp.lt.u32.totalorder %s1036_s16, %s1702_s2 }
  0x47   : > { %p1039_p12 = pnand %p1037_p11, %p1367_p8 }
  0x49   : > { %p1040_p13 = pneg %p1039_p12 }
  0x4b   : > { %p1045_p2 = pnand %p1043_p0, %p1040_p13 }
  0x4d   : > { %1048 = shalt.err (!%p1045_p2)
}
  0x4e   : > { %s1049_s7 = scalar_lea.vmem %s227_s12, 256  ;;  %p1057_p5 = scmp.lt.s32.totalorder %s227_s12, %s227_s12 }
  0x4f   : > { %p1050_p4 = scmp.ne.s32.totalorder %s227_s12, %s1049_s7  ;;  %p1058_p10 = scmp.lt.s32.totalorder %s1049_s7, %s1049_s7 }
  0x51   : > { %p1052_p7 = pnand %p1050_p4, %p1367_p8  ;;  %p1059_p3 = por %p1058_p10, %p1057_p5 }
  0x53   : > { %p1053_p9 = pneg %p1052_p7 }
  0x55   : > { %p1060_p1 = pnand %p1059_p3, %p1053_p9 }
  0x57   : > { %1063 = shalt.err (!%p1060_p1)
}
  0x58   : > { %873 = dma.hbm_to_vmem [thread:$0]  (!%p1351_p6), %s1702_s2, 256, %s227_s12, [#allocation6], %s1711_s9, %s1711_s9, %s1250_s11  }
  0x59   : > { %s1251_s13 = smov [#allocation10]   ;;  %s1252_s15 = smov [#allocation11]  }
  0x5a   : > { %s250_s14 = sshll.u32 %s1251_s13, 4  ;;  %s263_s16 = sshll.u32 %s1252_s15, 4  ;;  %s251_s14 = int_to_ptr.vmem [resolvable:$true] %s250_s14  ;;  %s264_s16 = int_to_ptr.vmem [resolvable:$true] %s263_s16 }
  0x5b   : > { %s1064_s20 = scalar_lea.hbm %s1704_s4, 256 }
  0x5c   : > { %p1065_p1 = scmp.ne.s32.totalorder %s1704_s4, %s1064_s20  ;;  %p1071_p12 = scmp.lt.u32.totalorder %s1064_s20, %s1704_s4 }
  0x5e   : > { %p1067_p3 = pnand %p1065_p1, %p1367_p8 }
  0x60   : > { %p1068_p11 = pneg %p1067_p3 }
  0x62   : > { %p1073_p13 = pnand %p1071_p12, %p1068_p11 }
  0x64   : > { %1076 = shalt.err (!%p1073_p13)
}
  0x65   : > { %s1077_s12 = scalar_lea.vmem %s251_s14, 256  ;;  %p1085_p7 = scmp.lt.s32.totalorder %s251_s14, %s251_s14 }
  0x66   : > { %p1078_p0 = scmp.ne.s32.totalorder %s251_s14, %s1077_s12  ;;  %p1086_p9 = scmp.lt.s32.totalorder %s1077_s12, %s1077_s12 }
  0x68   : > { %p1080_p2 = pnand %p1078_p0, %p1367_p8  ;;  %p1087_p5 = por %p1086_p9, %p1085_p7 }
  0x6a   : > { %p1081_p4 = pneg %p1080_p2 }
  0x6c   : > { %p1088_p10 = pnand %p1087_p5, %p1081_p4 }
  0x6e   : > { %1091 = shalt.err (!%p1088_p10)
}
  0x6f   : > { %879 = dma.hbm_to_vmem [thread:$0]  (!%p1351_p6), %s1704_s4, 256, %s251_s14, [#allocation9], %s1711_s9, %s1711_s9, %s1250_s11  }
  0x70   : > { %s1092_s17 = scalar_lea.hbm %s1705_s5, 256 }
  0x71   : > { %p1093_p1 = scmp.ne.s32.totalorder %s1705_s5, %s1092_s17  ;;  %p1099_p12 = scmp.lt.u32.totalorder %s1092_s17, %s1705_s5 }
  0x73   : > { %p1095_p3 = pnand %p1093_p1, %p1367_p8 }
  0x75   : > { %p1096_p11 = pneg %p1095_p3 }
  0x77   : > { %p1101_p13 = pnand %p1099_p12, %p1096_p11 }
  0x79   : > { %1104 = shalt.err (!%p1101_p13)
}
  0x7a   : > { %s1105_s10 = scalar_lea.vmem %s264_s16, 256  ;;  %p1113_p7 = scmp.lt.s32.totalorder %s264_s16, %s264_s16 }
  0x7b   : > { %p1106_p0 = scmp.ne.s32.totalorder %s264_s16, %s1105_s10  ;;  %p1114_p9 = scmp.lt.s32.totalorder %s1105_s10, %s1105_s10 }
  0x7d   : > { %p1108_p2 = pnand %p1106_p0, %p1367_p8  ;;  %p1115_p5 = por %p1114_p9, %p1113_p7 }
  0x7f   : > { %p1109_p4 = pneg %p1108_p2 }
  0x81   : > { %p1116_p10 = pnand %p1115_p5, %p1109_p4 }
  0x83   : > { %1119 = shalt.err (!%p1116_p10)
}
  0x84   : > { %882 = dma.hbm_to_vmem [thread:$0]  (!%p1351_p6), %s1705_s5, 256, %s264_s16, [#allocation12], %s1711_s9, %s1711_s9, %s1250_s11  }
  0x85   : > { %s800_s8 = sadd.s32 4294967294, %s1244_s26   ;;  %s37_s18 = sadd.s32 1, %s1240_s25 }
  0x86   : > { %s44_s1 = sadd.s32 1, %s1232_s23  ;;  %p39_p8 = scmp.ge.s32.totalorder %s37_s18, 2 }
  0x87   : > { %p51_p1 = scmp.ne.s32.totalorder %s1232_s23, %s1228_s22  ;;  %p52_p3 = scmp.eq.s32.totalorder %s1244_s26, 0 }
  0x88   : > { %p57_p11 = scmp.ne.s32.totalorder %s1228_s22, %s1224_s21  ;;  %s1738_s18 = smov (%p39_p8, %s37_s18), 0 }
  0x89   : > { %p1488_p12 = por %p52_p3, %p51_p1  ;;  %p1720_p13 = scmp.ne.s32.totalorder %s1714_s28, 0 }
  0x8a   : > { %s41_s13 = ssub.s32 %s1240_s25, %s1738_s18  ;;  %s1722_s15 = sadd.s32 4294967295, %s1244_s26  }
  0x8b   : > { %p1494_p6 = por %p1720_p13, %p57_p11  ;;  %p188_p0 = scmp.eq.s32.totalorder %s1722_s15, 1 }
  0x8c   : > { %p42_p2 = scmp.eq.s32.totalorder %s41_s13, 0  ;;  %p194_p4 = scmp.eq.s32.totalorder %s800_s8, 1 }
  0x8d   : > { %p1502_p7 = por %p188_p0, %p51_p1  ;;  %p896_p9 = scmp.lt.s32.totalorder %s1244_s26, 2 }
  0x8e   : > { %s1508_s19 = scalar_select %p42_p2, %s1232_s23, %s44_s1  }
  0x8f   : > { %s1723_s17 = scalar_select %p1502_p7, 1, 0 }
  0x90   : > { %p1510_p5 = por %p194_p4, %p57_p11  ;;  %s277_s30 = sand.u32 1, %s1232_s23  }
  0x91   : > { %s808_s7 = sshll.u32 %s277_s30, 4  ;;  %s834_s10 = sshll.u32 %s1240_s25, 8 }
  0x92   : > { %s1724_s20 = scalar_select %p1510_p5, 1, 0 }
  0x93   : > { %s1519_s15 = scalar_lea.hbm %s1700_s0, %s834_s10  ;;  %s281_s8 = scalar_lea.vmem [#allocation2], %s808_s7 }
  0x94   : > { %s288_s13 = sshll.u32 %s281_s8, 4  ;;  %p1525_p10 = pnand %p896_p9, %p1488_p12  ;;  %s1521_s13 = int_to_ptr.vmem [resolvable:$true] %s288_s13 }
  0x95   : > { %s1529_s9 = scalar_lea.sflag [#allocation3], %s277_s30  ;;  %s1120_s14 = scalar_lea.hbm %s1519_s15, 256 }
  0x96   : > { %p1121_p8 = scmp.ne.s32.totalorder %s1519_s15, %s1120_s14  ;;  %p1122_p1 = pneg %p1525_p10 }
  0x97   : > { %s1125_s27 = scalar_lea.hbm %s1700_s0, 512  ;;  %p1126_p12 = scmp.lt.u32.totalorder %s1519_s15, %s1700_s0 }
  0x98   : > { %p1123_p3 = pnand %p1122_p1, %p1121_p8  ;;  %p1127_p13 = scmp.lt.u32.totalorder %s1125_s27, %s1120_s14 }
  0x99   : > { %p1129_p2 = scmp.lt.u32.totalorder %s1120_s14, %s1519_s15 }
  0x9a   : > { %p1124_p11 = pneg %p1123_p3  ;;  %p1128_p0 = por %p1127_p13, %p1126_p12 }
  0x9c   : > { %p1130_p4 = por %p1129_p2, %p1128_p0 }
  0x9e   : > { %p1131_p9 = pnand %p1130_p4, %p1124_p11 }
  0xa0   : > { %1134 = shalt.err (!%p1131_p9)
}
  0xa1   : > { %s1135_s30 = scalar_lea.vmem %s1521_s13, 256  ;;  %s1253_s7 = smov [#allocation2]  }
  0xa2   : > { %p1136_p8 = scmp.ne.s32.totalorder %s1521_s13, %s1135_s30  ;;  %s1140_s10 = sshll.u32 %s1253_s7, 4  ;;  %s1141_s10 = int_to_ptr.vmem [resolvable:$false] %s1140_s10 }
  0xa3   : > { %s1142_s12 = scalar_lea.vmem %s1141_s10, 512  ;;  %p1143_p7 = scmp.lt.s32.totalorder %s1521_s13, %s1141_s10 }
  0xa4   : > { %p1138_p3 = pnand %p1136_p8, %p1122_p1  ;;  %p1144_p12 = scmp.lt.s32.totalorder %s1142_s12, %s1135_s30 }
  0xa6   : > { %p1139_p5 = pneg %p1138_p3  ;;  %p1145_p13 = por %p1144_p12, %p1143_p7 }
  0xa8   : > { %p1146_p0 = pnand %p1145_p13, %p1139_p5 }
  0xaa   : > { %1149 = shalt.err (!%p1146_p0)
}
  0xab   : > { %s1726_s14 = smov 128   ;;  %p1727_p1 = scmp.ne.s32.totalorder %s1715_s29, 0 }
  0xac   : > { %886 = dma.hbm_to_vmem [thread:$0]  (!%p1525_p10), %s1519_s15, 256, %s1521_s13, %s1529_s9, %s1726_s14, %s1726_s14, %s1250_s11  }
  0xad   : > { %300 = sbr.rel (%p1727_p1) target bundleno = 946 (0x3b2), region = 44  ;;  %s1563_s27 = sand.u32 (!%p1727_p1), 1, %s1228_s22  }
  0xae   : > { %s812_s8 = sshll.u32 (!%p1727_p1), %s1563_s27, 4  ;;  %s303_s30 = scalar_lea.sflag (!%p1727_p1), [#allocation3], %s1563_s27 }
  0xaf   : > { %s306_s7 = scalar_lea.vmem (!%p1727_p1), [#allocation2], %s812_s8 }
  0xb4   : > { %1203 = dma.done.wait (%p1494_p6), %s303_s30, 256  }
  0xb5   : > { %1205 = vsyncadd (%p1494_p6), %s303_s30, 4294967040  ;;  %p1728_p7 = scmp.ne.s32.totalorder %s1714_s28, 0 }
  0xb7   : > { %1207 = dma.done.wait (%p1728_p7), [#allocation6], 512  }
  0xb8   : > { %1209 = vsyncadd (%p1728_p7), [#allocation6], 4294966784 }
  0xb9   : > { %1211 = dma.done.wait (%p1728_p7), [#allocation9], 288  }
  0xba   : > { %1213 = vsyncadd (%p1728_p7), [#allocation9], 4294967008 }
  0xbb   : > { %1215 = dma.done.wait (%p1728_p7), [#allocation12], 256  }
  0xbc   : > { %1217 = vsyncadd (%p1728_p7), [#allocation12], 4294967040  ;;  %v971_v0 = vld [vmem:[%s306_s7] ss:$8 sps:$4 sm:$0xff]   ;;  %v973_v1 = vld [vmem:[%s306_s7 + $0x4] ss:$8 sps:$4 sm:$0xff]   ;;  %v508_v31 = vlaneseq }
  0xbd   : > { %s1254_s29 = smov 126   ;;  %s1255_s9 = smov 127   ;;  %460 = vmatprep.subr.bf16.mxu0 %v973_v1  ;;  %v976_v2 = vld [vmem:[#allocation5 + $0x4] ss:$8 sps:$4 sm:$0xff]   ;;  %vm456_vm0 = vcmask 130048   ;;  %v1261_v3 = vmov 0  }
  0xbe   : > { %377 = vrot.lane.b32.xlu1 %v971_v0, %s1254_s29  ;;  %369 = vrot.lane.b32.xlu0 %v971_v0, %s1255_s9  ;;  %s1256_s11 = smov 116   ;;  %s1257_s28 = smov 115   ;;  %v435_v4 = vld [vmem:[#allocation7] sm:$0xff]  ;;  %v436_v5 = vld [vmem:[#allocation7 + $0x8] sm:$0xff]  ;;  %vm373_vm1 = vcmask 1039360   ;;  %vm381_vm2 = vcmask 1031168  }
  0xbf   : > { %461 = vmatpush1.bf16.msra.mxu0 %v971_v0  ;;  %s1258_s16 = smov 114   ;;  %s1259_s15 = smov 104   ;;  %823 = vmatprep.mubr.msk.bf16.mxu0 %vm456_vm0, %v976_v2  ;;  %vm389_vm3 = vcmask 949248   ;;  %vm397_vm4 = vcmask 941056   ;;  %vm405_vm5 = vcmask 932864   ;;  %vm413_vm6 = vcmask 850944  }
  0xc0   : > { %s1260_s13 = smov 103   ;;  %969 = vset.pattern.permute.xlu0 %v1261_v3  ;;  %970 = vset.pattern.permute.xlu1 %v1261_v3  ;;  %s1262_s1 = smov 102   ;;  %vm421_vm7 = vcmask 842752   ;;  %vm429_vm8 = vcmask 834560   ;;  %v974_v30 = vld [vmem:[#allocation5] ss:$8 sps:$4 sm:$0xff]  }
  0xc1   : > { %600 = vmatprep.subr.bf16.mxu1 %v1261_v3  ;;  %v509_v32 = vshrl.u32 %v508_v31, 7  ;;  %v358_v35 = vld [vmem:[#allocation8] sm:$0x3]  ;;  %v979_v58 = vld [vmem:[#allocation10 + $0x4] ss:$8 sps:$4 sm:$0xff]   ;;  %v576_v59 = vld [vmem:[#allocation11] sm:$0xff] }
  0xc2   : > { %379 = vrot.lane.b32.xlu1 %v973_v1, %s1254_s29  ;;  %371 = vrot.lane.b32.xlu0 %v973_v1, %s1255_s9  ;;  %v577_v60 = vld [vmem:[#allocation11 + $0x8] sm:$0xff]  ;;  %s818_s10 = sshll.u32 %s1563_s27, 3  ;;  %s837_s8 = sshll.u32 %s1236_s24, 7 }
  0xc3   : > { %v510_v34 = vsub.s32 0, %v509_v32  ;;  %v514_v37 = vsub.s32 1, %v509_v32  ;;  %826 = vmatprep.mubr.msk.bf16.mxu1 %vm456_vm0, %v979_v58  ;;  %s354_s12 = scalar_lea.vmem [#allocation13], %s818_s10  ;;  %p1729_p5 = scmp.ne.s32.totalorder %s1723_s17, 0 }
  0xc4   : > { %s668_s14 = sshll.u32 %s354_s12, 4  ;;  %s1263_s24 = smov [#allocation13]   ;;  %s1646_s14 = int_to_ptr.vmem [resolvable:$true] %s668_s14 }
  0xc5   : > { %v511_v44 = vrot.slane %v358_v35, %v510_v34  ;;  %v515_v48 = vrot.slane %v358_v35, %v514_v37 }
  0xc6   : > { %387 = vrot.lane.b32.xlu1 %v973_v1, %s1256_s11  ;;  %385 = vrot.lane.b32.xlu0 %v971_v0, %s1256_s11 }
  0xca   : > { %395 = vrot.lane.b32.xlu1 %v973_v1, %s1257_s28  ;;  %393 = vrot.lane.b32.xlu0 %v971_v0, %s1257_s28 }
  0xce   : > { %403 = vrot.lane.b32.xlu1 %v973_v1, %s1258_s16  ;;  %401 = vrot.lane.b32.xlu0 %v971_v0, %s1258_s16 }
  0xd2   : > { %411 = vrot.lane.b32.xlu1 %v973_v1, %s1259_s15  ;;  %409 = vrot.lane.b32.xlu0 %v971_v0, %s1259_s15 }
  0xd6   : > { %419 = vrot.lane.b32.xlu1 %v973_v1, %s1260_s13  ;;  %417 = vrot.lane.b32.xlu0 %v971_v0, %s1260_s13 }
  0xda   : > { %427 = vrot.lane.b32.xlu1 %v973_v1, %s1262_s1  ;;  %425 = vrot.lane.b32.xlu0 %v971_v0, %s1262_s1 }
  0xde   : > { %439 = vperm.xlu0 %969, %v435_v4   ;;  %444 = vperm.xlu1 %970, %v436_v5  }
 0x130   : > { %v378_v6 = vpop.permute.xlu1 %377  ;;  %v370_v7 = vpop.permute.xlu0 %369 }
 0x134   : > { %v380_v8 = vpop.permute.xlu1 %379  ;;  %v372_v9 = vpop.permute.xlu0 %371 }
 0x135   : > { %462 = vmatprep.subr.bf16.mxu0 %v372_v9  ;;  %v374_v10 = vsel %vm373_vm1, %v370_v7, %v372_v9  ;;  %v382_v13 = vsel %vm381_vm2, %v378_v6, %v380_v8 }
 0x136   : > { %463 = vmatpush1.bf16.msra.mxu0 %v374_v10 }
 0x137   : > { %464 = vmatprep.subr.bf16.mxu0 %v380_v8 }
 0x138   : > { %v388_v11 = vpop.permute.xlu1 %387  ;;  %v386_v12 = vpop.permute.xlu0 %385 }
 0x139   : > { %v390_v14 = vsel %vm389_vm3, %v386_v12, %v388_v11 }
 0x13a   : > { %465 = vmatpush1.bf16.msra.mxu0 %v382_v13 }
 0x13b   : > { %466 = vmatprep.subr.bf16.mxu0 %v388_v11 }
 0x13c   : > { %v396_v15 = vpop.permute.xlu1 %395  ;;  %v394_v16 = vpop.permute.xlu0 %393 }
 0x13d   : > { %v398_v17 = vsel %vm397_vm4, %v394_v16, %v396_v15 }
 0x13e   : > { %467 = vmatpush1.bf16.msra.mxu0 %v390_v14 }
 0x13f   : > { %468 = vmatprep.subr.bf16.mxu0 %v396_v15 }
 0x140   : > { %v404_v18 = vpop.permute.xlu1 %403  ;;  %v402_v19 = vpop.permute.xlu0 %401 }
 0x141   : > { %v406_v20 = vsel %vm405_vm5, %v402_v19, %v404_v18 }
 0x142   : > { %469 = vmatpush1.bf16.msra.mxu0 %v398_v17 }
 0x143   : > { %470 = vmatprep.subr.bf16.mxu0 %v404_v18 }
 0x144   : > { %v412_v21 = vpop.permute.xlu1 %411  ;;  %v410_v22 = vpop.permute.xlu0 %409 }
 0x145   : > { %v414_v23 = vsel %vm413_vm6, %v410_v22, %v412_v21  ;;  %v977_v22 = vld [vmem:[#allocation10] ss:$8 sps:$4 sm:$0xff]  }
 0x146   : > { %471 = vmatpush1.bf16.msra.mxu0 %v406_v20 }
 0x147   : > { %472 = vmatprep.subr.bf16.mxu0 %v412_v21 }
 0x148   : > { %v420_v24 = vpop.permute.xlu1 %419  ;;  %v418_v25 = vpop.permute.xlu0 %417 }
 0x149   : > { %v422_v26 = vsel %vm421_vm7, %v418_v25, %v420_v24 }
 0x14a   : > { %473 = vmatpush1.bf16.msra.mxu0 %v414_v23 }
 0x14b   : > { %474 = vmatprep.subr.bf16.mxu0 %v420_v24 }
 0x14c   : > { %v428_v27 = vpop.permute.xlu1 %427  ;;  %v426_v28 = vpop.permute.xlu0 %425 }
 0x14d   : > { %v430_v29 = vsel %vm429_vm8, %v426_v28, %v428_v27 }
 0x14e   : > { %475 = vmatpush1.bf16.msra.mxu0 %v422_v26 }
 0x14f   : > { %476 = vmatprep.subr.bf16.mxu0 %v428_v27 }
 0x152   : > { %477 = vmatpush1.bf16.msra.mxu0 %v430_v29 }
 0x155   : > { %493 = vmatmul.mubr.bf16.vlgmr.msra.gmra.mrb[0].mxu0 %v974_v30 }
 0x15d   : > { %v440_v33 = vpop.permute.xlu0 %439  ;;  %v445_v38 = vpop.permute.xlu1 %444 }
 0x228   : > { %v494_v36 = vpop.f32.mrb[0].mxu0 }
 0x229   : > { %v495_v39 = vadd.f32 %v494_v36, %v440_v33  ;;  %v496_v40 = vpop.f32.mrb[1].mxu0 }
 0x22a   : > { %v497_v41 = vadd.f32 %v496_v40, %v440_v33  ;;  %v498_v42 = vpop.f32.mrb[2].mxu0 }
 0x22b   : > { %v503_v43 = vmax.f32 %v495_v39, 0.0  ;;  %v499_v45 = vadd.f32 %v498_v42, %v445_v38  ;;  %v500_v46 = vpop.f32.mrb[3].mxu0 }
 0x22c   : > { %v504_v47 = vmax.f32 %v497_v41, 0.0  ;;  %v501_v49 = vadd.f32 %v500_v46, %v445_v38 }
 0x22d   : > { %v505_v50 = vmax.f32 %v499_v45, 0.0  ;;  %v518_v52 = vmul.f32 %v511_v44, %v503_v43 }
 0x22e   : > { %v506_v51 = vmax.f32 %v501_v49, 0.0  ;;  %v519_v54 = vmul.f32 %v515_v48, %v504_v47 }
 0x22f   : > { %v520_v53 = vmul.f32 %v511_v44, %v505_v50 }
 0x230   : > { %v521_v55 = vmul.f32 %v515_v48, %v506_v51 }
 0x231   : > { %v522_v56 = vpack.c.bf16 %v520_v53, %v518_v52 }
 0x232   : > { %v523_v57 = vpack.c.bf16 %v521_v55, %v519_v54 }
 0x233   : > { %526 = vrot.lane.b32.xlu1 %v522_v56, %s1255_s9  ;;  %601 = vmatpush1.bf16.msra.mxu1 %v522_v56 }
 0x234   : > { %528 = vrot.lane.b32.xlu0 %v523_v57, %s1255_s9  ;;  %602 = vmatprep.subr.bf16.mxu1 %v1261_v3  ;;  %s654_s9 = scalar_lea.sflag [#allocation4], %s1563_s27 }
 0x237   : > { %532 = vrot.lane.b32.xlu1 %v522_v56, %s1254_s29 }
 0x238   : > { %534 = vrot.lane.b32.xlu0 %v523_v57, %s1254_s29  ;;  %s1651_s29 = scalar_lea.hbm %s1706_s6, %s837_s8 }
 0x23b   : > { %538 = vrot.lane.b32.xlu1 %v522_v56, %s1256_s11 }
 0x23c   : > { %540 = vrot.lane.b32.xlu0 %v523_v57, %s1256_s11  ;;  %s1150_s11 = scalar_lea.vmem %s1646_s14, 128 }
 0x23d   : > { %p1151_p6 = scmp.ne.s32.totalorder %s1646_s14, %s1150_s11 }
 0x23f   : > { %544 = vrot.lane.b32.xlu1 %v522_v56, %s1257_s28  ;;  %p1152_p10 = pnand %p1151_p6, %p1729_p5 }
 0x240   : > { %546 = vrot.lane.b32.xlu0 %v523_v57, %s1257_s28  ;;  %s1154_s28 = sshll.u32 %s1263_s24, 4  ;;  %s1155_s28 = int_to_ptr.vmem [resolvable:$false] %s1154_s28 }
 0x241   : > { %p1153_p11 = pneg %p1152_p10  ;;  %p1157_p2 = scmp.lt.s32.totalorder %s1646_s14, %s1155_s28 }
 0x243   : > { %550 = vrot.lane.b32.xlu1 %v522_v56, %s1258_s16 }
 0x244   : > { %552 = vrot.lane.b32.xlu0 %v523_v57, %s1258_s16  ;;  %s1156_s16 = scalar_lea.vmem %s1155_s28, 256 }
 0x245   : > { %p1158_p4 = scmp.lt.s32.totalorder %s1156_s16, %s1150_s11 }
 0x247   : > { %556 = vrot.lane.b32.xlu1 %v522_v56, %s1259_s15  ;;  %p1159_p9 = por %p1158_p4, %p1157_p2 }
 0x248   : > { %558 = vrot.lane.b32.xlu0 %v523_v57, %s1259_s15 }
 0x249   : > { %p1160_p8 = pnand %p1159_p9, %p1153_p11 }
 0x24b   : > { %562 = vrot.lane.b32.xlu1 %v522_v56, %s1260_s13 }
 0x24c   : > { %564 = vrot.lane.b32.xlu0 %v523_v57, %s1260_s13 }
 0x24f   : > { %568 = vrot.lane.b32.xlu1 %v522_v56, %s1262_s1 }
 0x250   : > { %570 = vrot.lane.b32.xlu0 %v523_v57, %s1262_s1 }
 0x253   : > { %580 = vperm.xlu1 %970, %v576_v59  }
 0x254   : > { %585 = vperm.xlu0 %969, %v577_v60  }
 0x2a5   : > { %v527_v61 = vpop.permute.xlu1 %526 }
 0x2a6   : > { %v529_v62 = vpop.permute.xlu0 %528 }
 0x2a7   : > { %v530_v63 = vsel %vm373_vm1, %v527_v61, %v529_v62 }
 0x2a8   : > { %603 = vmatpush1.bf16.msra.mxu1 %v530_v63 }
 0x2a9   : > { %v533_v0 = vpop.permute.xlu1 %532  ;;  %604 = vmatprep.subr.bf16.mxu1 %v1261_v3 }
 0x2aa   : > { %v535_v1 = vpop.permute.xlu0 %534 }
 0x2ab   : > { %v536_v2 = vsel %vm381_vm2, %v533_v0, %v535_v1 }
 0x2ac   : > { %605 = vmatpush1.bf16.msra.mxu1 %v536_v2 }
 0x2ad   : > { %v539_v4 = vpop.permute.xlu1 %538  ;;  %606 = vmatprep.subr.bf16.mxu1 %v1261_v3 }
 0x2ae   : > { %v541_v5 = vpop.permute.xlu0 %540 }
 0x2af   : > { %v542_v6 = vsel %vm389_vm3, %v539_v4, %v541_v5 }
 0x2b0   : > { %607 = vmatpush1.bf16.msra.mxu1 %v542_v6 }
 0x2b1   : > { %v545_v7 = vpop.permute.xlu1 %544  ;;  %608 = vmatprep.subr.bf16.mxu1 %v1261_v3 }
 0x2b2   : > { %v547_v8 = vpop.permute.xlu0 %546 }
 0x2b3   : > { %v548_v9 = vsel %vm397_vm4, %v545_v7, %v547_v8 }
 0x2b4   : > { %609 = vmatpush1.bf16.msra.mxu1 %v548_v9 }
 0x2b5   : > { %v551_v10 = vpop.permute.xlu1 %550  ;;  %610 = vmatprep.subr.bf16.mxu1 %v1261_v3 }
 0x2b6   : > { %v553_v11 = vpop.permute.xlu0 %552 }
 0x2b7   : > { %v554_v12 = vsel %vm405_vm5, %v551_v10, %v553_v11 }
 0x2b8   : > { %611 = vmatpush1.bf16.msra.mxu1 %v554_v12 }
 0x2b9   : > { %v557_v13 = vpop.permute.xlu1 %556  ;;  %612 = vmatprep.subr.bf16.mxu1 %v1261_v3 }
 0x2ba   : > { %v559_v14 = vpop.permute.xlu0 %558 }
 0x2bb   : > { %v560_v15 = vsel %vm413_vm6, %v557_v13, %v559_v14 }
 0x2bc   : > { %613 = vmatpush1.bf16.msra.mxu1 %v560_v15 }
 0x2bd   : > { %v563_v16 = vpop.permute.xlu1 %562  ;;  %614 = vmatprep.subr.bf16.mxu1 %v1261_v3 }
 0x2be   : > { %v565_v17 = vpop.permute.xlu0 %564 }
 0x2bf   : > { %v566_v18 = vsel %vm421_vm7, %v563_v16, %v565_v17 }
 0x2c0   : > { %615 = vmatpush1.bf16.msra.mxu1 %v566_v18 }
 0x2c1   : > { %v569_v19 = vpop.permute.xlu1 %568  ;;  %616 = vmatprep.subr.bf16.mxu1 %v1261_v3 }
 0x2c2   : > { %v571_v20 = vpop.permute.xlu0 %570 }
 0x2c3   : > { %v572_v21 = vsel %vm429_vm8, %v569_v19, %v571_v20 }
 0x2c4   : > { %617 = vmatpush1.bf16.msra.mxu1 %v572_v21 }
 0x2c7   : > { %633 = vmatmul.mubr.bf16.vlgmr.msra.gmra.mrb[0].mxu1 %v977_v22 }
 0x2d2   : > { %v581_v23 = vpop.permute.xlu1 %580 }
 0x2d3   : > { %v586_v27 = vpop.permute.xlu0 %585 }
 0x39a   : > { %v634_v24 = vpop.f32.mrb[0].mxu1 }
 0x39b   : > { %v635_v25 = vadd.f32 %v634_v24, %v581_v23  ;;  %v636_v26 = vpop.f32.mrb[1].mxu1 }
 0x39c   : > { %v637_v28 = vpop.f32.mrb[2].mxu1 }
 0x39d   : > { %v638_v29 = vadd.f32 %v637_v28, %v586_v27  ;;  %v639_v3 = vpop.f32.mrb[3].mxu1  ;;  %v641_v30 = vmax.f32 %v635_v25, 0.0 }
 0x39f   : > { %v642_v31 = vmax.f32 %v638_v29, 0.0 }
 0x3a1   : > { %v841_v32 = vpack.c.bf16 %v642_v31, %v641_v30 }
 0x3a3   : > { %842 = vst [vmem:[%s354_s12] sm:$0xff] %v841_v32  }
 0x3a4   : > { %1163 = shalt.err (!%p1160_p8)
}
 0x3a5   : > { %s1164_s15 = scalar_lea.hbm %s1651_s29, 128  ;;  %s1168_s10 = scalar_lea.hbm %s1706_s6, 256 }
 0x3a6   : > { %p1165_p3 = scmp.ne.s32.totalorder %s1651_s29, %s1164_s15  ;;  %p1169_p0 = scmp.lt.u32.totalorder %s1651_s29, %s1706_s6 }
 0x3a7   : > { %p1170_p1 = scmp.lt.u32.totalorder %s1168_s10, %s1164_s15  ;;  %p1172_p6 = scmp.lt.u32.totalorder %s1164_s15, %s1651_s29 }
 0x3a8   : > { %p1166_p12 = pnand %p1165_p3, %p1729_p5 }
 0x3a9   : > { %p1171_p7 = por %p1170_p1, %p1169_p0 }
 0x3aa   : > { %p1167_p13 = pneg %p1166_p12 }
 0x3ab   : > { %p1173_p10 = por %p1172_p6, %p1171_p7 }
 0x3ad   : > { %p1174_p11 = pnand %p1173_p10, %p1167_p13 }
 0x3af   : > { %1177 = shalt.err (!%p1174_p11)
}
 0x3b0   : > { %s1264_s30 = smov 64   ;;  %s1265_s7 = smov 4  }
 0x3b1   : > { %865 = dma.vmem_to_hbm [thread:$0]  (%p1729_p5), %s1646_s14, 128, %s1651_s29, %s654_s9, %s1264_s30, %s1264_s30, %s1265_s7  }
 0x3b2 PF: > { %s683_s11 = sand.u32 1, %s1224_s21   ;;  %p1730_p2 = scmp.ne.s32.totalorder %s1724_s20, 0 }
 0x3b3   : > { %p1731_p4 = scmp.ge.s32.totalorder %s1244_s26, 2  ;;  %s684_s24 = scalar_lea.sflag [#allocation4], %s683_s11 }
 0x3b5   : > { %p888_p9 = pnand %p1731_p4, %p1730_p2 }
 0x3b7   : > { %1219 = dma.done.wait (!%p888_p9), %s684_s24, 128  }
 0x3b8   : > { %1221 = vsyncadd (!%p888_p9), %s684_s24, 4294967168  ;;  %s25_s26 = sadd.s32 1, %s1244_s26   ;;  %s1732_s21 = smov %s1228_s22 }
 0x3b9   : > { %p22_p8 = scmp.ge.s32.totalorder %s25_s26, 4   ;;  %s1733_s22 = smov %s1232_s23 }
 0x3ba   : > { %s1734_s23 = smov %s1508_s19  ;;  %s1735_s24 = smov %s1240_s25 }
 0x3bb   : > { %s1736_s25 = smov %s1738_s18  ;;  %24 = sbr.rel (!%p22_p8) target bundleno = 11 (0xb), region = 109 }
 0x3c2   :  { %689 = vsyncpa [#allocation3], 1 }
 0x3c3   :  { %691 = vsyncpa [#allocation3 + $0x1], 1 }
 0x3c4   :  { %692 = vsyncpa [#allocation6], 1 }
 0x3c5   :  { %693 = vsyncpa [#allocation9], 1 }
 0x3c6   :  { %694 = vsyncpa [#allocation12], 1 }
 0x3c7   :  { %695 = vsyncpa [#allocation4], 1 }
 0x3c8   :  { %697 = vsyncpa [#allocation4 + $0x1], 1 }

// kernel: tile.13
= control target key start
LH: loop header
LB: loop body
LE: loop exit
PB: predicated region body
PF: predicated region fallthrough
CT: control target
= control target key end

     0   :  { %s22_s0 = inlined_call_operand.vmem [shape: f32[16], index: 0, kind: input, shape index: {}]   ;;  %s23_s1 = inlined_call_operand.vmem [shape: f32[4,16], index: 1, kind: output, shape index: {}]  }
   0x1   :  { %v4_v0 = vld [vmem:[%s22_s0] ss:$0 sm:$0xff] }
   0x2   :  { %5 = vst [vmem:[%s23_s1] sm:$0xf] %v4_v0 }

// kernel: tile.0
= control target key start
LH: loop header
LB: loop body
LE: loop exit
PB: predicated region body
PF: predicated region fallthrough
CT: control target
= control target key end

     0   :  { %s254_s0 = inlined_call_operand.vmem [shape: f32[4,16], index: 0, kind: input, shape index: {}]   ;;  %s255_s1 = inlined_call_operand.hbm [shape: f32[64,1], index: 1, kind: output, shape index: {}]  }
   0x1   :  { %v5_v0 = vld [vmem:[%s254_s0] sm:$0xf] }
   0x2   :  { %6 = vst [vmem:[#allocation2] sm:$0xf] %v5_v0 }
   0x3   :  { %2 = vsyncpa [#allocation1], 0  ;;  %s181_s0 = smov 127   ;;  %s182_s8 = smov 125   ;;  %vm8_vm0 = vcmask 7168  }
   0x4   :  { %s183_s9 = smov 126   ;;  %s184_s10 = smov 124  }
   0x5   :  { %s185_s11 = smov 123   ;;  %s186_s12 = smov 122  }
   0x6   :  { %s187_s13 = smov 121   ;;  %s188_s14 = smov 120  }
   0x7   :  { %s189_s15 = smov 119   ;;  %s190_s16 = smov 118  }
   0x8   :  { %s191_s17 = smov 117   ;;  %s192_s18 = smov 116  }
   0x9   :  { %v11_v1 = vld [vmem:[#allocation2] sm:$0xf]   ;;  %s193_s19 = smov 115   ;;  %s194_s20 = smov 114  }
   0xa   :  { %v27_v2 = vld [vmem:[#allocation2] sm:$0xf]   ;;  %12 = vrot.lane.b32.xlu0 %v11_v1, %s181_s0  ;;  %s195_s21 = smov 113   ;;  %s196_s22 = smov [#allocation0]  }
   0xb   :  { %28 = vrot.lane.b32.xlu1 %v27_v2, %s182_s8  ;;  %v19_v3 = vld [vmem:[#allocation2] sm:$0xf]   ;;  %s135_s23 = sshll.u32 %s196_s22, 4  ;;  %s136_s23 = int_to_ptr.vmem [resolvable:$true] %s135_s23 }
   0xc   :  { %v35_v4 = vld [vmem:[#allocation2] sm:$0xf]   ;;  %s157_s24 = scalar_lea.vmem %s136_s23, 1024  ;;  %p162_p1 = scmp.lt.s32.totalorder %s136_s23, %s136_s23 }
   0xd   :  { %v43_v5 = vld [vmem:[#allocation2] sm:$0xf]   ;;  %p158_p0 = scmp.ne.s32.totalorder %s136_s23, %s157_s24  ;;  %p163_p2 = scmp.lt.s32.totalorder %s157_s24, %s157_s24 }
   0xe   :  { %20 = vrot.lane.b32.xlu0 %v19_v3, %s183_s9  ;;  %v51_v6 = vld [vmem:[#allocation2] sm:$0xf]  }
   0xf   :  { %36 = vrot.lane.b32.xlu1 %v35_v4, %s184_s10  ;;  %v59_v7 = vld [vmem:[#allocation2] sm:$0xf]   ;;  %p164_p3 = por %p163_p2, %p162_p1 }
  0x10   :  { %v67_v8 = vld [vmem:[#allocation2] sm:$0xf]  }
  0x11   :  { %v75_v9 = vld [vmem:[#allocation2] sm:$0xf]   ;;  %p165_p4 = pnand %p164_p3, %p158_p0 }
  0x12   :  { %44 = vrot.lane.b32.xlu0 %v43_v5, %s185_s11  ;;  %v83_v10 = vld [vmem:[#allocation2] sm:$0xf]  }
  0x13   :  { %52 = vrot.lane.b32.xlu1 %v51_v6, %s186_s12  ;;  %v7_v11 = vld [vmem:[#allocation2] sm:$0xf]  }
  0x14   :  { %9 = vst.msk [vmem:[#allocation0] ss:$16 sm:$0x3] %vm8_vm0, %v7_v11   ;;  %10 = vst.msk [vmem:[#allocation0] ss:$16 sm:$0xc] %vm8_vm0, %v7_v11  }
  0x15   :  { %v91_v12 = vld [vmem:[#allocation2] sm:$0xf]  }
  0x16   :  { %60 = vrot.lane.b32.xlu0 %v59_v7, %s187_s13  ;;  %v99_v13 = vld [vmem:[#allocation2] sm:$0xf]  }
  0x17   :  { %68 = vrot.lane.b32.xlu1 %v67_v8, %s188_s14  ;;  %v107_v14 = vld [vmem:[#allocation2] sm:$0xf]  }
  0x18   :  { %v115_v15 = vld [vmem:[#allocation2] sm:$0xf]  }
  0x19   :  { %v123_v16 = vld [vmem:[#allocation2] sm:$0xf]  }
  0x1a   :  { %76 = vrot.lane.b32.xlu0 %v75_v9, %s189_s15 }
  0x1b   :  { %84 = vrot.lane.b32.xlu1 %v83_v10, %s190_s16 }
  0x1e   :  { %92 = vrot.lane.b32.xlu0 %v91_v12, %s191_s17 }
  0x1f   :  { %100 = vrot.lane.b32.xlu1 %v99_v13, %s192_s18 }
  0x22   :  { %108 = vrot.lane.b32.xlu0 %v107_v14, %s193_s19 }
  0x23   :  { %116 = vrot.lane.b32.xlu1 %v115_v15, %s194_s20 }
  0x26   :  { %124 = vrot.lane.b32.xlu0 %v123_v16, %s195_s21 }
  0x7c   :  { %v13_v17 = vpop.permute.xlu0 %12  }
  0x7d   :  { %v29_v18 = vpop.permute.xlu1 %28   ;;  %16 = vst.msk [vmem:[#allocation0 + $0x1] ss:$16 sm:$0x3] %vm8_vm0, %v13_v17   ;;  %18 = vst.msk [vmem:[#allocation0 + $0x1] ss:$16 sm:$0xc] %vm8_vm0, %v13_v17  }
  0x7e   :  { %32 = vst.msk [vmem:[#allocation0 + $0x3] ss:$16 sm:$0x3] %vm8_vm0, %v29_v18   ;;  %34 = vst.msk [vmem:[#allocation0 + $0x3] ss:$16 sm:$0xc] %vm8_vm0, %v29_v18  }
  0x80   :  { %v21_v19 = vpop.permute.xlu0 %20  }
  0x81   :  { %v37_v20 = vpop.permute.xlu1 %36   ;;  %24 = vst.msk [vmem:[#allocation0 + $0x2] ss:$16 sm:$0x3] %vm8_vm0, %v21_v19   ;;  %26 = vst.msk [vmem:[#allocation0 + $0x2] ss:$16 sm:$0xc] %vm8_vm0, %v21_v19  }
  0x82   :  { %40 = vst.msk [vmem:[#allocation0 + $0x4] ss:$16 sm:$0x3] %vm8_vm0, %v37_v20   ;;  %42 = vst.msk [vmem:[#allocation0 + $0x4] ss:$16 sm:$0xc] %vm8_vm0, %v37_v20  }
  0x84   :  { %v45_v21 = vpop.permute.xlu0 %44  }
  0x85   :  { %v53_v22 = vpop.permute.xlu1 %52   ;;  %48 = vst.msk [vmem:[#allocation0 + $0x5] ss:$16 sm:$0x3] %vm8_vm0, %v45_v21   ;;  %50 = vst.msk [vmem:[#allocation0 + $0x5] ss:$16 sm:$0xc] %vm8_vm0, %v45_v21  }
  0x86   :  { %56 = vst.msk [vmem:[#allocation0 + $0x6] ss:$16 sm:$0x3] %vm8_vm0, %v53_v22   ;;  %58 = vst.msk [vmem:[#allocation0 + $0x6] ss:$16 sm:$0xc] %vm8_vm0, %v53_v22  }
  0x88   :  { %v61_v23 = vpop.permute.xlu0 %60  }
  0x89   :  { %v69_v24 = vpop.permute.xlu1 %68   ;;  %64 = vst.msk [vmem:[#allocation0 + $0x7] ss:$16 sm:$0x3] %vm8_vm0, %v61_v23   ;;  %66 = vst.msk [vmem:[#allocation0 + $0x7] ss:$16 sm:$0xc] %vm8_vm0, %v61_v23  }
  0x8a   :  { %72 = vst.msk [vmem:[#allocation0 + $0x8] ss:$16 sm:$0x3] %vm8_vm0, %v69_v24   ;;  %74 = vst.msk [vmem:[#allocation0 + $0x8] ss:$16 sm:$0xc] %vm8_vm0, %v69_v24  }
  0x8c   :  { %v77_v25 = vpop.permute.xlu0 %76  }
  0x8d   :  { %v85_v26 = vpop.permute.xlu1 %84   ;;  %80 = vst.msk [vmem:[#allocation0 + $0x9] ss:$16 sm:$0x3] %vm8_vm0, %v77_v25   ;;  %82 = vst.msk [vmem:[#allocation0 + $0x9] ss:$16 sm:$0xc] %vm8_vm0, %v77_v25  }
  0x8e   :  { %88 = vst.msk [vmem:[#allocation0 + $0xa] ss:$16 sm:$0x3] %vm8_vm0, %v85_v26   ;;  %90 = vst.msk [vmem:[#allocation0 + $0xa] ss:$16 sm:$0xc] %vm8_vm0, %v85_v26  }
  0x90   :  { %v93_v27 = vpop.permute.xlu0 %92  }
  0x91   :  { %v101_v28 = vpop.permute.xlu1 %100   ;;  %96 = vst.msk [vmem:[#allocation0 + $0xb] ss:$16 sm:$0x3] %vm8_vm0, %v93_v27   ;;  %98 = vst.msk [vmem:[#allocation0 + $0xb] ss:$16 sm:$0xc] %vm8_vm0, %v93_v27  }
  0x92   :  { %104 = vst.msk [vmem:[#allocation0 + $0xc] ss:$16 sm:$0x3] %vm8_vm0, %v101_v28   ;;  %106 = vst.msk [vmem:[#allocation0 + $0xc] ss:$16 sm:$0xc] %vm8_vm0, %v101_v28  }
  0x94   :  { %v109_v29 = vpop.permute.xlu0 %108  }
  0x95   :  { %v117_v30 = vpop.permute.xlu1 %116   ;;  %112 = vst.msk [vmem:[#allocation0 + $0xd] ss:$16 sm:$0x3] %vm8_vm0, %v109_v29   ;;  %114 = vst.msk [vmem:[#allocation0 + $0xd] ss:$16 sm:$0xc] %vm8_vm0, %v109_v29  }
  0x96   :  { %120 = vst.msk [vmem:[#allocation0 + $0xe] ss:$16 sm:$0x3] %vm8_vm0, %v117_v30   ;;  %122 = vst.msk [vmem:[#allocation0 + $0xe] ss:$16 sm:$0xc] %vm8_vm0, %v117_v30  }
  0x98   :  { %v125_v31 = vpop.permute.xlu0 %124  }
  0x99   :  { %128 = vst.msk [vmem:[#allocation0 + $0xf] ss:$16 sm:$0x3] %vm8_vm0, %v125_v31   ;;  %130 = vst.msk [vmem:[#allocation0 + $0xf] ss:$16 sm:$0xc] %vm8_vm0, %v125_v31  }
  0x9a   :  { %168 = shalt.err (!%p165_p4)
}
  0x9b   :  { %s169_s27 = scalar_lea.hbm %s255_s1, 1024 }
  0x9c   :  { %p170_p5 = scmp.ne.s32.totalorder %s255_s1, %s169_s27  ;;  %p173_p6 = scmp.lt.u32.totalorder %s169_s27, %s255_s1 }
  0x9e   :  { %p175_p7 = pnand %p173_p6, %p170_p5 }
  0xa0   :  { %178 = shalt.err (!%p175_p7)
}
  0xa1   :  { %138 = dma.vmem_to_hbm [thread:$0]  %s136_s23, 1024, %s255_s1, [#allocation1]  }
  0xa2   :  { %179 = dma.done.wait [#allocation1], 1024  }
  0xa3   :  { %180 = vsyncadd [#allocation1], 4294966272 }
  0xa4   :  { %140 = vsyncpa [#allocation1], 1 }

// kernel: channel_attn_unet_forward.12
= control target key start
LH: loop header
LB: loop body
LE: loop exit
PB: predicated region body
PF: predicated region fallthrough
CT: control target
= control target key end

     0   :  { %s2002_s0 = inlined_call_operand.hbm [shape: bf16[2,16,256], index: 0, kind: input, shape index: {}]   ;;  %s2003_s1 = inlined_call_operand.hbm [shape: bf16[32,144], index: 1, kind: input, shape index: {}]   ;;  %s2004_s2 = inlined_call_operand.hbm [shape: f32[32,1], index: 2, kind: input, shape index: {}]   ;;  %s2005_s3 = inlined_call_operand.hbm [shape: f32[1,256], index: 3, kind: input, shape index: {}]   ;;  %s2006_s4 = inlined_call_operand.hbm [shape: bf16[32,288], index: 4, kind: input, shape index: {}]   ;;  %s2007_s5 = inlined_call_operand.hbm [shape: f32[32,1], index: 5, kind: input, shape index: {}]   ;;  %s2008_s6 = inlined_call_operand.hbm [shape: bf16[2,32,128], index: 6, kind: output, shape index: {}]  }
   0x1   :  { %2018 = sst [smem:[#allocation19_spill]] %s2003_s1 }
   0x2   :  { %2019 = sst [smem:[#allocation20_spill]] %s2004_s2 }
   0x3   :  { %11 = vsyncpa [#allocation3], 0 }
   0x4   :  { %13 = vsyncpa [#allocation3 + $0x1], 0 }
   0x5   :  { %14 = vsyncpa [#allocation6], 0 }
   0x6   :  { %15 = vsyncpa [#allocation9], 0 }
   0x7   :  { %16 = vsyncpa [#allocation12], 0 }
   0x8   :  { %17 = vsyncpa [#allocation4], 0 }
   0x9   :  { %19 = vsyncpa [#allocation4 + $0x1], 0  ;;  %s1579_s21 = smov 0   ;;  %s1581_s22 = smov 0  }
   0xa   :  { %s1583_s23 = smov 0   ;;  %s1585_s24 = smov 0  }
   0xb   :  { %s1587_s25 = smov 0   ;;  %s1589_s26 = smov 0  }
   0xc LB: > { %s2009_s27 = sadd.s32 4294967295, %s1520_s26   ;;  %p1009_p0 = scmp.ge.s32.totalorder %s1520_s26, 1  ;;  %s1520_s26 = sphi %s1589_s26, %s25_s26   ;;  %s1516_s25 = sphi %s1587_s25, %s2044_s25   ;;  %s1512_s24 = sphi %s1585_s24, %s2043_s24   ;;  %s1508_s23 = sphi %s1583_s23, %s2042_s23   ;;  %s1504_s22 = sphi %s1581_s22, %s2041_s22   ;;  %s1500_s21 = sphi %s1579_s21, %s2040_s21  }
   0xd   : > { %p1613_p1 = scmp.eq.s32.totalorder %s2009_s27, 0  ;;  %p201_p2 = scmp.lt.s32.totalorder %s1520_s26, 3 }
   0xe   : > { %s1522_s30 = smov [#allocation5]   ;;  %s1523_s9 = smov [#allocation8]  }
   0xf   : > { %s2020_s28 = scalar_select %p1613_p1, 1, 0 }
  0x10   : > { %p1618_p3 = pnand %p1009_p0, %p201_p2  ;;  %s213_s7 = sshll.u32 %s1522_s30, 4  ;;  %s1622_s7 = int_to_ptr.vmem [resolvable:$true] %s213_s7 }
  0x11   : > { %s240_s10 = sshll.u32 %s1523_s9, 4  ;;  %s1524_s11 = smov [#allocation7]   ;;  %s1633_s10 = int_to_ptr.vmem [resolvable:$true] %s240_s10 }
  0x12   : > { %s2021_s29 = scalar_select %p1618_p3, 1, 0 }
  0x13   : > { %p1133_p4 = pneg %p1618_p3  ;;  %s1635_s12 = sshll.u32 %s1524_s11, 4  ;;  %s227_s12 = int_to_ptr.vmem [resolvable:$true] %s1635_s12 }
  0x14   : > { %s2023_s1 = sld [smem:[#allocation19_spill]] }
  0x15   : > { %p1629_p6 = pnand %p1133_p4, %p1613_p1 }
  0x17   : > { %p1645_p8 = pneg %p1629_p6 }
  0x1a   : > { %s1256_s15 = scalar_lea.hbm %s2023_s1, 512 }
  0x1b   : > { %p1257_p7 = scmp.ne.s32.totalorder %s2023_s1, %s1256_s15  ;;  %p1263_p11 = scmp.lt.u32.totalorder %s1256_s15, %s2023_s1 }
  0x1d   : > { %p1259_p9 = pnand %p1645_p8, %p1257_p7 }
  0x1f   : > { %p1260_p10 = pneg %p1259_p9 }
  0x21   : > { %p1265_p12 = pnand %p1263_p11, %p1260_p10 }
  0x23   : > { %1268 = shalt.err (!%p1265_p12)
}
  0x24   : > { %s1269_s30 = scalar_lea.vmem %s1622_s7, 512  ;;  %p1277_p4 = scmp.lt.s32.totalorder %s1622_s7, %s1622_s7 }
  0x25   : > { %p1270_p13 = scmp.ne.s32.totalorder %s1622_s7, %s1269_s30  ;;  %p1278_p5 = scmp.lt.s32.totalorder %s1269_s30, %s1269_s30 }
  0x27   : > { %p1272_p0 = pnand %p1270_p13, %p1645_p8  ;;  %p1279_p7 = por %p1278_p5, %p1277_p4 }
  0x29   : > { %p1273_p2 = pneg %p1272_p0 }
  0x2b   : > { %p1280_p9 = pnand %p1279_p7, %p1273_p2 }
  0x2d   : > { %1283 = shalt.err (!%p1280_p9)
}
  0x2e   : > { %s2013_s9 = smov 128   ;;  %s2015_s11 = smov 8  }
  0x2f   : > { %1136 = dma.hbm_to_vmem [thread:$0]  (!%p1629_p6), %s2023_s1, 512, %s1622_s7, [#allocation6], %s2013_s9, %s2013_s9, %s2015_s11  }
  0x30   : > { %s1284_s17 = scalar_lea.hbm %s2005_s3, 32 }
  0x31   : > { %p1285_p5 = scmp.ne.s32.totalorder %s2005_s3, %s1284_s17  ;;  %p1291_p12 = scmp.lt.u32.totalorder %s1284_s17, %s2005_s3 }
  0x33   : > { %p1287_p10 = pnand %p1285_p5, %p1645_p8 }
  0x35   : > { %p1288_p11 = pneg %p1287_p10 }
  0x37   : > { %p1293_p13 = pnand %p1291_p12, %p1288_p11 }
  0x39   : > { %1296 = shalt.err (!%p1293_p13)
}
  0x3a   : > { %s1297_s7 = scalar_lea.vmem %s1633_s10, 32  ;;  %p1305_p7 = scmp.lt.s32.totalorder %s1633_s10, %s1633_s10 }
  0x3b   : > { %p1298_p0 = scmp.ne.s32.totalorder %s1633_s10, %s1297_s7  ;;  %p1306_p9 = scmp.lt.s32.totalorder %s1297_s7, %s1297_s7 }
  0x3d   : > { %p1300_p2 = pnand %p1298_p0, %p1645_p8  ;;  %p1307_p5 = por %p1306_p9, %p1305_p7 }
  0x3f   : > { %p1301_p4 = pneg %p1300_p2 }
  0x41   : > { %p1308_p10 = pnand %p1307_p5, %p1301_p4 }
  0x43   : > { %1311 = shalt.err (!%p1308_p10)
}
  0x44   : > { %1142 = dma.hbm_to_vmem [thread:$0]  (!%p1629_p6), %s2005_s3, 32, %s1633_s10, [#allocation9]  }
  0x45   : > { %s2025_s2 = sld [smem:[#allocation20_spill]] }
  0x4b   : > { %s1312_s16 = scalar_lea.hbm %s2025_s2, 512 }
  0x4c   : > { %p1313_p11 = scmp.ne.s32.totalorder %s2025_s2, %s1312_s16  ;;  %p1319_p0 = scmp.lt.u32.totalorder %s1312_s16, %s2025_s2 }
  0x4e   : > { %p1315_p12 = pnand %p1313_p11, %p1645_p8 }
  0x50   : > { %p1316_p13 = pneg %p1315_p12 }
  0x52   : > { %p1321_p2 = pnand %p1319_p0, %p1316_p13 }
  0x54   : > { %1324 = shalt.err (!%p1321_p2)
}
  0x55   : > { %s1325_s7 = scalar_lea.vmem %s227_s12, 512  ;;  %p1333_p5 = scmp.lt.s32.totalorder %s227_s12, %s227_s12 }
  0x56   : > { %p1326_p4 = scmp.ne.s32.totalorder %s227_s12, %s1325_s7  ;;  %p1334_p10 = scmp.lt.s32.totalorder %s1325_s7, %s1325_s7 }
  0x58   : > { %p1328_p7 = pnand %p1326_p4, %p1645_p8  ;;  %p1335_p3 = por %p1334_p10, %p1333_p5 }
  0x5a   : > { %p1329_p9 = pneg %p1328_p7 }
  0x5c   : > { %p1336_p1 = pnand %p1335_p3, %p1329_p9 }
  0x5e   : > { %1339 = shalt.err (!%p1336_p1)
}
  0x5f   : > { %1139 = dma.hbm_to_vmem [thread:$0]  (!%p1629_p6), %s2025_s2, 512, %s227_s12, [#allocation6], %s2013_s9, %s2013_s9, %s2015_s11  }
  0x60   : > { %s1527_s13 = smov [#allocation10]   ;;  %s1340_s17 = scalar_lea.hbm %s2006_s4, 768 }
  0x61   : > { %s250_s14 = sshll.u32 %s1527_s13, 4  ;;  %p1341_p1 = scmp.ne.s32.totalorder %s2006_s4, %s1340_s17  ;;  %s251_s14 = int_to_ptr.vmem [resolvable:$true] %s250_s14 }
  0x62   : > { %p1347_p12 = scmp.lt.u32.totalorder %s1340_s17, %s2006_s4 }
  0x63   : > { %p1343_p3 = pnand %p1341_p1, %p1645_p8 }
  0x65   : > { %p1344_p11 = pneg %p1343_p3 }
  0x67   : > { %p1349_p13 = pnand %p1347_p12, %p1344_p11 }
  0x69   : > { %1352 = shalt.err (!%p1349_p13)
}
  0x6a   : > { %s1353_s12 = scalar_lea.vmem %s251_s14, 768  ;;  %p1361_p7 = scmp.lt.s32.totalorder %s251_s14, %s251_s14 }
  0x6b   : > { %p1354_p0 = scmp.ne.s32.totalorder %s251_s14, %s1353_s12  ;;  %p1362_p9 = scmp.lt.s32.totalorder %s1353_s12, %s1353_s12 }
  0x6d   : > { %p1356_p2 = pnand %p1354_p0, %p1645_p8  ;;  %p1363_p5 = por %p1362_p9, %p1361_p7 }
  0x6f   : > { %p1357_p4 = pneg %p1356_p2 }
  0x71   : > { %p1364_p10 = pnand %p1363_p5, %p1357_p4 }
  0x73   : > { %1367 = shalt.err (!%p1364_p10)
}
  0x74   : > { %s1528_s10 = smov 192   ;;  %s1529_s27 = smov 12  }
  0x75   : > { %1145 = dma.hbm_to_vmem [thread:$0]  (!%p1629_p6), %s2006_s4, 768, %s251_s14, [#allocation9], %s1528_s10, %s1528_s10, %s1529_s27  }
  0x76   : > { %s1530_s16 = smov [#allocation11]   ;;  %s1368_s30 = scalar_lea.hbm %s2007_s5, 512 }
  0x77   : > { %s263_s17 = sshll.u32 %s1530_s16, 4  ;;  %p1369_p1 = scmp.ne.s32.totalorder %s2007_s5, %s1368_s30  ;;  %s264_s17 = int_to_ptr.vmem [resolvable:$true] %s263_s17 }
  0x78   : > { %p1375_p12 = scmp.lt.u32.totalorder %s1368_s30, %s2007_s5 }
  0x79   : > { %p1371_p3 = pnand %p1369_p1, %p1645_p8 }
  0x7b   : > { %p1372_p11 = pneg %p1371_p3 }
  0x7d   : > { %p1377_p13 = pnand %p1375_p12, %p1372_p11 }
  0x7f   : > { %1380 = shalt.err (!%p1377_p13)
}
  0x80   : > { %s1381_s14 = scalar_lea.vmem %s264_s17, 512  ;;  %p1389_p7 = scmp.lt.s32.totalorder %s264_s17, %s264_s17 }
  0x81   : > { %p1382_p0 = scmp.ne.s32.totalorder %s264_s17, %s1381_s14  ;;  %p1390_p9 = scmp.lt.s32.totalorder %s1381_s14, %s1381_s14 }
  0x83   : > { %p1384_p2 = pnand %p1382_p0, %p1645_p8  ;;  %p1391_p5 = por %p1390_p9, %p1389_p7 }
  0x85   : > { %p1385_p4 = pneg %p1384_p2 }
  0x87   : > { %p1392_p10 = pnand %p1391_p5, %p1385_p4 }
  0x89   : > { %1395 = shalt.err (!%p1392_p10)
}
  0x8a   : > { %s2026_s10 = smov 8   ;;  %s2027_s27 = smov 128  }
  0x8b   : > { %1148 = dma.hbm_to_vmem [thread:$0]  (!%p1629_p6), %s2007_s5, 512, %s264_s17, [#allocation12], %s2027_s27, %s2027_s27, %s2026_s10  }
  0x8c   : > { %s1008_s8 = sadd.s32 4294967294, %s1520_s26   ;;  %s37_s18 = sadd.s32 1, %s1516_s25 }
  0x8d   : > { %s44_s13 = sadd.s32 1, %s1508_s23  ;;  %p39_p8 = scmp.ge.s32.totalorder %s37_s18, 2 }
  0x8e   : > { %p51_p1 = scmp.ne.s32.totalorder %s1508_s23, %s1504_s22  ;;  %p52_p3 = scmp.eq.s32.totalorder %s1520_s26, 0 }
  0x8f   : > { %p57_p11 = scmp.ne.s32.totalorder %s1504_s22, %s1500_s21  ;;  %s2046_s18 = smov (%p39_p8, %s37_s18), 0 }
  0x90   : > { %p1763_p12 = por %p52_p3, %p51_p1  ;;  %p2029_p13 = scmp.ne.s32.totalorder %s2020_s28, 0 }
  0x91   : > { %s41_s17 = ssub.s32 %s1516_s25, %s2046_s18  ;;  %s2031_s19 = sadd.s32 4294967295, %s1520_s26  }
  0x92   : > { %p1769_p6 = por %p2029_p13, %p57_p11  ;;  %p188_p0 = scmp.eq.s32.totalorder %s2031_s19, 1 }
  0x93   : > { %p42_p2 = scmp.eq.s32.totalorder %s41_s17, 0  ;;  %p194_p4 = scmp.eq.s32.totalorder %s1008_s8, 1 }
  0x94   : > { %p1777_p7 = por %p188_p0, %p51_p1  ;;  %p1162_p9 = scmp.lt.s32.totalorder %s1520_s26, 2 }
  0x95   : > { %s1783_s30 = scalar_select %p42_p2, %s1508_s23, %s44_s13  }
  0x96   : > { %s2032_s20 = scalar_select %p1777_p7, 1, 0 }
  0x97   : > { %p1785_p5 = por %p194_p4, %p57_p11  ;;  %s277_s12 = sand.u32 1, %s1508_s23  }
  0x98   : > { %s1016_s14 = sshll.u32 %s277_s12, 4  ;;  %s1052_s9 = sshll.u32 %s1516_s25, 8 }
  0x99   : > { %s2033_s7 = scalar_select %p1785_p5, 1, 0 }
  0x9a   : > { %s1794_s19 = scalar_lea.hbm %s2002_s0, %s1052_s9  ;;  %s281_s8 = scalar_lea.vmem [#allocation2], %s1016_s14 }
  0x9b   : > { %s288_s17 = sshll.u32 %s281_s8, 4  ;;  %p1800_p10 = pnand %p1162_p9, %p1763_p12  ;;  %s1796_s17 = int_to_ptr.vmem [resolvable:$true] %s288_s17 }
  0x9c   : > { %s1804_s2 = scalar_lea.sflag [#allocation3], %s277_s12  ;;  %s1396_s1 = scalar_lea.hbm %s1794_s19, 256 }
  0x9d   : > { %p1397_p8 = scmp.ne.s32.totalorder %s1794_s19, %s1396_s1  ;;  %p1398_p1 = pneg %p1800_p10 }
  0x9e   : > { %s1401_s15 = scalar_lea.hbm %s2002_s0, 512  ;;  %p1402_p12 = scmp.lt.u32.totalorder %s1794_s19, %s2002_s0 }
  0x9f   : > { %p1399_p3 = pnand %p1398_p1, %p1397_p8  ;;  %p1403_p13 = scmp.lt.u32.totalorder %s1401_s15, %s1396_s1 }
  0xa0   : > { %p1405_p2 = scmp.lt.u32.totalorder %s1396_s1, %s1794_s19 }
  0xa1   : > { %p1400_p11 = pneg %p1399_p3  ;;  %p1404_p0 = por %p1403_p13, %p1402_p12 }
  0xa3   : > { %p1406_p4 = por %p1405_p2, %p1404_p0 }
  0xa5   : > { %p1407_p9 = pnand %p1406_p4, %p1400_p11 }
  0xa7   : > { %1410 = shalt.err (!%p1407_p9)
}
  0xa8   : > { %s1411_s12 = scalar_lea.vmem %s1796_s17, 256  ;;  %s1531_s14 = smov [#allocation2]  }
  0xa9   : > { %p1412_p8 = scmp.ne.s32.totalorder %s1796_s17, %s1411_s12  ;;  %s1416_s9 = sshll.u32 %s1531_s14, 4  ;;  %s1417_s9 = int_to_ptr.vmem [resolvable:$false] %s1416_s9 }
  0xaa   : > { %s1418_s11 = scalar_lea.vmem %s1417_s9, 512  ;;  %p1419_p7 = scmp.lt.s32.totalorder %s1796_s17, %s1417_s9 }
  0xab   : > { %p1414_p3 = pnand %p1412_p8, %p1398_p1  ;;  %p1420_p12 = scmp.lt.s32.totalorder %s1418_s11, %s1411_s12 }
  0xad   : > { %p1415_p5 = pneg %p1414_p3  ;;  %p1421_p13 = por %p1420_p12, %p1419_p7 }
  0xaf   : > { %p1422_p0 = pnand %p1421_p13, %p1415_p5 }
  0xb1   : > { %1425 = shalt.err (!%p1422_p0)
}
  0xb2   : > { %1152 = dma.hbm_to_vmem [thread:$0]  (!%p1800_p10), %s1794_s19, 256, %s1796_s17, %s1804_s2, %s2027_s27, %s2027_s27, %s2026_s10  }
  0xb3   : > { %p2035_p1 = scmp.ne.s32.totalorder %s2021_s29, 0 }
  0xb4   : > { %s1838_s1 = sand.u32 (!%p2035_p1), 1, %s1504_s22  }
  0xb5   : > { %300 = sbr.rel (%p2035_p1) target bundleno = 995 (0x3e3), region = 44  ;;  %s1020_s15 = sshll.u32 (!%p2035_p1), %s1838_s1, 4 }
  0xb6   : > { %s303_s8 = scalar_lea.sflag (!%p2035_p1), [#allocation3], %s1838_s1  ;;  %s306_s13 = scalar_lea.vmem (!%p2035_p1), [#allocation2], %s1020_s15 }
  0xbc   : > { %1479 = dma.done.wait (%p1769_p6), %s303_s8, 256  }
  0xbd   : > { %1481 = vsyncadd (%p1769_p6), %s303_s8, 4294967040  ;;  %p2036_p7 = scmp.ne.s32.totalorder %s2020_s28, 0 }
  0xbf   : > { %1483 = dma.done.wait (%p2036_p7), [#allocation6], 1024  }
  0xc0   : > { %1485 = vsyncadd (%p2036_p7), [#allocation6], 4294966272 }
  0xc1   : > { %1487 = dma.done.wait (%p2036_p7), [#allocation9], 800  }
  0xc2   : > { %1489 = vsyncadd (%p2036_p7), [#allocation9], 4294966496 }
  0xc3   : > { %1491 = dma.done.wait (%p2036_p7), [#allocation12], 512  }
  0xc4   : > { %1493 = vsyncadd (%p2036_p7), [#allocation12], 4294966784  ;;  %v1239_v0 = vld [vmem:[%s306_s13] ss:$8 sps:$4 sm:$0xff]   ;;  %v1241_v1 = vld [vmem:[%s306_s13 + $0x4] ss:$8 sps:$4 sm:$0xff]   ;;  %v548_v35 = vlaneseq }
  0xc5   : > { %s1532_s2 = smov 126   ;;  %s1533_s29 = smov 127   ;;  %486 = vmatprep.subr.bf16.mxu0 %v1241_v1  ;;  %v1244_v2 = vld [vmem:[#allocation5 + $0x4] ss:$8 sps:$4 sm:$0xff]   ;;  %vm479_vm0 = vcmask 130048   ;;  %v1540_v5 = vmov 0  }
  0xc6   : > { %377 = vrot.lane.b32.xlu1 %v1239_v0, %s1532_s2  ;;  %369 = vrot.lane.b32.xlu0 %v1239_v0, %s1533_s29  ;;  %s1534_s10 = smov 120   ;;  %s1535_s28 = smov 119   ;;  %v438_v3 = vld [vmem:[#allocation7 + $0x8] sm:$0xff]  ;;  %v437_v4 = vld [vmem:[#allocation7] sm:$0xff]  ;;  %v439_v6 = vld [vmem:[#allocation7 + $0x10] sm:$0xff]  ;;  %vm373_vm1 = vcmask 1039360  }
  0xc7   : > { %487 = vmatpush1.bf16.msra.mxu0 %v1239_v0  ;;  %s1536_s27 = smov 118   ;;  %s1537_s16 = smov 112   ;;  %1033 = vmatprep.mubr.msk.bf16.mxu0 %vm479_vm0, %v1244_v2  ;;  %v440_v7 = vld [vmem:[#allocation7 + $0x18] sm:$0xff]  ;;  %vm381_vm2 = vcmask 1031168   ;;  %vm389_vm3 = vcmask 982016   ;;  %vm397_vm4 = vcmask 973824  }
  0xc8   : > { %s1538_s19 = smov 111   ;;  %s1539_s17 = smov 110   ;;  %1238 = vset.pattern.permute.xlu1 %v1540_v5  ;;  %1237 = vset.pattern.permute.xlu0 %v1540_v5  ;;  %vm405_vm5 = vcmask 965632   ;;  %vm413_vm6 = vcmask 916480   ;;  %vm421_vm7 = vcmask 908288   ;;  %vm429_vm8 = vcmask 900096  }
  0xc9   : > { %v1242_v32 = vld [vmem:[#allocation5] ss:$8 sps:$4 sm:$0xff]   ;;  %v1245_v33 = vld [vmem:[#allocation5 + $0x14] ss:$8 sps:$4 sm:$0xff]   ;;  %v1247_v34 = vld [vmem:[#allocation5 + $0x10] ss:$8 sps:$4 sm:$0xff]  }
  0xca   : > { %379 = vrot.lane.b32.xlu1 %v1241_v1, %s1532_s2  ;;  %371 = vrot.lane.b32.xlu0 %v1241_v1, %s1533_s29  ;;  %v549_v36 = vshrl.u32 %v548_v35, 7  ;;  %v358_v39 = vld [vmem:[#allocation8] sm:$0x3]  ;;  %vm732_vm9 = vcmask 261120   ;;  %s354_s12 = scalar_lea.vmem [#allocation13], %s1020_s15  ;;  %s1057_s9 = sshll.u32 %s1512_s24, 8 }
  0xcb   : > { %s876_s14 = sshll.u32 %s354_s12, 4  ;;  %s1953_s13 = scalar_lea.hbm %s2008_s6, %s1057_s9  ;;  %s1948_s14 = int_to_ptr.vmem [resolvable:$true] %s876_s14 }
  0xcc   : > { %v550_v38 = vsub.s32 0, %v549_v36  ;;  %v554_v41 = vsub.s32 1, %v549_v36  ;;  %s862_s15 = scalar_lea.sflag [#allocation4], %s1838_s1  ;;  %s1426_s24 = scalar_lea.vmem %s1948_s14, 256 }
  0xcd   : > { %p1427_p6 = scmp.ne.s32.totalorder %s1948_s14, %s1426_s24  ;;  %p2037_p5 = scmp.ne.s32.totalorder %s2032_s20, 0 }
  0xce   : > { %387 = vrot.lane.b32.xlu1 %v1241_v1, %s1534_s10  ;;  %385 = vrot.lane.b32.xlu0 %v1239_v0, %s1534_s10  ;;  %v551_v48 = vrot.slane %v358_v39, %v550_v38  ;;  %v555_v52 = vrot.slane %v358_v39, %v554_v41 }
  0xcf   : > { %p1428_p10 = pnand %p1427_p6, %p2037_p5 }
  0xd1   : > { %p1429_p11 = pneg %p1428_p10 }
  0xd2   : > { %395 = vrot.lane.b32.xlu1 %v1241_v1, %s1535_s28  ;;  %393 = vrot.lane.b32.xlu0 %v1239_v0, %s1535_s28 }
  0xd6   : > { %403 = vrot.lane.b32.xlu1 %v1241_v1, %s1536_s27  ;;  %401 = vrot.lane.b32.xlu0 %v1239_v0, %s1536_s27 }
  0xda   : > { %411 = vrot.lane.b32.xlu1 %v1241_v1, %s1537_s16  ;;  %409 = vrot.lane.b32.xlu0 %v1239_v0, %s1537_s16 }
  0xde   : > { %419 = vrot.lane.b32.xlu1 %v1241_v1, %s1538_s19  ;;  %417 = vrot.lane.b32.xlu0 %v1239_v0, %s1538_s19 }
  0xe2   : > { %427 = vrot.lane.b32.xlu1 %v1241_v1, %s1539_s17  ;;  %425 = vrot.lane.b32.xlu0 %v1239_v0, %s1539_s17 }
  0xe6   : > { %448 = vperm.xlu1 %1238, %v438_v3   ;;  %443 = vperm.xlu0 %1237, %v437_v4  }
  0xea   : > { %453 = vperm.xlu1 %1238, %v439_v6   ;;  %458 = vperm.xlu0 %1237, %v440_v7  }
 0x138   : > { %v378_v8 = vpop.permute.xlu1 %377  ;;  %v370_v9 = vpop.permute.xlu0 %369 }
 0x13c   : > { %v380_v10 = vpop.permute.xlu1 %379  ;;  %v372_v11 = vpop.permute.xlu0 %371 }
 0x13d   : > { %488 = vmatprep.subr.bf16.mxu0 %v372_v11  ;;  %v374_v12 = vsel %vm373_vm1, %v370_v9, %v372_v11  ;;  %v382_v15 = vsel %vm381_vm2, %v378_v8, %v380_v10 }
 0x13e   : > { %489 = vmatpush1.bf16.msra.mxu0 %v374_v12 }
 0x13f   : > { %490 = vmatprep.subr.bf16.mxu0 %v380_v10 }
 0x140   : > { %v388_v13 = vpop.permute.xlu1 %387  ;;  %v386_v14 = vpop.permute.xlu0 %385 }
 0x141   : > { %v390_v16 = vsel %vm389_vm3, %v386_v14, %v388_v13 }
 0x142   : > { %491 = vmatpush1.bf16.msra.mxu0 %v382_v15 }
 0x143   : > { %492 = vmatprep.subr.bf16.mxu0 %v388_v13 }
 0x144   : > { %v396_v17 = vpop.permute.xlu1 %395  ;;  %v394_v18 = vpop.permute.xlu0 %393 }
 0x145   : > { %v398_v19 = vsel %vm397_vm4, %v394_v18, %v396_v17  ;;  %v1250_v18 = vld [vmem:[#allocation10 + $0x4] ss:$12 sps:$4 sm:$0xff]  }
 0x146   : > { %493 = vmatpush1.bf16.msra.mxu0 %v390_v16  ;;  %771 = vmatprep.mubr.bf16.mxu1 %v1250_v18 }
 0x147   : > { %494 = vmatprep.subr.bf16.mxu0 %v396_v17 }
 0x148   : > { %v404_v20 = vpop.permute.xlu1 %403  ;;  %v402_v21 = vpop.permute.xlu0 %401 }
 0x149   : > { %v406_v22 = vsel %vm405_vm5, %v402_v21, %v404_v20  ;;  %v680_v21 = vld [vmem:[#allocation11 + $0x10] sm:$0xff] }
 0x14a   : > { %495 = vmatpush1.bf16.msra.mxu0 %v398_v19  ;;  %v678_v19 = vld [vmem:[#allocation11] sm:$0xff] }
 0x14b   : > { %496 = vmatprep.subr.bf16.mxu0 %v404_v20  ;;  %v679_v20 = vld [vmem:[#allocation11 + $0x8] sm:$0xff] }
 0x14c   : > { %v412_v23 = vpop.permute.xlu1 %411  ;;  %v410_v24 = vpop.permute.xlu0 %409 }
 0x14d   : > { %v414_v25 = vsel %vm413_vm6, %v410_v24, %v412_v23 }
 0x14e   : > { %497 = vmatpush1.bf16.msra.mxu0 %v406_v22  ;;  %v681_v22 = vld [vmem:[#allocation11 + $0x18] sm:$0xff] }
 0x14f   : > { %498 = vmatprep.subr.bf16.mxu0 %v412_v23 }
 0x150   : > { %v420_v26 = vpop.permute.xlu1 %419  ;;  %v418_v27 = vpop.permute.xlu0 %417 }
 0x151   : > { %v422_v28 = vsel %vm421_vm7, %v418_v27, %v420_v26 }
 0x152   : > { %499 = vmatpush1.bf16.msra.mxu0 %v414_v25 }
 0x153   : > { %500 = vmatprep.subr.bf16.mxu0 %v420_v26 }
 0x154   : > { %v428_v29 = vpop.permute.xlu1 %427  ;;  %v426_v30 = vpop.permute.xlu0 %425 }
 0x155   : > { %v430_v31 = vsel %vm429_vm8, %v426_v30, %v428_v29 }
 0x156   : > { %501 = vmatpush1.bf16.msra.mxu0 %v422_v28 }
 0x157   : > { %502 = vmatprep.subr.bf16.mxu0 %v428_v29 }
 0x15a   : > { %503 = vmatpush1.bf16.msra.mxu0 %v430_v31 }
 0x15d   : > { %519 = vmatmul.mubr.bf16.vlgmr.msra.gmra.mrb[0].mxu0 %v1242_v32 }
 0x15e   : > { %1034 = vmatprep.mubr.msk.bf16.mxu0 %vm479_vm0, %v1245_v33 }
 0x165   : > { %529 = vmatmul.mubr.bf16.gmra.mrb[4].mxu0 %v1247_v34  ;;  %v444_v37 = vpop.permute.xlu0 %443  ;;  %v449_v44 = vpop.permute.xlu1 %448 }
 0x169   : > { %v454_v59 = vpop.permute.xlu1 %453  ;;  %v459_v1 = vpop.permute.xlu0 %458 }
 0x230   : > { %v520_v40 = vpop.f32.mrb[0].mxu0 }
 0x231   : > { %v521_v42 = vadd.f32 %v520_v40, %v444_v37  ;;  %v522_v43 = vpop.f32.mrb[1].mxu0 }
 0x232   : > { %v523_v45 = vadd.f32 %v522_v43, %v444_v37  ;;  %v524_v46 = vpop.f32.mrb[2].mxu0 }
 0x233   : > { %v539_v47 = vmax.f32 %v521_v42, 0.0  ;;  %v525_v49 = vadd.f32 %v524_v46, %v449_v44  ;;  %v526_v50 = vpop.f32.mrb[3].mxu0 }
 0x234   : > { %v540_v51 = vmax.f32 %v523_v45, 0.0  ;;  %v527_v53 = vadd.f32 %v526_v50, %v449_v44 }
 0x235   : > { %v541_v54 = vmax.f32 %v525_v49, 0.0  ;;  %v558_v56 = vmul.f32 %v551_v48, %v539_v47 }
 0x236   : > { %v542_v55 = vmax.f32 %v527_v53, 0.0  ;;  %v559_v58 = vmul.f32 %v555_v52, %v540_v51 }
 0x237   : > { %v560_v57 = vmul.f32 %v551_v48, %v541_v54 }
 0x238   : > { %v561_v60 = vmul.f32 %v555_v52, %v542_v55  ;;  %v530_v61 = vpop.f32.mrb[4].mxu0 }
 0x239   : > { %v1886_v62 = vpack.c.bf16 %v560_v57, %v558_v56  ;;  %v531_v63 = vadd.f32 %v530_v61, %v454_v59  ;;  %v532_v0 = vpop.f32.mrb[5].mxu0 }
 0x23a   : > { %v567_v2 = vpack.c.bf16 %v561_v60, %v559_v58  ;;  %v533_v3 = vadd.f32 %v532_v0, %v454_v59  ;;  %v534_v4 = vpop.f32.mrb[6].mxu0 }
 0x23b   : > { %v543_v5 = vmax.f32 %v531_v63, 0.0  ;;  %v535_v6 = vadd.f32 %v534_v4, %v459_v1  ;;  %v536_v7 = vpop.f32.mrb[7].mxu0  ;;  %610 = vrot.lane.b32.xlu1 %v1886_v62, %s1535_s28 }
 0x23c   : > { %v544_v8 = vmax.f32 %v533_v3, 0.0  ;;  %v537_v9 = vadd.f32 %v536_v7, %v459_v1  ;;  %612 = vrot.lane.b32.xlu0 %v567_v2, %s1535_s28  ;;  %v1248_v1 = vld [vmem:[#allocation10] ss:$12 sps:$4 sm:$0xff]  }
 0x23d   : > { %v545_v10 = vmax.f32 %v535_v6, 0.0  ;;  %v562_v12 = vmul.f32 %v551_v48, %v543_v5 }
 0x23e   : > { %v546_v11 = vmax.f32 %v537_v9, 0.0  ;;  %v563_v14 = vmul.f32 %v555_v52, %v544_v8  ;;  %v1253_v9 = vld [vmem:[#allocation10 + $0x18] ss:$12 sps:$4 sm:$0xff]  }
 0x23f   : > { %v564_v13 = vmul.f32 %v551_v48, %v545_v10  ;;  %622 = vrot.lane.b32.xlu1 %v1886_v62, %s1536_s27  ;;  %v1254_v10 = vld [vmem:[#allocation10 + $0x8] ss:$12 sps:$4 sm:$0xff]  }
 0x240   : > { %v565_v15 = vmul.f32 %v555_v52, %v546_v11  ;;  %624 = vrot.lane.b32.xlu0 %v567_v2, %s1536_s27  ;;  %v1255_v11 = vld [vmem:[#allocation10 + $0x20] ss:$12 sps:$4 sm:$0xff]  }
 0x241   : > { %v568_v16 = vpack.c.bf16 %v564_v13, %v562_v12 }
 0x242   : > { %v569_v17 = vpack.c.bf16 %v565_v15, %v563_v14 }
 0x243   : > { %574 = vrot.lane.b32.xlu1 %v1886_v62, %s1533_s29 }
 0x244   : > { %576 = vrot.lane.b32.xlu0 %v567_v2, %s1533_s29 }
 0x247   : > { %634 = vrot.lane.b32.xlu1 %v1886_v62, %s1537_s16 }
 0x248   : > { %636 = vrot.lane.b32.xlu0 %v567_v2, %s1537_s16 }
 0x24b   : > { %586 = vrot.lane.b32.xlu1 %v1886_v62, %s1532_s2 }
 0x24c   : > { %588 = vrot.lane.b32.xlu0 %v567_v2, %s1532_s2 }
 0x24f   : > { %646 = vrot.lane.b32.xlu1 %v1886_v62, %s1538_s19 }
 0x250   : > { %648 = vrot.lane.b32.xlu0 %v567_v2, %s1538_s19 }
 0x253   : > { %614 = vrot.lane.b32.xlu1 %v568_v16, %s1535_s28 }
 0x254   : > { %616 = vrot.lane.b32.xlu0 %v569_v17, %s1535_s28 }
 0x257   : > { %598 = vrot.lane.b32.xlu1 %v1886_v62, %s1534_s10 }
 0x258   : > { %600 = vrot.lane.b32.xlu0 %v567_v2, %s1534_s10 }
 0x25b   : > { %626 = vrot.lane.b32.xlu1 %v568_v16, %s1536_s27 }
 0x25c   : > { %628 = vrot.lane.b32.xlu0 %v569_v17, %s1536_s27 }
 0x25f   : > { %578 = vrot.lane.b32.xlu1 %v568_v16, %s1533_s29 }
 0x260   : > { %580 = vrot.lane.b32.xlu0 %v569_v17, %s1533_s29 }
 0x263   : > { %638 = vrot.lane.b32.xlu1 %v568_v16, %s1537_s16 }
 0x264   : > { %640 = vrot.lane.b32.xlu0 %v569_v17, %s1537_s16 }
 0x267   : > { %590 = vrot.lane.b32.xlu1 %v568_v16, %s1532_s2 }
 0x268   : > { %592 = vrot.lane.b32.xlu0 %v569_v17, %s1532_s2  ;;  %s1541_s2 = smov [#allocation13]  }
 0x269   : > { %s1430_s29 = sshll.u32 %s1541_s2, 4  ;;  %s1431_s29 = int_to_ptr.vmem [resolvable:$false] %s1430_s29 }
 0x26a   : > { %p1433_p2 = scmp.lt.s32.totalorder %s1948_s14, %s1431_s29 }
 0x26b   : > { %650 = vrot.lane.b32.xlu1 %v568_v16, %s1538_s19 }
 0x26c   : > { %652 = vrot.lane.b32.xlu0 %v569_v17, %s1538_s19 }
 0x26f   : > { %602 = vrot.lane.b32.xlu1 %v568_v16, %s1534_s10 }
 0x270   : > { %604 = vrot.lane.b32.xlu0 %v569_v17, %s1534_s10  ;;  %s1432_s10 = scalar_lea.vmem %s1431_s29, 512 }
 0x271   : > { %p1434_p4 = scmp.lt.s32.totalorder %s1432_s10, %s1426_s24 }
 0x273   : > { %658 = vrot.lane.b32.xlu1 %v1886_v62, %s1539_s17  ;;  %p1435_p9 = por %p1434_p4, %p1433_p2 }
 0x274   : > { %660 = vrot.lane.b32.xlu0 %v567_v2, %s1539_s17  ;;  %v1251_v2 = vld [vmem:[#allocation10 + $0x1c] ss:$12 sps:$4 sm:$0xff]  }
 0x275   : > { %p1436_p8 = pnand %p1435_p9, %p1429_p11 }
 0x277   : > { %662 = vrot.lane.b32.xlu1 %v568_v16, %s1539_s17 }
 0x278   : > { %664 = vrot.lane.b32.xlu0 %v569_v17, %s1539_s17 }
 0x27b   : > { %684 = vperm.xlu1 %1238, %v678_v19  }
 0x27c   : > { %689 = vperm.xlu0 %1237, %v679_v20  }
 0x27f   : > { %694 = vperm.xlu1 %1238, %v680_v21  }
 0x280   : > { %699 = vperm.xlu0 %1237, %v681_v22  }
 0x2ad   : > { %v611_v23 = vpop.permute.xlu1 %610 }
 0x2ae   : > { %v613_v24 = vpop.permute.xlu0 %612 }
 0x2af   : > { %v618_v25 = vsel %vm397_vm4, %v611_v23, %v613_v24 }
 0x2b0   : > { %1069 = vmatprep.subr.bf16.mxu1 %v618_v25 }
 0x2b1   : > { %1070 = vmatpush3.bf16.msra.mxu1 %v1886_v62  ;;  %v623_v26 = vpop.permute.xlu1 %622 }
 0x2b2   : > { %v625_v27 = vpop.permute.xlu0 %624 }
 0x2b3   : > { %v630_v40 = vsel %vm405_vm5, %v623_v26, %v625_v27 }
 0x2b5   : > { %v575_v28 = vpop.permute.xlu1 %574 }
 0x2b6   : > { %v577_v29 = vpop.permute.xlu0 %576 }
 0x2b7   : > { %v582_v42 = vsel %vm373_vm1, %v575_v28, %v577_v29 }
 0x2b9   : > { %v635_v30 = vpop.permute.xlu1 %634 }
 0x2ba   : > { %v637_v31 = vpop.permute.xlu0 %636 }
 0x2bb   : > { %v642_v49 = vsel %vm413_vm6, %v635_v30, %v637_v31 }
 0x2bd   : > { %v587_v32 = vpop.permute.xlu1 %586 }
 0x2be   : > { %v589_v33 = vpop.permute.xlu0 %588 }
 0x2bf   : > { %v594_v52 = vsel %vm381_vm2, %v587_v32, %v589_v33 }
 0x2c1   : > { %v647_v34 = vpop.permute.xlu1 %646 }
 0x2c2   : > { %v649_v35 = vpop.permute.xlu0 %648 }
 0x2c3   : > { %v654_v57 = vsel %vm421_vm7, %v647_v34, %v649_v35 }
 0x2c5   : > { %v615_v36 = vpop.permute.xlu1 %614 }
 0x2c6   : > { %v617_v37 = vpop.permute.xlu0 %616 }
 0x2c7   : > { %v619_v38 = vsel %vm397_vm4, %v615_v36, %v617_v37 }
 0x2c8   : > { %1071 = vmatprep.subr.bf16.mxu1 %v619_v38 }
 0x2c9   : > { %1072 = vmatpush3.bf16.msra.mxu1 %v568_v16  ;;  %v599_v39 = vpop.permute.xlu1 %598 }
 0x2ca   : > { %v601_v41 = vpop.permute.xlu0 %600  ;;  %1073 = vmatprep.subr.bf16.mxu1 %v630_v40 }
 0x2cb   : > { %v606_v60 = vsel %vm389_vm3, %v599_v39, %v601_v41 }
 0x2cd   : > { %1074 = vmatpush3.bf16.msra.mxu1 %v582_v42  ;;  %v627_v43 = vpop.permute.xlu1 %626 }
 0x2ce   : > { %v629_v44 = vpop.permute.xlu0 %628 }
 0x2cf   : > { %v631_v45 = vsel %vm405_vm5, %v627_v43, %v629_v44 }
 0x2d0   : > { %1075 = vmatprep.subr.bf16.mxu1 %v631_v45 }
 0x2d1   : > { %v579_v46 = vpop.permute.xlu1 %578 }
 0x2d2   : > { %v581_v47 = vpop.permute.xlu0 %580 }
 0x2d3   : > { %v583_v48 = vsel %vm373_vm1, %v579_v46, %v581_v47 }
 0x2d4   : > { %1076 = vmatpush3.bf16.msra.mxu1 %v583_v48 }
 0x2d5   : > { %1077 = vmatprep.subr.bf16.mxu1 %v642_v49  ;;  %v639_v50 = vpop.permute.xlu1 %638 }
 0x2d6   : > { %v641_v51 = vpop.permute.xlu0 %640 }
 0x2d7   : > { %v643_v53 = vsel %vm413_vm6, %v639_v50, %v641_v51 }
 0x2d8   : > { %1078 = vmatpush3.bf16.msra.mxu1 %v594_v52 }
 0x2d9   : > { %1079 = vmatprep.subr.bf16.mxu1 %v643_v53  ;;  %v591_v54 = vpop.permute.xlu1 %590 }
 0x2da   : > { %v593_v55 = vpop.permute.xlu0 %592 }
 0x2db   : > { %v595_v56 = vsel %vm381_vm2, %v591_v54, %v593_v55 }
 0x2dc   : > { %1080 = vmatpush3.bf16.msra.mxu1 %v595_v56 }
 0x2dd   : > { %1081 = vmatprep.subr.bf16.mxu1 %v654_v57  ;;  %v651_v58 = vpop.permute.xlu1 %650 }
 0x2de   : > { %v653_v59 = vpop.permute.xlu0 %652 }
 0x2df   : > { %v655_v61 = vsel %vm421_vm7, %v651_v58, %v653_v59 }
 0x2e0   : > { %1082 = vmatpush3.bf16.msra.mxu1 %v606_v60 }
 0x2e1   : > { %1083 = vmatprep.subr.bf16.mxu1 %v655_v61  ;;  %v603_v62 = vpop.permute.xlu1 %602 }
 0x2e2   : > { %v605_v63 = vpop.permute.xlu0 %604 }
 0x2e3   : > { %v607_v0 = vsel %vm389_vm3, %v603_v62, %v605_v63 }
 0x2e4   : > { %1084 = vmatpush3.bf16.msra.mxu1 %v607_v0 }
 0x2e5   : > { %v659_v3 = vpop.permute.xlu1 %658 }
 0x2e6   : > { %v661_v4 = vpop.permute.xlu0 %660 }
 0x2e7   : > { %772 = vmatmul.mubr.bf16.vlgmr.msra.gmra.mrb[0].mxu1 %v1248_v1  ;;  %v666_v5 = vsel %vm429_vm8, %v659_v3, %v661_v4 }
 0x2e8   : > { %1101 = vmatprep.subr.bf16.mxu1 %v666_v5  ;;  %779 = vmatprep.mubr.bf16.mxu1 %v1251_v2 }
 0x2e9   : > { %1102 = vmatpush3.bf16.msra.mxu1 %v666_v5  ;;  %v663_v6 = vpop.permute.xlu1 %662 }
 0x2ea   : > { %v665_v7 = vpop.permute.xlu0 %664 }
 0x2eb   : > { %v667_v8 = vsel %vm429_vm8, %v663_v6, %v665_v7 }
 0x2ec   : > { %1103 = vmatprep.subr.bf16.mxu1 %v667_v8 }
 0x2ed   : > { %1104 = vmatpush3.bf16.msra.mxu1 %v667_v8 }
 0x2ef   : > { %780 = vmatmul.mubr.bf16.gmra.mrb[4].mxu1 %v1253_v9 }
 0x2f0   : > { %1105 = vmatprep.mubr.msk.bf16.mxu1 %vm732_vm9, %v1254_v10 }
 0x2f7   : > { %1106 = vmatmul.mubr.msk.bf16.vlgmr.msra.gmra.mrb[8].mxu1 %vm732_vm9, %v1255_v11 }
 0x2fa   : > { %v685_v18 = vpop.permute.xlu1 %684 }
 0x2fb   : > { %v690_v21 = vpop.permute.xlu0 %689 }
 0x2fe   : > { %v695_v26 = vpop.permute.xlu1 %694 }
 0x2ff   : > { %v700_v28 = vpop.permute.xlu0 %699 }
 0x3ba   : > { %v1085_v12 = vpop.f32.mrb[0].mxu1 }
 0x3bb   : > { %v1086_v13 = vpop.f32.mrb[1].mxu1 }
 0x3bc   : > { %v1087_v14 = vadd.f32 %v1086_v13, %v1085_v12  ;;  %v1088_v15 = vpop.f32.mrb[2].mxu1 }
 0x3bd   : > { %v1089_v16 = vpop.f32.mrb[3].mxu1 }
 0x3be   : > { %v1090_v17 = vadd.f32 %v1089_v16, %v1088_v15  ;;  %v774_v30 = vadd.f32 %v1087_v14, %v685_v18 }
 0x3c0   : > { %v777_v36 = vadd.f32 %v1090_v17, %v690_v21 }
 0x3c2   : > { %v1091_v19 = vpop.f32.mrb[4].mxu1 }
 0x3c3   : > { %v1092_v20 = vpop.f32.mrb[5].mxu1 }
 0x3c4   : > { %v1093_v22 = vadd.f32 %v1092_v20, %v1091_v19  ;;  %v1094_v23 = vpop.f32.mrb[6].mxu1 }
 0x3c5   : > { %v1095_v24 = vpop.f32.mrb[7].mxu1 }
 0x3c6   : > { %v1096_v25 = vadd.f32 %v1095_v24, %v1094_v23  ;;  %v782_v27 = vadd.f32 %v1093_v22, %v695_v26 }
 0x3c8   : > { %v785_v33 = vadd.f32 %v1096_v25, %v700_v28 }
 0x3ca   : > { %v1107_v29 = vpop.f32.mrb[8].mxu1 }
 0x3cb   : > { %v831_v31 = vadd.f32 %v1107_v29, %v782_v27  ;;  %v822_v32 = vpop.f32.mrb[9].mxu1 }
 0x3cc   : > { %v823_v34 = vadd.f32 %v822_v32, %v774_v30  ;;  %v1108_v35 = vpop.f32.mrb[10].mxu1 }
 0x3cd   : > { %v834_v37 = vadd.f32 %v1108_v35, %v785_v33  ;;  %v825_v38 = vpop.f32.mrb[11].mxu1  ;;  %v839_v40 = vmax.f32 %v831_v31, 0.0 }
 0x3ce   : > { %v826_v39 = vadd.f32 %v825_v38, %v777_v36  ;;  %v837_v42 = vmax.f32 %v823_v34, 0.0 }
 0x3cf   : > { %v840_v41 = vmax.f32 %v834_v37, 0.0 }
 0x3d0   : > { %v838_v43 = vmax.f32 %v826_v39, 0.0 }
 0x3d1   : > { %v1066_v44 = vpack.c.bf16 %v840_v41, %v839_v40 }
 0x3d2   : > { %v1061_v45 = vpack.c.bf16 %v838_v43, %v837_v42 }
 0x3d3   : > { %1068 = vst [vmem:[%s354_s12 + $0x8] sm:$0xff] %v1066_v44  }
 0x3d4   : > { %1062 = vst [vmem:[%s354_s12] sm:$0xff] %v1061_v45  }
 0x3d5   : > { %1439 = shalt.err (!%p1436_p8)
}
 0x3d6   : > { %s1440_s28 = scalar_lea.hbm %s1953_s13, 256  ;;  %s1444_s19 = scalar_lea.hbm %s2008_s6, 512 }
 0x3d7   : > { %p1441_p3 = scmp.ne.s32.totalorder %s1953_s13, %s1440_s28  ;;  %p1445_p0 = scmp.lt.u32.totalorder %s1953_s13, %s2008_s6 }
 0x3d8   : > { %p1446_p1 = scmp.lt.u32.totalorder %s1444_s19, %s1440_s28  ;;  %p1448_p6 = scmp.lt.u32.totalorder %s1440_s28, %s1953_s13 }
 0x3d9   : > { %p1442_p12 = pnand %p1441_p3, %p2037_p5 }
 0x3da   : > { %p1447_p7 = por %p1446_p1, %p1445_p0 }
 0x3db   : > { %p1443_p13 = pneg %p1442_p12 }
 0x3dc   : > { %p1449_p10 = por %p1448_p6, %p1447_p7 }
 0x3de   : > { %p1450_p11 = pnand %p1449_p10, %p1443_p13 }
 0x3e0   : > { %1453 = shalt.err (!%p1450_p11)
}
 0x3e1   : > { %s1542_s9 = smov 64   ;;  %s1543_s11 = smov 4  }
 0x3e2   : > { %1131 = dma.vmem_to_hbm [thread:$0]  (%p2037_p5), %s1948_s14, 256, %s1953_s13, %s862_s15, %s1542_s9, %s1542_s9, %s1543_s11  }
 0x3e3 PF: > { %s891_s8 = sand.u32 1, %s1500_s21   ;;  %p2038_p2 = scmp.ne.s32.totalorder %s2033_s7, 0 }
 0x3e4   : > { %p2039_p4 = scmp.ge.s32.totalorder %s1520_s26, 2  ;;  %s892_s24 = scalar_lea.sflag [#allocation4], %s891_s8 }
 0x3e6   : > { %p1154_p9 = pnand %p2039_p4, %p2038_p2 }
 0x3e8   : > { %1495 = dma.done.wait (!%p1154_p9), %s892_s24, 256  }
 0x3e9   : > { %1497 = vsyncadd (!%p1154_p9), %s892_s24, 4294967040  ;;  %s25_s26 = sadd.s32 1, %s1520_s26   ;;  %s2040_s21 = smov %s1504_s22 }
 0x3ea   : > { %p22_p8 = scmp.ge.s32.totalorder %s25_s26, 4   ;;  %s2041_s22 = smov %s1508_s23 }
 0x3eb   : > { %s2042_s23 = smov %s1783_s30  ;;  %s2043_s24 = smov %s1516_s25 }
 0x3ec   : > { %s2044_s25 = smov %s2046_s18  ;;  %24 = sbr.rel (!%p22_p8) target bundleno = 12 (0xc), region = 109 }
 0x3f3   :  { %897 = vsyncpa [#allocation3], 1 }
 0x3f4   :  { %899 = vsyncpa [#allocation3 + $0x1], 1 }
 0x3f5   :  { %900 = vsyncpa [#allocation6], 1 }
 0x3f6   :  { %901 = vsyncpa [#allocation9], 1 }
 0x3f7   :  { %902 = vsyncpa [#allocation12], 1 }
 0x3f8   :  { %903 = vsyncpa [#allocation4], 1 }
 0x3f9   :  { %905 = vsyncpa [#allocation4 + $0x1], 1 }

// kernel: channel_attn_unet_forward.13
= control target key start
LH: loop header
LB: loop body
LE: loop exit
PB: predicated region body
PF: predicated region fallthrough
CT: control target
= control target key end

     0   :  { %8 = vsyncpa [#allocation3], 0  ;;  %s848_s0 = inlined_call_operand.hbm [shape: bf16[2,32,128], index: 0, kind: input, shape index: {}]   ;;  %s849_s1 = inlined_call_operand.hbm [shape: bf16[64,32], index: 1, kind: input, shape index: {}]   ;;  %s850_s2 = inlined_call_operand.hbm [shape: f32[64,1], index: 2, kind: input, shape index: {}]   ;;  %s851_s3 = inlined_call_operand.hbm [shape: bf16[2,64,128], index: 3, kind: output, shape index: {}]  }
   0x1   :  { %9 = vsyncpa [#allocation6], 0 }
   0x2   :  { %10 = vsyncpa [#allocation4], 0  ;;  %s747_s12 = smov [#allocation5]   ;;  %s748_s14 = smov [#allocation2]  }
   0x3   :  { %s28_s13 = sshll.u32 %s747_s12, 4  ;;  %s16_s15 = sshll.u32 %s748_s14, 4  ;;  %s29_s13 = int_to_ptr.vmem [resolvable:$true] %s28_s13  ;;  %s776_s15 = int_to_ptr.vmem [resolvable:$true] %s16_s15 }
   0x4   :  { %s653_s18 = scalar_lea.hbm %s849_s1, 512 }
   0x5   :  { %p654_p0 = scmp.ne.s32.totalorder %s849_s1, %s653_s18  ;;  %p657_p1 = scmp.lt.u32.totalorder %s653_s18, %s849_s1 }
   0x7   :  { %p659_p2 = pnand %p657_p1, %p654_p0 }
   0x9   :  { %662 = shalt.err (!%p659_p2)
}
   0xa   :  { %s663_s23 = scalar_lea.vmem %s29_s13, 512  ;;  %p668_p4 = scmp.lt.s32.totalorder %s29_s13, %s29_s13 }
   0xb   :  { %p664_p3 = scmp.ne.s32.totalorder %s29_s13, %s663_s23  ;;  %p669_p5 = scmp.lt.s32.totalorder %s663_s23, %s663_s23 }
   0xd   :  { %p670_p6 = por %p669_p5, %p668_p4 }
   0xf   :  { %p671_p7 = pnand %p670_p6, %p664_p3 }
  0x11   :  { %674 = shalt.err (!%p671_p7)
}
  0x12   :  { %s749_s24 = smov 64   ;;  %s750_s25 = smov 4  }
  0x13   :  { %34 = dma.hbm_to_vmem [thread:$0]  %s849_s1, 512, %s29_s13, [#allocation6], %s749_s24, %s749_s24, %s750_s25  }
  0x14   :  { %s675_s30 = scalar_lea.hbm %s848_s0, 512 }
  0x15   :  { %p676_p8 = scmp.ne.s32.totalorder %s848_s0, %s675_s30  ;;  %p679_p9 = scmp.lt.u32.totalorder %s675_s30, %s848_s0 }
  0x17   :  { %p681_p10 = pnand %p679_p9, %p676_p8 }
  0x19   :  { %684 = shalt.err (!%p681_p10)
}
  0x1a   :  { %s685_s8 = scalar_lea.vmem %s776_s15, 512  ;;  %p690_p12 = scmp.lt.s32.totalorder %s776_s15, %s776_s15 }
  0x1b   :  { %p686_p11 = scmp.ne.s32.totalorder %s776_s15, %s685_s8  ;;  %p691_p13 = scmp.lt.s32.totalorder %s685_s8, %s685_s8 }
  0x1d   :  { %p692_p0 = por %p691_p13, %p690_p12 }
  0x1f   :  { %p693_p1 = pnand %p692_p0, %p686_p11 }
  0x21   :  { %696 = shalt.err (!%p693_p1)
}
  0x22   :  { %22 = dma.hbm_to_vmem [thread:$0]  %s848_s0, 512, %s776_s15, [#allocation3], %s749_s24, %s749_s24, %s750_s25  }
  0x23   :  { %s751_s10 = smov [#allocation7]   ;;  %s697_s14 = scalar_lea.hbm %s850_s2, 1024 }
  0x24   :  { %s40_s11 = sshll.u32 %s751_s10, 4  ;;  %p698_p2 = scmp.ne.s32.totalorder %s850_s2, %s697_s14  ;;  %s41_s11 = int_to_ptr.vmem [resolvable:$true] %s40_s11 }
  0x25   :  { %p701_p3 = scmp.lt.u32.totalorder %s697_s14, %s850_s2 }
  0x27   :  { %p703_p4 = pnand %p701_p3, %p698_p2 }
  0x29   :  { %706 = shalt.err (!%p703_p4)
}
  0x2a   :  { %s707_s20 = scalar_lea.vmem %s41_s11, 1024  ;;  %p712_p6 = scmp.lt.s32.totalorder %s41_s11, %s41_s11 }
  0x2b   :  { %p708_p5 = scmp.ne.s32.totalorder %s41_s11, %s707_s20  ;;  %p713_p7 = scmp.lt.s32.totalorder %s707_s20, %s707_s20 }
  0x2d   :  { %p714_p8 = por %p713_p7, %p712_p6 }
  0x2f   :  { %p715_p9 = pnand %p714_p8, %p708_p5 }
  0x31   :  { %718 = shalt.err (!%p715_p9)
}
  0x32   :  { %s752_s0 = smov 128   ;;  %s753_s15 = smov 8  }
  0x33   :  { %46 = dma.hbm_to_vmem [thread:$0]  %s850_s2, 1024, %s41_s11, [#allocation6], %s752_s0, %s752_s0, %s753_s15  }
  0x34   :  { %741 = dma.done.wait [#allocation3], 512  }
  0x35   :  { %742 = vsyncadd [#allocation3], 4294966784 }
  0x36   :  { %743 = dma.done.wait [#allocation6], 1536  }
  0x37   :  { %744 = vsyncadd [#allocation6], 4294965760  ;;  %v754_v0 = vmov 0   ;;  %v641_v1 = vld [vmem:[#allocation2] sm:$0xff]   ;;  %v642_v2 = vld [vmem:[#allocation2 + $0x10] sm:$0xff]   ;;  %vm149_vm0 = vcmask 261120  }
  0x38   :  { %640 = vset.pattern.permute.xlu1 %v754_v0  ;;  %639 = vset.pattern.permute.xlu0 %v754_v0  ;;  %v643_v3 = vld [vmem:[#allocation2 + $0x8] sm:$0xff]   ;;  %v644_v4 = vld [vmem:[#allocation2 + $0x18] sm:$0xff]   ;;  %v645_v5 = vld [vmem:[#allocation5] sm:$0xff]   ;;  %s755_s2 = smov [#allocation8]  }
  0x39   :  { %606 = vmatprep.subr.bf16.mxu0 %v641_v1  ;;  %618 = vmatprep.subr.bf16.mxu1 %v642_v2  ;;  %v646_v6 = vld [vmem:[#allocation5] sm:$0xff]   ;;  %v647_v7 = vld [vmem:[#allocation5 + $0x8] sm:$0xff]   ;;  %v649_v9 = vld [vmem:[#allocation5 + $0x10] sm:$0xff]   ;;  %s483_s23 = sshll.u32 %s755_s2, 4  ;;  %s484_s23 = int_to_ptr.vmem [resolvable:$true] %s483_s23 }
  0x3a   :  { %607 = vmatpush3.bf16.msra.mxu0 %v641_v1  ;;  %619 = vmatpush3.bf16.msra.mxu1 %v642_v2  ;;  %v648_v8 = vld [vmem:[#allocation5 + $0x8] sm:$0xff]   ;;  %v650_v10 = vld [vmem:[#allocation5 + $0x10] sm:$0xff]   ;;  %v69_v12 = vld [vmem:[#allocation7] sm:$0xff]  ;;  %s719_s26 = scalar_lea.vmem %s484_s23, 1024  ;;  %p724_p11 = scmp.lt.s32.totalorder %s484_s23, %s484_s23 }
  0x3b   :  { %608 = vmatprep.subr.bf16.mxu0 %v643_v3  ;;  %620 = vmatprep.subr.bf16.mxu1 %v644_v4  ;;  %v71_v11 = vld [vmem:[#allocation7 + $0x10] sm:$0xff]  ;;  %v651_v13 = vld [vmem:[#allocation5 + $0x18] sm:$0xff]   ;;  %v70_v15 = vld [vmem:[#allocation7 + $0x8] sm:$0xff]  ;;  %p720_p10 = scmp.ne.s32.totalorder %s484_s23, %s719_s26  ;;  %p725_p12 = scmp.lt.s32.totalorder %s719_s26, %s719_s26 }
  0x3c   :  { %610 = vmatprep.mubr.msk.bf16.mxu0 %vm149_vm0, %v645_v5  ;;  %622 = vmatprep.mubr.msk.bf16.mxu1 %vm149_vm0, %v646_v6  ;;  %v72_v14 = vld [vmem:[#allocation7 + $0x18] sm:$0xff]  ;;  %v74_v17 = vld [vmem:[#allocation7 + $0x28] sm:$0xff]  ;;  %v73_v18 = vld [vmem:[#allocation7 + $0x20] sm:$0xff] }
  0x3d   :  { %89 = vperm.xlu1 %640, %v71_v11   ;;  %79 = vperm.xlu0 %639, %v69_v12   ;;  %v652_v16 = vld [vmem:[#allocation5 + $0x18] sm:$0xff]   ;;  %v75_v20 = vld [vmem:[#allocation7 + $0x30] sm:$0xff]  ;;  %p726_p13 = por %p725_p12, %p724_p11 }
  0x3e   :  { %609 = vmatpush3.bf16.msra.mxu0 %v643_v3  ;;  %621 = vmatpush3.bf16.msra.mxu1 %v644_v4  ;;  %v76_v19 = vld [vmem:[#allocation7 + $0x38] sm:$0xff] }
  0x3f   :  { %p727_p0 = pnand %p726_p13, %p720_p10 }
  0x41   :  { %611 = vmatmul.mubr.msk.bf16.vlgmr.msra.gmra.mrb[0].mxu0 %vm149_vm0, %v647_v7  ;;  %623 = vmatmul.mubr.msk.bf16.vlgmr.msra.gmra.mrb[0].mxu1 %vm149_vm0, %v648_v8 }
  0x42   :  { %614 = vmatprep.mubr.msk.bf16.mxu0 %vm149_vm0, %v649_v9  ;;  %626 = vmatprep.mubr.msk.bf16.mxu1 %vm149_vm0, %v650_v10 }
  0x43   :  { %94 = vperm.xlu1 %640, %v72_v14   ;;  %84 = vperm.xlu0 %639, %v70_v15  }
  0x47   :  { %104 = vperm.xlu1 %640, %v74_v17   ;;  %99 = vperm.xlu0 %639, %v73_v18  }
  0x49   :  { %615 = vmatmul.mubr.msk.bf16.gmra.mrb[4].mxu0 %vm149_vm0, %v651_v13  ;;  %627 = vmatmul.mubr.msk.bf16.gmra.mrb[4].mxu1 %vm149_vm0, %v652_v16 }
  0x4b   :  { %114 = vperm.xlu1 %640, %v76_v19   ;;  %109 = vperm.xlu0 %639, %v75_v20  }
  0x4f   :  { %295 = vperm.xlu1 %640, %v70_v15   ;;  %290 = vperm.xlu0 %639, %v69_v12  }
  0x53   :  { %305 = vperm.xlu1 %640, %v72_v14   ;;  %300 = vperm.xlu0 %639, %v71_v11  }
  0x57   :  { %315 = vperm.xlu1 %640, %v74_v17   ;;  %310 = vperm.xlu0 %639, %v73_v18  }
  0x5b   :  { %325 = vperm.xlu1 %640, %v76_v19   ;;  %320 = vperm.xlu0 %639, %v75_v20  }
  0xbc   :  { %v90_v21 = vpop.permute.xlu1 %89  ;;  %v80_v22 = vpop.permute.xlu0 %79 }
  0xc2   :  { %v95_v23 = vpop.permute.xlu1 %94  ;;  %v85_v24 = vpop.permute.xlu0 %84 }
  0xc6   :  { %v105_v25 = vpop.permute.xlu1 %104  ;;  %v100_v26 = vpop.permute.xlu0 %99 }
  0xca   :  { %v115_v27 = vpop.permute.xlu1 %114  ;;  %v110_v28 = vpop.permute.xlu0 %109 }
  0xce   :  { %v296_v29 = vpop.permute.xlu1 %295  ;;  %v291_v30 = vpop.permute.xlu0 %290 }
  0xd2   :  { %v306_v31 = vpop.permute.xlu1 %305  ;;  %v301_v32 = vpop.permute.xlu0 %300 }
  0xd6   :  { %v316_v33 = vpop.permute.xlu1 %315  ;;  %v311_v34 = vpop.permute.xlu0 %310 }
  0xda   :  { %v326_v54 = vpop.permute.xlu1 %325  ;;  %v321_v56 = vpop.permute.xlu0 %320 }
 0x114   :  { %v612_v35 = vpop.f32.mrb[0].mxu0  ;;  %v624_v36 = vpop.f32.mrb[0].mxu1 }
 0x115   :  { %v196_v37 = vpop.f32.mrb[1].mxu0  ;;  %v406_v38 = vpop.f32.mrb[1].mxu1  ;;  %v205_v40 = vadd.f32 %v612_v35, %v90_v21  ;;  %v415_v44 = vadd.f32 %v624_v36, %v301_v32 }
 0x116   :  { %v613_v39 = vpop.f32.mrb[2].mxu0  ;;  %v625_v42 = vpop.f32.mrb[2].mxu1  ;;  %v197_v45 = vadd.f32 %v196_v37, %v80_v22  ;;  %v407_v49 = vadd.f32 %v406_v38, %v291_v30 }
 0x117   :  { %v208_v41 = vadd.f32 %v613_v39, %v95_v23  ;;  %v199_v43 = vpop.f32.mrb[3].mxu0  ;;  %v418_v46 = vadd.f32 %v625_v42, %v306_v31  ;;  %v409_v48 = vpop.f32.mrb[3].mxu1 }
 0x118   :  { %v200_v47 = vadd.f32 %v199_v43, %v85_v24  ;;  %v410_v51 = vadd.f32 %v409_v48, %v296_v29 }
 0x119   :  { %v556_v50 = vpack.c.bf16 %v208_v41, %v205_v40  ;;  %v576_v52 = vpack.c.bf16 %v418_v46, %v415_v44 }
 0x11a   :  { %v551_v53 = vpack.c.bf16 %v200_v47, %v197_v45  ;;  %v571_v55 = vpack.c.bf16 %v410_v51, %v407_v49 }
 0x11b   :  { %588 = vst [vmem:[#allocation8 + $0x8] sm:$0xff] %v556_v50   ;;  %591 = vst [vmem:[#allocation8 + $0x28] sm:$0xff] %v576_v52  }
 0x11c   :  { %552 = vst [vmem:[#allocation8] sm:$0xff] %v551_v53   ;;  %v616_v57 = vpop.f32.mrb[4].mxu0  ;;  %572 = vst [vmem:[#allocation8 + $0x20] sm:$0xff] %v571_v55   ;;  %v628_v58 = vpop.f32.mrb[4].mxu1 }
 0x11d   :  { %v212_v59 = vpop.f32.mrb[5].mxu0  ;;  %v422_v60 = vpop.f32.mrb[5].mxu1  ;;  %v221_v62 = vadd.f32 %v616_v57, %v110_v28  ;;  %v431_v2 = vadd.f32 %v628_v58, %v321_v56 }
 0x11e   :  { %v617_v61 = vpop.f32.mrb[6].mxu0  ;;  %v629_v0 = vpop.f32.mrb[6].mxu1  ;;  %v213_v3 = vadd.f32 %v212_v59, %v100_v26  ;;  %v423_v7 = vadd.f32 %v422_v60, %v311_v34 }
 0x11f   :  { %v224_v63 = vadd.f32 %v617_v61, %v115_v27  ;;  %v215_v1 = vpop.f32.mrb[7].mxu0  ;;  %v434_v4 = vadd.f32 %v629_v0, %v326_v54  ;;  %v425_v6 = vpop.f32.mrb[7].mxu1 }
 0x120   :  { %v216_v5 = vadd.f32 %v215_v1, %v105_v25  ;;  %v426_v9 = vadd.f32 %v425_v6, %v316_v33 }
 0x121   :  { %v566_v8 = vpack.c.bf16 %v224_v63, %v221_v62  ;;  %v586_v10 = vpack.c.bf16 %v434_v4, %v431_v2 }
 0x122   :  { %v561_v11 = vpack.c.bf16 %v216_v5, %v213_v3  ;;  %v581_v12 = vpack.c.bf16 %v426_v9, %v423_v7 }
 0x123   :  { %590 = vst [vmem:[#allocation8 + $0x18] sm:$0xff] %v566_v8   ;;  %593 = vst [vmem:[#allocation8 + $0x38] sm:$0xff] %v586_v10  }
 0x124   :  { %589 = vst [vmem:[#allocation8 + $0x10] sm:$0xff] %v561_v11   ;;  %592 = vst [vmem:[#allocation8 + $0x30] sm:$0xff] %v581_v12  }
 0x125   :  { %730 = shalt.err (!%p727_p0)
}
 0x126   :  { %s731_s29 = scalar_lea.hbm %s851_s3, 1024 }
 0x127   :  { %p732_p1 = scmp.ne.s32.totalorder %s851_s3, %s731_s29  ;;  %p735_p2 = scmp.lt.u32.totalorder %s731_s29, %s851_s3 }
 0x129   :  { %p737_p3 = pnand %p735_p2, %p732_p1 }
 0x12b   :  { %740 = shalt.err (!%p737_p3)
}
 0x12c   :  { %489 = dma.vmem_to_hbm [thread:$0]  %s484_s23, 1024, %s851_s3, [#allocation4], %s749_s24, %s749_s24, %s750_s25  }
 0x12d   :  { %745 = dma.done.wait [#allocation4], 1024  }
 0x12e   :  { %746 = vsyncadd [#allocation4], 4294966272 }
 0x12f   :  { %493 = vsyncpa [#allocation3], 1 }
 0x130   :  { %494 = vsyncpa [#allocation6], 1 }
 0x131   :  { %495 = vsyncpa [#allocation4], 1 }

// kernel: tile.18
= control target key start
LH: loop header
LB: loop body
LE: loop exit
PB: predicated region body
PF: predicated region fallthrough
CT: control target
= control target key end

     0   :  { %s22_s0 = inlined_call_operand.vmem [shape: f32[8], index: 0, kind: input, shape index: {}]   ;;  %s23_s1 = inlined_call_operand.vmem [shape: f32[4,8], index: 1, kind: output, shape index: {}]  }
   0x1   :  { %v4_v0 = vld [vmem:[%s22_s0] ss:$0 sm:$0xff] }
   0x2   :  { %5 = vst [vmem:[%s23_s1] sm:$0xf] %v4_v0 }

// kernel: tile.1
= control target key start
LH: loop header
LB: loop body
LE: loop exit
PB: predicated region body
PF: predicated region fallthrough
CT: control target
= control target key end

     0   :  { %s135_s0 = inlined_call_operand.vmem [shape: f32[4,8], index: 0, kind: input, shape index: {}]   ;;  %s136_s1 = inlined_call_operand.hbm [shape: f32[32,1], index: 1, kind: output, shape index: {}]  }
   0x1   :  { %v5_v0 = vld [vmem:[%s135_s0] sm:$0xf] }
   0x2   :  { %6 = vst [vmem:[#allocation2] sm:$0xf] %v5_v0 }
   0x3   :  { %2 = vsyncpa [#allocation1], 0  ;;  %s94_s0 = smov 127   ;;  %s95_s8 = smov 125   ;;  %vm8_vm0 = vcmask 7168  }
   0x4   :  { %s96_s9 = smov 126   ;;  %s97_s10 = smov 124  }
   0x5   :  { %s98_s11 = smov 123   ;;  %s99_s12 = smov 122  }
   0x6   :  { %s100_s13 = smov 121   ;;  %s101_s14 = smov [#allocation0]  }
   0x7   :  { %s56_s15 = sshll.u32 %s101_s14, 4  ;;  %s57_s15 = int_to_ptr.vmem [resolvable:$true] %s56_s15 }
   0x8   :  { %s70_s16 = scalar_lea.vmem %s57_s15, 512  ;;  %p75_p1 = scmp.lt.s32.totalorder %s57_s15, %s57_s15 }
   0x9   :  { %v10_v1 = vld [vmem:[#allocation2] sm:$0xf]   ;;  %p71_p0 = scmp.ne.s32.totalorder %s57_s15, %s70_s16  ;;  %p76_p2 = scmp.lt.s32.totalorder %s70_s16, %s70_s16 }
   0xa   :  { %v22_v2 = vld [vmem:[#allocation2] sm:$0xf]   ;;  %11 = vrot.lane.b32.xlu0 %v10_v1, %s94_s0 }
   0xb   :  { %23 = vrot.lane.b32.xlu1 %v22_v2, %s95_s8  ;;  %v16_v3 = vld [vmem:[#allocation2] sm:$0xf]   ;;  %p77_p3 = por %p76_p2, %p75_p1 }
   0xc   :  { %v28_v4 = vld [vmem:[#allocation2] sm:$0xf]  }
   0xd   :  { %v7_v5 = vld [vmem:[#allocation2] sm:$0xf]   ;;  %p78_p4 = pnand %p77_p3, %p71_p0 }
   0xe   :  { %9 = vst.msk [vmem:[#allocation0] ss:$8 sm:$0xf] %vm8_vm0, %v7_v5   ;;  %17 = vrot.lane.b32.xlu0 %v16_v3, %s96_s9  ;;  %v34_v6 = vld [vmem:[#allocation2] sm:$0xf]  }
   0xf   :  { %29 = vrot.lane.b32.xlu1 %v28_v4, %s97_s10  ;;  %v40_v7 = vld [vmem:[#allocation2] sm:$0xf]  }
  0x10   :  { %v46_v8 = vld [vmem:[#allocation2] sm:$0xf]  }
  0x12   :  { %35 = vrot.lane.b32.xlu0 %v34_v6, %s98_s11 }
  0x13   :  { %41 = vrot.lane.b32.xlu1 %v40_v7, %s99_s12 }
  0x16   :  { %47 = vrot.lane.b32.xlu0 %v46_v8, %s100_s13 }
  0x7c   :  { %v12_v9 = vpop.permute.xlu0 %11  }
  0x7d   :  { %v24_v10 = vpop.permute.xlu1 %23   ;;  %15 = vst.msk [vmem:[#allocation0 + $0x1] ss:$8 sm:$0xf] %vm8_vm0, %v12_v9  }
  0x7e   :  { %27 = vst.msk [vmem:[#allocation0 + $0x3] ss:$8 sm:$0xf] %vm8_vm0, %v24_v10  }
  0x80   :  { %v18_v11 = vpop.permute.xlu0 %17  }
  0x81   :  { %v30_v12 = vpop.permute.xlu1 %29   ;;  %21 = vst.msk [vmem:[#allocation0 + $0x2] ss:$8 sm:$0xf] %vm8_vm0, %v18_v11  }
  0x82   :  { %33 = vst.msk [vmem:[#allocation0 + $0x4] ss:$8 sm:$0xf] %vm8_vm0, %v30_v12  }
  0x84   :  { %v36_v13 = vpop.permute.xlu0 %35  }
  0x85   :  { %v42_v14 = vpop.permute.xlu1 %41   ;;  %39 = vst.msk [vmem:[#allocation0 + $0x5] ss:$8 sm:$0xf] %vm8_vm0, %v36_v13  }
  0x86   :  { %45 = vst.msk [vmem:[#allocation0 + $0x6] ss:$8 sm:$0xf] %vm8_vm0, %v42_v14  }
  0x88   :  { %v48_v15 = vpop.permute.xlu0 %47  }
  0x89   :  { %51 = vst.msk [vmem:[#allocation0 + $0x7] ss:$8 sm:$0xf] %vm8_vm0, %v48_v15  }
  0x8a   :  { %81 = shalt.err (!%p78_p4)
}
  0x8b   :  { %s82_s19 = scalar_lea.hbm %s136_s1, 512 }
  0x8c   :  { %p83_p5 = scmp.ne.s32.totalorder %s136_s1, %s82_s19  ;;  %p86_p6 = scmp.lt.u32.totalorder %s82_s19, %s136_s1 }
  0x8e   :  { %p88_p7 = pnand %p86_p6, %p83_p5 }
  0x90   :  { %91 = shalt.err (!%p88_p7)
}
  0x91   :  { %59 = dma.vmem_to_hbm [thread:$0]  %s57_s15, 512, %s136_s1, [#allocation1]  }
  0x92   :  { %92 = dma.done.wait [#allocation1], 512  }
  0x93   :  { %93 = vsyncadd [#allocation1], 4294966784 }
  0x94   :  { %61 = vsyncpa [#allocation1], 1 }

// kernel: channel_attn_unet_forward.15
= control target key start
LH: loop header
LB: loop body
LE: loop exit
PB: predicated region body
PF: predicated region fallthrough
CT: control target
= control target key end

     0   :  { %8 = vsyncpa [#allocation3], 0  ;;  %s590_s0 = inlined_call_operand.hbm [shape: bf16[2,16,128], index: 0, kind: input, shape index: {}]   ;;  %s591_s1 = inlined_call_operand.hbm [shape: bf16[32,16], index: 1, kind: input, shape index: {}]   ;;  %s592_s2 = inlined_call_operand.hbm [shape: f32[32,1], index: 2, kind: input, shape index: {}]   ;;  %s593_s3 = inlined_call_operand.hbm [shape: bf16[2,32,128], index: 3, kind: output, shape index: {}]  }
   0x1   :  { %9 = vsyncpa [#allocation6], 0 }
   0x2   :  { %10 = vsyncpa [#allocation4], 0  ;;  %s497_s12 = smov [#allocation5]   ;;  %s498_s14 = smov [#allocation2]  }
   0x3   :  { %s28_s13 = sshll.u32 %s497_s12, 4  ;;  %s16_s15 = sshll.u32 %s498_s14, 4  ;;  %s29_s13 = int_to_ptr.vmem [resolvable:$true] %s28_s13  ;;  %s526_s15 = int_to_ptr.vmem [resolvable:$true] %s16_s15 }
   0x4   :  { %s403_s18 = scalar_lea.hbm %s591_s1, 256 }
   0x5   :  { %p404_p0 = scmp.ne.s32.totalorder %s591_s1, %s403_s18  ;;  %p407_p1 = scmp.lt.u32.totalorder %s403_s18, %s591_s1 }
   0x7   :  { %p409_p2 = pnand %p407_p1, %p404_p0 }
   0x9   :  { %412 = shalt.err (!%p409_p2)
}
   0xa   :  { %s413_s23 = scalar_lea.vmem %s29_s13, 256  ;;  %p418_p4 = scmp.lt.s32.totalorder %s29_s13, %s29_s13 }
   0xb   :  { %p414_p3 = scmp.ne.s32.totalorder %s29_s13, %s413_s23  ;;  %p419_p5 = scmp.lt.s32.totalorder %s413_s23, %s413_s23 }
   0xd   :  { %p420_p6 = por %p419_p5, %p418_p4 }
   0xf   :  { %p421_p7 = pnand %p420_p6, %p414_p3 }
  0x11   :  { %424 = shalt.err (!%p421_p7)
}
  0x12   :  { %s499_s24 = smov 64   ;;  %s500_s25 = smov 4  }
  0x13   :  { %34 = dma.hbm_to_vmem [thread:$0]  %s591_s1, 256, %s29_s13, [#allocation6], %s499_s24, %s499_s24, %s500_s25  }
  0x14   :  { %s425_s30 = scalar_lea.hbm %s590_s0, 256 }
  0x15   :  { %p426_p8 = scmp.ne.s32.totalorder %s590_s0, %s425_s30  ;;  %p429_p9 = scmp.lt.u32.totalorder %s425_s30, %s590_s0 }
  0x17   :  { %p431_p10 = pnand %p429_p9, %p426_p8 }
  0x19   :  { %434 = shalt.err (!%p431_p10)
}
  0x1a   :  { %s435_s8 = scalar_lea.vmem %s526_s15, 256  ;;  %p440_p12 = scmp.lt.s32.totalorder %s526_s15, %s526_s15 }
  0x1b   :  { %p436_p11 = scmp.ne.s32.totalorder %s526_s15, %s435_s8  ;;  %p441_p13 = scmp.lt.s32.totalorder %s435_s8, %s435_s8 }
  0x1d   :  { %p442_p0 = por %p441_p13, %p440_p12 }
  0x1f   :  { %p443_p1 = pnand %p442_p0, %p436_p11 }
  0x21   :  { %446 = shalt.err (!%p443_p1)
}
  0x22   :  { %22 = dma.hbm_to_vmem [thread:$0]  %s590_s0, 256, %s526_s15, [#allocation3], %s499_s24, %s499_s24, %s500_s25  }
  0x23   :  { %s501_s10 = smov [#allocation7]   ;;  %s447_s14 = scalar_lea.hbm %s592_s2, 512 }
  0x24   :  { %s40_s11 = sshll.u32 %s501_s10, 4  ;;  %p448_p2 = scmp.ne.s32.totalorder %s592_s2, %s447_s14  ;;  %s41_s11 = int_to_ptr.vmem [resolvable:$true] %s40_s11 }
  0x25   :  { %p451_p3 = scmp.lt.u32.totalorder %s447_s14, %s592_s2 }
  0x27   :  { %p453_p4 = pnand %p451_p3, %p448_p2 }
  0x29   :  { %456 = shalt.err (!%p453_p4)
}
  0x2a   :  { %s457_s20 = scalar_lea.vmem %s41_s11, 512  ;;  %p462_p6 = scmp.lt.s32.totalorder %s41_s11, %s41_s11 }
  0x2b   :  { %p458_p5 = scmp.ne.s32.totalorder %s41_s11, %s457_s20  ;;  %p463_p7 = scmp.lt.s32.totalorder %s457_s20, %s457_s20 }
  0x2d   :  { %p464_p8 = por %p463_p7, %p462_p6 }
  0x2f   :  { %p465_p9 = pnand %p464_p8, %p458_p5 }
  0x31   :  { %468 = shalt.err (!%p465_p9)
}
  0x32   :  { %s502_s0 = smov 128   ;;  %s503_s15 = smov 8  }
  0x33   :  { %46 = dma.hbm_to_vmem [thread:$0]  %s592_s2, 512, %s41_s11, [#allocation6], %s502_s0, %s502_s0, %s503_s15  }
  0x34   :  { %491 = dma.done.wait [#allocation3], 256  }
  0x35   :  { %492 = vsyncadd [#allocation3], 4294967040 }
  0x36   :  { %493 = dma.done.wait [#allocation6], 768  }
  0x37   :  { %494 = vsyncadd [#allocation6], 4294966528  ;;  %v504_v0 = vmov 0   ;;  %v397_v1 = vld [vmem:[#allocation2] sm:$0xff]   ;;  %v398_v2 = vld [vmem:[#allocation2 + $0x8] sm:$0xff]   ;;  %vm103_vm0 = vcmask 130048  }
  0x38   :  { %396 = vset.pattern.permute.xlu1 %v504_v0  ;;  %395 = vset.pattern.permute.xlu0 %v504_v0  ;;  %v399_v3 = vld [vmem:[#allocation5] sm:$0xff]   ;;  %v401_v5 = vld [vmem:[#allocation5 + $0x8] sm:$0xff]   ;;  %v63_v8 = vld [vmem:[#allocation7] sm:$0xff]  ;;  %s505_s2 = smov [#allocation8]  }
  0x39   :  { %374 = vmatprep.subr.bf16.mxu0 %v397_v1  ;;  %380 = vmatprep.subr.bf16.mxu1 %v398_v2  ;;  %v400_v4 = vld [vmem:[#allocation5] sm:$0xff]   ;;  %v402_v6 = vld [vmem:[#allocation5 + $0x8] sm:$0xff]   ;;  %v64_v10 = vld [vmem:[#allocation7 + $0x8] sm:$0xff]  ;;  %s307_s23 = sshll.u32 %s505_s2, 4  ;;  %s308_s23 = int_to_ptr.vmem [resolvable:$true] %s307_s23 }
  0x3a   :  { %375 = vmatpush3.bf16.msra.mxu0 %v397_v1  ;;  %381 = vmatpush3.bf16.msra.mxu1 %v398_v2  ;;  %v65_v7 = vld [vmem:[#allocation7 + $0x10] sm:$0xff]  ;;  %v66_v9 = vld [vmem:[#allocation7 + $0x18] sm:$0xff]  ;;  %s469_s26 = scalar_lea.vmem %s308_s23, 512  ;;  %p474_p11 = scmp.lt.s32.totalorder %s308_s23, %s308_s23 }
  0x3b   :  { %376 = vmatprep.mubr.msk.bf16.mxu0 %vm103_vm0, %v399_v3  ;;  %382 = vmatprep.mubr.msk.bf16.mxu1 %vm103_vm0, %v400_v4  ;;  %p470_p10 = scmp.ne.s32.totalorder %s308_s23, %s469_s26  ;;  %p475_p12 = scmp.lt.s32.totalorder %s469_s26, %s469_s26 }
  0x3c   :  { %79 = vperm.xlu1 %396, %v65_v7   ;;  %69 = vperm.xlu0 %395, %v63_v8  }
  0x3d   :  { %377 = vmatmul.mubr.msk.bf16.vlgmr.msra.gmra.mrb[0].mxu0 %vm103_vm0, %v401_v5  ;;  %383 = vmatmul.mubr.msk.bf16.vlgmr.msra.gmra.mrb[0].mxu1 %vm103_vm0, %v402_v6  ;;  %p476_p13 = por %p475_p12, %p474_p11 }
  0x3f   :  { %p477_p0 = pnand %p476_p13, %p470_p10 }
  0x40   :  { %84 = vperm.xlu1 %396, %v66_v9   ;;  %74 = vperm.xlu0 %395, %v64_v10  }
  0x44   :  { %197 = vperm.xlu1 %396, %v64_v10   ;;  %192 = vperm.xlu0 %395, %v63_v8  }
  0x48   :  { %207 = vperm.xlu1 %396, %v66_v9   ;;  %202 = vperm.xlu0 %395, %v65_v7  }
  0xbb   :  { %v80_v11 = vpop.permute.xlu1 %79  ;;  %v70_v12 = vpop.permute.xlu0 %69 }
  0xbf   :  { %v85_v13 = vpop.permute.xlu1 %84  ;;  %v75_v14 = vpop.permute.xlu0 %74 }
  0xc3   :  { %v198_v15 = vpop.permute.xlu1 %197  ;;  %v193_v16 = vpop.permute.xlu0 %192 }
  0xc7   :  { %v208_v17 = vpop.permute.xlu1 %207  ;;  %v203_v18 = vpop.permute.xlu0 %202 }
 0x110   :  { %v378_v19 = vpop.f32.mrb[0].mxu0  ;;  %v384_v20 = vpop.f32.mrb[0].mxu1 }
 0x111   :  { %v144_v21 = vpop.f32.mrb[1].mxu0  ;;  %v266_v22 = vpop.f32.mrb[1].mxu1  ;;  %v153_v24 = vadd.f32 %v378_v19, %v80_v11  ;;  %v275_v28 = vadd.f32 %v384_v20, %v203_v18 }
 0x112   :  { %v379_v23 = vpop.f32.mrb[2].mxu0  ;;  %v385_v26 = vpop.f32.mrb[2].mxu1  ;;  %v145_v29 = vadd.f32 %v144_v21, %v70_v12  ;;  %v267_v33 = vadd.f32 %v266_v22, %v193_v16 }
 0x113   :  { %v156_v25 = vadd.f32 %v379_v23, %v85_v13  ;;  %v147_v27 = vpop.f32.mrb[3].mxu0  ;;  %v278_v30 = vadd.f32 %v385_v26, %v208_v17  ;;  %v269_v32 = vpop.f32.mrb[3].mxu1 }
 0x114   :  { %v148_v31 = vadd.f32 %v147_v27, %v75_v14  ;;  %v270_v35 = vadd.f32 %v269_v32, %v198_v15 }
 0x115   :  { %v354_v34 = vpack.c.bf16 %v156_v25, %v153_v24  ;;  %v364_v36 = vpack.c.bf16 %v278_v30, %v275_v28 }
 0x116   :  { %v349_v37 = vpack.c.bf16 %v148_v31, %v145_v29  ;;  %v359_v38 = vpack.c.bf16 %v270_v35, %v267_v33 }
 0x117   :  { %366 = vst [vmem:[#allocation8 + $0x8] sm:$0xff] %v354_v34   ;;  %367 = vst [vmem:[#allocation8 + $0x18] sm:$0xff] %v364_v36  }
 0x118   :  { %350 = vst [vmem:[#allocation8] sm:$0xff] %v349_v37   ;;  %360 = vst [vmem:[#allocation8 + $0x10] sm:$0xff] %v359_v38  }
 0x119   :  { %480 = shalt.err (!%p477_p0)
}
 0x11a   :  { %s481_s29 = scalar_lea.hbm %s593_s3, 512 }
 0x11b   :  { %p482_p1 = scmp.ne.s32.totalorder %s593_s3, %s481_s29  ;;  %p485_p2 = scmp.lt.u32.totalorder %s481_s29, %s593_s3 }
 0x11d   :  { %p487_p3 = pnand %p485_p2, %p482_p1 }
 0x11f   :  { %490 = shalt.err (!%p487_p3)
}
 0x120   :  { %313 = dma.vmem_to_hbm [thread:$0]  %s308_s23, 512, %s593_s3, [#allocation4], %s499_s24, %s499_s24, %s500_s25  }
 0x121   :  { %495 = dma.done.wait [#allocation4], 512  }
 0x122   :  { %496 = vsyncadd [#allocation4], 4294966784 }
 0x123   :  { %317 = vsyncpa [#allocation3], 1 }
 0x124   :  { %318 = vsyncpa [#allocation6], 1 }
 0x125   :  { %319 = vsyncpa [#allocation4], 1 }

// kernel: channel_attn_unet_forward.14
= control target key start
LH: loop header
LB: loop body
LE: loop exit
PB: predicated region body
PF: predicated region fallthrough
CT: control target
= control target key end

     0   :  { %s1859_s0 = inlined_call_operand.hbm [shape: bf16[2,32,256], index: 0, kind: input, shape index: {}]   ;;  %s1860_s1 = inlined_call_operand.hbm [shape: bf16[16,288], index: 1, kind: input, shape index: {}]   ;;  %s1861_s2 = inlined_call_operand.hbm [shape: f32[16,1], index: 2, kind: input, shape index: {}]   ;;  %s1862_s3 = inlined_call_operand.hbm [shape: f32[1,256], index: 3, kind: input, shape index: {}]   ;;  %s1863_s4 = inlined_call_operand.hbm [shape: bf16[16,144], index: 4, kind: input, shape index: {}]   ;;  %s1864_s5 = inlined_call_operand.hbm [shape: f32[16,1], index: 5, kind: input, shape index: {}]   ;;  %s1865_s6 = inlined_call_operand.hbm [shape: bf16[2,16,128], index: 6, kind: output, shape index: {}]  }
   0x1   :  { %1871 = sst [smem:[#allocation19_spill]] %s1860_s1 }
   0x2   :  { %1872 = sst [smem:[#allocation20_spill]] %s1862_s3 }
   0x3   :  { %11 = vsyncpa [#allocation3], 0 }
   0x4   :  { %13 = vsyncpa [#allocation3 + $0x1], 0 }
   0x5   :  { %14 = vsyncpa [#allocation6], 0 }
   0x6   :  { %15 = vsyncpa [#allocation9], 0 }
   0x7   :  { %16 = vsyncpa [#allocation12], 0 }
   0x8   :  { %17 = vsyncpa [#allocation4], 0 }
   0x9   :  { %19 = vsyncpa [#allocation4 + $0x1], 0  ;;  %s1440_s21 = smov 0   ;;  %s1442_s22 = smov 0  }
   0xa   :  { %s1444_s23 = smov 0   ;;  %s1446_s24 = smov 0  }
   0xb   :  { %s1448_s25 = smov 0   ;;  %s1450_s26 = smov 0  }
   0xc LB: > { %s1866_s27 = sadd.s32 4294967295, %s1381_s26   ;;  %p921_p0 = scmp.ge.s32.totalorder %s1381_s26, 1  ;;  %s1381_s26 = sphi %s1450_s26, %s25_s26   ;;  %s1377_s25 = sphi %s1448_s25, %s1895_s25   ;;  %s1373_s24 = sphi %s1446_s24, %s1894_s24   ;;  %s1369_s23 = sphi %s1444_s23, %s1893_s23   ;;  %s1365_s22 = sphi %s1442_s22, %s1892_s22   ;;  %s1361_s21 = sphi %s1440_s21, %s1891_s21  }
   0xd   : > { %p1474_p1 = scmp.eq.s32.totalorder %s1866_s27, 0  ;;  %p201_p2 = scmp.lt.s32.totalorder %s1381_s26, 3 }
   0xe   : > { %s1383_s30 = smov [#allocation5]   ;;  %s1384_s9 = smov [#allocation8]  }
   0xf   : > { %s1873_s28 = scalar_select %p1474_p1, 1, 0 }
  0x10   : > { %p1479_p3 = pnand %p921_p0, %p201_p2  ;;  %s213_s7 = sshll.u32 %s1383_s30, 4  ;;  %s1483_s7 = int_to_ptr.vmem [resolvable:$true] %s213_s7 }
  0x11   : > { %s240_s10 = sshll.u32 %s1384_s9, 4  ;;  %s1385_s11 = smov [#allocation7]   ;;  %s1494_s10 = int_to_ptr.vmem [resolvable:$true] %s240_s10 }
  0x12   : > { %s1874_s29 = scalar_select %p1479_p3, 1, 0 }
  0x13   : > { %p998_p4 = pneg %p1479_p3  ;;  %s1496_s12 = sshll.u32 %s1385_s11, 4  ;;  %s227_s12 = int_to_ptr.vmem [resolvable:$true] %s1496_s12 }
  0x14   : > { %s1876_s1 = sld [smem:[#allocation19_spill]] }
  0x15   : > { %p1490_p6 = pnand %p998_p4, %p1474_p1 }
  0x17   : > { %p1506_p8 = pneg %p1490_p6 }
  0x1a   : > { %s1117_s15 = scalar_lea.hbm %s1876_s1, 384 }
  0x1b   : > { %p1118_p7 = scmp.ne.s32.totalorder %s1876_s1, %s1117_s15  ;;  %p1124_p11 = scmp.lt.u32.totalorder %s1117_s15, %s1876_s1 }
  0x1d   : > { %p1120_p9 = pnand %p1506_p8, %p1118_p7 }
  0x1f   : > { %p1121_p10 = pneg %p1120_p9 }
  0x21   : > { %p1126_p12 = pnand %p1124_p11, %p1121_p10 }
  0x23   : > { %1129 = shalt.err (!%p1126_p12)
}
  0x24   : > { %s1130_s30 = scalar_lea.vmem %s1483_s7, 384  ;;  %p1138_p4 = scmp.lt.s32.totalorder %s1483_s7, %s1483_s7 }
  0x25   : > { %p1131_p13 = scmp.ne.s32.totalorder %s1483_s7, %s1130_s30  ;;  %p1139_p5 = scmp.lt.s32.totalorder %s1130_s30, %s1130_s30 }
  0x27   : > { %p1133_p0 = pnand %p1131_p13, %p1506_p8  ;;  %p1140_p7 = por %p1139_p5, %p1138_p4 }
  0x29   : > { %p1134_p2 = pneg %p1133_p0 }
  0x2b   : > { %p1141_p9 = pnand %p1140_p7, %p1134_p2 }
  0x2d   : > { %1144 = shalt.err (!%p1141_p9)
}
  0x2e   : > { %s1386_s9 = smov 192   ;;  %s1387_s11 = smov 12  }
  0x2f   : > { %1001 = dma.hbm_to_vmem [thread:$0]  (!%p1490_p6), %s1876_s1, 384, %s1483_s7, [#allocation6], %s1386_s9, %s1386_s9, %s1387_s11  }
  0x30   : > { %s1878_s3 = sld [smem:[#allocation20_spill]] }
  0x36   : > { %s1145_s17 = scalar_lea.hbm %s1878_s3, 32 }
  0x37   : > { %p1146_p5 = scmp.ne.s32.totalorder %s1878_s3, %s1145_s17  ;;  %p1152_p12 = scmp.lt.u32.totalorder %s1145_s17, %s1878_s3 }
  0x39   : > { %p1148_p10 = pnand %p1146_p5, %p1506_p8 }
  0x3b   : > { %p1149_p11 = pneg %p1148_p10 }
  0x3d   : > { %p1154_p13 = pnand %p1152_p12, %p1149_p11 }
  0x3f   : > { %1157 = shalt.err (!%p1154_p13)
}
  0x40   : > { %s1158_s7 = scalar_lea.vmem %s1494_s10, 32  ;;  %p1166_p7 = scmp.lt.s32.totalorder %s1494_s10, %s1494_s10 }
  0x41   : > { %p1159_p0 = scmp.ne.s32.totalorder %s1494_s10, %s1158_s7  ;;  %p1167_p9 = scmp.lt.s32.totalorder %s1158_s7, %s1158_s7 }
  0x43   : > { %p1161_p2 = pnand %p1159_p0, %p1506_p8  ;;  %p1168_p5 = por %p1167_p9, %p1166_p7 }
  0x45   : > { %p1162_p4 = pneg %p1161_p2 }
  0x47   : > { %p1169_p10 = pnand %p1168_p5, %p1162_p4 }
  0x49   : > { %1172 = shalt.err (!%p1169_p10)
}
  0x4a   : > { %1007 = dma.hbm_to_vmem [thread:$0]  (!%p1490_p6), %s1878_s3, 32, %s1494_s10, [#allocation9]  }
  0x4b   : > { %s1173_s14 = scalar_lea.hbm %s1861_s2, 256 }
  0x4c   : > { %p1174_p11 = scmp.ne.s32.totalorder %s1861_s2, %s1173_s14  ;;  %p1180_p0 = scmp.lt.u32.totalorder %s1173_s14, %s1861_s2 }
  0x4e   : > { %p1176_p12 = pnand %p1174_p11, %p1506_p8 }
  0x50   : > { %p1177_p13 = pneg %p1176_p12 }
  0x52   : > { %p1182_p2 = pnand %p1180_p0, %p1177_p13 }
  0x54   : > { %1185 = shalt.err (!%p1182_p2)
}
  0x55   : > { %s1186_s20 = scalar_lea.vmem %s227_s12, 256  ;;  %p1194_p5 = scmp.lt.s32.totalorder %s227_s12, %s227_s12 }
  0x56   : > { %p1187_p4 = scmp.ne.s32.totalorder %s227_s12, %s1186_s20  ;;  %p1195_p10 = scmp.lt.s32.totalorder %s1186_s20, %s1186_s20 }
  0x58   : > { %p1189_p7 = pnand %p1187_p4, %p1506_p8  ;;  %p1196_p3 = por %p1195_p10, %p1194_p5 }
  0x5a   : > { %p1190_p9 = pneg %p1189_p7 }
  0x5c   : > { %p1197_p1 = pnand %p1196_p3, %p1190_p9 }
  0x5e   : > { %1200 = shalt.err (!%p1197_p1)
}
  0x5f   : > { %s1388_s10 = smov 128   ;;  %s1389_s30 = smov 8  }
  0x60   : > { %1004 = dma.hbm_to_vmem [thread:$0]  (!%p1490_p6), %s1861_s2, 256, %s227_s12, [#allocation6], %s1388_s10, %s1388_s10, %s1389_s30  }
  0x61   : > { %s1390_s9 = smov [#allocation10]   ;;  %s1391_s13 = smov [#allocation11]  }
  0x62   : > { %s250_s11 = sshll.u32 %s1390_s9, 4  ;;  %s263_s14 = sshll.u32 %s1391_s13, 4  ;;  %s251_s11 = int_to_ptr.vmem [resolvable:$true] %s250_s11  ;;  %s264_s14 = int_to_ptr.vmem [resolvable:$true] %s263_s14 }
  0x63   : > { %s1201_s17 = scalar_lea.hbm %s1863_s4, 256 }
  0x64   : > { %p1202_p1 = scmp.ne.s32.totalorder %s1863_s4, %s1201_s17  ;;  %p1208_p12 = scmp.lt.u32.totalorder %s1201_s17, %s1863_s4 }
  0x66   : > { %p1204_p3 = pnand %p1202_p1, %p1506_p8 }
  0x68   : > { %p1205_p11 = pneg %p1204_p3 }
  0x6a   : > { %p1210_p13 = pnand %p1208_p12, %p1205_p11 }
  0x6c   : > { %1213 = shalt.err (!%p1210_p13)
}
  0x6d   : > { %s1214_s12 = scalar_lea.vmem %s251_s11, 256  ;;  %p1222_p7 = scmp.lt.s32.totalorder %s251_s11, %s251_s11 }
  0x6e   : > { %p1215_p0 = scmp.ne.s32.totalorder %s251_s11, %s1214_s12  ;;  %p1223_p9 = scmp.lt.s32.totalorder %s1214_s12, %s1214_s12 }
  0x70   : > { %p1217_p2 = pnand %p1215_p0, %p1506_p8  ;;  %p1224_p5 = por %p1223_p9, %p1222_p7 }
  0x72   : > { %p1218_p4 = pneg %p1217_p2 }
  0x74   : > { %p1225_p10 = pnand %p1224_p5, %p1218_p4 }
  0x76   : > { %1228 = shalt.err (!%p1225_p10)
}
  0x77   : > { %1010 = dma.hbm_to_vmem [thread:$0]  (!%p1490_p6), %s1863_s4, 256, %s251_s11, [#allocation9], %s1388_s10, %s1388_s10, %s1389_s30  }
  0x78   : > { %s1229_s9 = scalar_lea.hbm %s1864_s5, 256 }
  0x79   : > { %p1230_p1 = scmp.ne.s32.totalorder %s1864_s5, %s1229_s9  ;;  %p1236_p12 = scmp.lt.u32.totalorder %s1229_s9, %s1864_s5 }
  0x7b   : > { %p1232_p3 = pnand %p1230_p1, %p1506_p8 }
  0x7d   : > { %p1233_p11 = pneg %p1232_p3 }
  0x7f   : > { %p1238_p13 = pnand %p1236_p12, %p1233_p11 }
  0x81   : > { %1241 = shalt.err (!%p1238_p13)
}
  0x82   : > { %s1242_s19 = scalar_lea.vmem %s264_s14, 256  ;;  %p1250_p7 = scmp.lt.s32.totalorder %s264_s14, %s264_s14 }
  0x83   : > { %p1243_p0 = scmp.ne.s32.totalorder %s264_s14, %s1242_s19  ;;  %p1251_p9 = scmp.lt.s32.totalorder %s1242_s19, %s1242_s19 }
  0x85   : > { %p1245_p2 = pnand %p1243_p0, %p1506_p8  ;;  %p1252_p5 = por %p1251_p9, %p1250_p7 }
  0x87   : > { %p1246_p4 = pneg %p1245_p2 }
  0x89   : > { %p1253_p10 = pnand %p1252_p5, %p1246_p4 }
  0x8b   : > { %1256 = shalt.err (!%p1253_p10)
}
  0x8c   : > { %1013 = dma.hbm_to_vmem [thread:$0]  (!%p1490_p6), %s1864_s5, 256, %s264_s14, [#allocation12], %s1388_s10, %s1388_s10, %s1389_s30  }
  0x8d   : > { %s920_s8 = sadd.s32 4294967294, %s1381_s26   ;;  %s37_s18 = sadd.s32 1, %s1377_s25 }
  0x8e   : > { %s44_s12 = sadd.s32 1, %s1369_s23  ;;  %p39_p8 = scmp.ge.s32.totalorder %s37_s18, 2 }
  0x8f   : > { %p51_p1 = scmp.ne.s32.totalorder %s1369_s23, %s1365_s22  ;;  %p52_p3 = scmp.eq.s32.totalorder %s1381_s26, 0 }
  0x90   : > { %p57_p11 = scmp.ne.s32.totalorder %s1365_s22, %s1361_s21  ;;  %s1897_s18 = smov (%p39_p8, %s37_s18), 0 }
  0x91   : > { %p1624_p12 = por %p52_p3, %p51_p1  ;;  %p1880_p13 = scmp.ne.s32.totalorder %s1873_s28, 0 }
  0x92   : > { %s41_s3 = ssub.s32 %s1377_s25, %s1897_s18  ;;  %s1882_s7 = sadd.s32 4294967295, %s1381_s26  }
  0x93   : > { %p1630_p6 = por %p1880_p13, %p57_p11  ;;  %p188_p0 = scmp.eq.s32.totalorder %s1882_s7, 1 }
  0x94   : > { %p42_p2 = scmp.eq.s32.totalorder %s41_s3, 0  ;;  %p194_p4 = scmp.eq.s32.totalorder %s920_s8, 1 }
  0x95   : > { %p1638_p7 = por %p188_p0, %p51_p1  ;;  %p1027_p9 = scmp.lt.s32.totalorder %s1381_s26, 2 }
  0x96   : > { %s1644_s9 = scalar_select %p42_p2, %s1369_s23, %s44_s12  }
  0x97   : > { %s1883_s27 = scalar_select %p1638_p7, 1, 0 }
  0x98   : > { %p1646_p5 = por %p194_p4, %p57_p11  ;;  %s277_s15 = sand.u32 1, %s1369_s23  }
  0x99   : > { %s928_s16 = sshll.u32 %s277_s15, 5  ;;  %s957_s17 = sshll.u32 %s1377_s25, 9 }
  0x9a   : > { %s1884_s13 = scalar_select %p1646_p5, 1, 0 }
  0x9b   : > { %s1655_s20 = scalar_lea.hbm %s1859_s0, %s957_s17  ;;  %s281_s8 = scalar_lea.vmem [#allocation2], %s928_s16 }
  0x9c   : > { %s288_s3 = sshll.u32 %s281_s8, 4  ;;  %p1661_p10 = pnand %p1027_p9, %p1624_p12  ;;  %s1657_s3 = int_to_ptr.vmem [resolvable:$true] %s288_s3 }
  0x9d   : > { %s1665_s7 = scalar_lea.sflag [#allocation3], %s277_s15  ;;  %s1257_s19 = scalar_lea.hbm %s1655_s20, 512 }
  0x9e   : > { %p1258_p8 = scmp.ne.s32.totalorder %s1655_s20, %s1257_s19  ;;  %p1259_p1 = pneg %p1661_p10 }
  0x9f   : > { %s1262_s1 = scalar_lea.hbm %s1859_s0, 1024  ;;  %p1263_p12 = scmp.lt.u32.totalorder %s1655_s20, %s1859_s0 }
  0xa0   : > { %p1260_p3 = pnand %p1259_p1, %p1258_p8  ;;  %p1264_p13 = scmp.lt.u32.totalorder %s1262_s1, %s1257_s19 }
  0xa1   : > { %p1266_p2 = scmp.lt.u32.totalorder %s1257_s19, %s1655_s20 }
  0xa2   : > { %p1261_p11 = pneg %p1260_p3  ;;  %p1265_p0 = por %p1264_p13, %p1263_p12 }
  0xa4   : > { %p1267_p4 = por %p1266_p2, %p1265_p0 }
  0xa6   : > { %p1268_p9 = pnand %p1267_p4, %p1261_p11 }
  0xa8   : > { %1271 = shalt.err (!%p1268_p9)
}
  0xa9   : > { %s1272_s15 = scalar_lea.vmem %s1657_s3, 512  ;;  %s1392_s16 = smov [#allocation2]  }
  0xaa   : > { %p1273_p8 = scmp.ne.s32.totalorder %s1657_s3, %s1272_s15  ;;  %s1277_s17 = sshll.u32 %s1392_s16, 4  ;;  %s1278_s17 = int_to_ptr.vmem [resolvable:$false] %s1277_s17 }
  0xab   : > { %s1279_s11 = scalar_lea.vmem %s1278_s17, 1024  ;;  %p1280_p7 = scmp.lt.s32.totalorder %s1657_s3, %s1278_s17 }
  0xac   : > { %p1275_p3 = pnand %p1273_p8, %p1259_p1  ;;  %p1281_p12 = scmp.lt.s32.totalorder %s1279_s11, %s1272_s15 }
  0xae   : > { %p1276_p5 = pneg %p1275_p3  ;;  %p1282_p13 = por %p1281_p12, %p1280_p7 }
  0xb0   : > { %p1283_p0 = pnand %p1282_p13, %p1276_p5 }
  0xb2   : > { %1286 = shalt.err (!%p1283_p0)
}
  0xb3   : > { %1017 = dma.hbm_to_vmem [thread:$0]  (!%p1661_p10), %s1655_s20, 512, %s1657_s3, %s1665_s7, %s1388_s10, %s1388_s10, %s1389_s30  }
  0xb4   : > { %p1886_p1 = scmp.ne.s32.totalorder %s1874_s29, 0 }
  0xb5   : > { %s1699_s19 = sand.u32 (!%p1886_p1), 1, %s1365_s22  }
  0xb6   : > { %300 = sbr.rel (%p1886_p1) target bundleno = 983 (0x3d7), region = 44  ;;  %s932_s1 = sshll.u32 (!%p1886_p1), %s1699_s19, 5 }
  0xb7   : > { %s303_s8 = scalar_lea.sflag (!%p1886_p1), [#allocation3], %s1699_s19  ;;  %s306_s15 = scalar_lea.vmem (!%p1886_p1), [#allocation2], %s932_s1 }
  0xbd   : > { %1340 = dma.done.wait (%p1630_p6), %s303_s8, 512  }
  0xbe   : > { %1342 = vsyncadd (%p1630_p6), %s303_s8, 4294966784  ;;  %p1887_p7 = scmp.ne.s32.totalorder %s1873_s28, 0 }
  0xc0   : > { %1344 = dma.done.wait (%p1887_p7), [#allocation6], 640  }
  0xc1   : > { %1346 = vsyncadd (%p1887_p7), [#allocation6], 4294966656 }
  0xc2   : > { %1348 = dma.done.wait (%p1887_p7), [#allocation9], 288  }
  0xc3   : > { %1350 = vsyncadd (%p1887_p7), [#allocation9], 4294967008 }
  0xc4   : > { %1352 = dma.done.wait (%p1887_p7), [#allocation12], 256  }
  0xc5   : > { %1354 = vsyncadd (%p1887_p7), [#allocation12], 4294967040  ;;  %v1104_v0 = vld [vmem:[%s306_s15 + $0x10] ss:$8 sps:$4 sm:$0xff]   ;;  %v1106_v1 = vld [vmem:[%s306_s15] ss:$8 sps:$4 sm:$0xff]   ;;  %v627_v58 = vlaneseq }
  0xc6   : > { %s1393_s29 = smov 127   ;;  %v1108_v2 = vld [vmem:[%s306_s15 + $0x14] ss:$8 sps:$4 sm:$0xff]   ;;  %v1109_v3 = vld [vmem:[%s306_s15 + $0x4] ss:$8 sps:$4 sm:$0xff]   ;;  %s1394_s10 = smov 126  }
  0xc7   : > { %385 = vrot.lane.b32.xlu1 %v1104_v0, %s1393_s29  ;;  %381 = vrot.lane.b32.xlu0 %v1106_v1, %s1393_s29  ;;  %s1395_s28 = smov 116   ;;  %s1396_s30 = smov 115   ;;  %v1112_v4 = vld [vmem:[#allocation5 + $0x4] ss:$12 sps:$4 sm:$0xff]   ;;  %v1400_v5 = vmov 0   ;;  %v505_v7 = vld [vmem:[#allocation7] sm:$0xff] }
  0xc8   : > { %536 = vmatprep.subr.bf16.mxu0 %v1109_v3  ;;  %s1397_s14 = smov 114   ;;  %s1398_s20 = smov 104   ;;  %568 = vmatprep.mubr.bf16.mxu0 %v1112_v4  ;;  %v506_v6 = vld [vmem:[#allocation7 + $0x8] sm:$0xff]  ;;  %vm389_vm0 = vcmask 1039360   ;;  %vm404_vm1 = vcmask 1031168   ;;  %vm419_vm2 = vcmask 949248  }
  0xc9   : > { %537 = vmatpush1.bf16.msra.mxu0 %v1106_v1  ;;  %s1399_s3 = smov 103   ;;  %611 = vmatprep.mubr.bf16.mxu1 %v1400_v5  ;;  %s1401_s12 = smov 102   ;;  %vm434_vm3 = vcmask 941056   ;;  %vm449_vm4 = vcmask 932864   ;;  %vm464_vm5 = vcmask 850944   ;;  %vm479_vm6 = vcmask 842752  }
  0xca   : > { %538 = vmatprep.subr.bf16.mxu0 %v1108_v2  ;;  %1103 = vset.pattern.permute.xlu1 %v1400_v5  ;;  %vm494_vm7 = vcmask 834560   ;;  %v1110_v53 = vld [vmem:[#allocation5] ss:$12 sps:$4 sm:$0xff]   ;;  %v1113_v57 = vld [vmem:[#allocation5 + $0x8] ss:$12 sps:$4 sm:$0xff]   ;;  %vm532_vm8 = vcmask 261120  }
  0xcb   : > { %387 = vrot.lane.b32.xlu1 %v1108_v2, %s1393_s29  ;;  %383 = vrot.lane.b32.xlu0 %v1109_v3, %s1393_s29  ;;  %v628_v60 = vshrl.u32 %v627_v58, 7  ;;  %vm716_vm9 = vcmask 130048   ;;  %s938_s7 = sshll.u32 %s1699_s19, 3  ;;  %s960_s11 = sshll.u32 %s1373_s24, 7 }
  0xcc   : > { %1102 = vset.pattern.permute.xlu0 %v1400_v5  ;;  %s354_s16 = scalar_lea.vmem [#allocation13], %s938_s7  ;;  %s1810_s15 = scalar_lea.hbm %s1865_s6, %s960_s11 }
  0xcd   : > { %539 = vmatpush1.bf16.msra.mxu0 %v1104_v0  ;;  %v629_v4 = vsub.s32 0, %v628_v60  ;;  %s788_s17 = sshll.u32 %s354_s16, 4  ;;  %p1888_p5 = scmp.ne.s32.totalorder %s1883_s27, 0  ;;  %s1805_s17 = int_to_ptr.vmem [resolvable:$true] %s788_s17 }
  0xce   : > { %s1402_s24 = smov [#allocation13]  }
  0xcf   : > { %398 = vrot.lane.b32.xlu1 %v1109_v3, %s1394_s10  ;;  %396 = vrot.lane.b32.xlu0 %v1106_v1, %s1394_s10 }
  0xd3   : > { %402 = vrot.lane.b32.xlu1 %v1108_v2, %s1394_s10  ;;  %400 = vrot.lane.b32.xlu0 %v1104_v0, %s1394_s10 }
  0xd7   : > { %413 = vrot.lane.b32.xlu1 %v1109_v3, %s1395_s28  ;;  %411 = vrot.lane.b32.xlu0 %v1106_v1, %s1395_s28 }
  0xdb   : > { %417 = vrot.lane.b32.xlu1 %v1108_v2, %s1395_s28  ;;  %415 = vrot.lane.b32.xlu0 %v1104_v0, %s1395_s28 }
  0xdf   : > { %428 = vrot.lane.b32.xlu1 %v1109_v3, %s1396_s30  ;;  %426 = vrot.lane.b32.xlu0 %v1106_v1, %s1396_s30 }
  0xe3   : > { %432 = vrot.lane.b32.xlu1 %v1108_v2, %s1396_s30  ;;  %430 = vrot.lane.b32.xlu0 %v1104_v0, %s1396_s30 }
  0xe7   : > { %443 = vrot.lane.b32.xlu1 %v1109_v3, %s1397_s14  ;;  %441 = vrot.lane.b32.xlu0 %v1106_v1, %s1397_s14 }
  0xeb   : > { %447 = vrot.lane.b32.xlu1 %v1108_v2, %s1397_s14  ;;  %445 = vrot.lane.b32.xlu0 %v1104_v0, %s1397_s14 }
  0xef   : > { %458 = vrot.lane.b32.xlu1 %v1109_v3, %s1398_s20  ;;  %456 = vrot.lane.b32.xlu0 %v1106_v1, %s1398_s20 }
  0xf3   : > { %462 = vrot.lane.b32.xlu1 %v1108_v2, %s1398_s20  ;;  %460 = vrot.lane.b32.xlu0 %v1104_v0, %s1398_s20 }
  0xf7   : > { %473 = vrot.lane.b32.xlu1 %v1109_v3, %s1399_s3  ;;  %471 = vrot.lane.b32.xlu0 %v1106_v1, %s1399_s3 }
  0xfb   : > { %488 = vrot.lane.b32.xlu1 %v1109_v3, %s1401_s12  ;;  %486 = vrot.lane.b32.xlu0 %v1106_v1, %s1401_s12 }
  0xff   : > { %477 = vrot.lane.b32.xlu1 %v1108_v2, %s1399_s3  ;;  %475 = vrot.lane.b32.xlu0 %v1104_v0, %s1399_s3 }
 0x103   : > { %492 = vrot.lane.b32.xlu1 %v1108_v2, %s1401_s12  ;;  %490 = vrot.lane.b32.xlu0 %v1104_v0, %s1401_s12 }
 0x107   : > { %514 = vperm.xlu1 %1103, %v506_v6   ;;  %509 = vperm.xlu0 %1102, %v505_v7   ;;  %v360_v6 = vld [vmem:[#allocation8] sm:$0x3] }
 0x139   : > { %v386_v8 = vpop.permute.xlu1 %385  ;;  %v382_v9 = vpop.permute.xlu0 %381 }
 0x13d   : > { %v388_v10 = vpop.permute.xlu1 %387  ;;  %v384_v11 = vpop.permute.xlu0 %383 }
 0x13e   : > { %540 = vmatprep.subr.bf16.mxu0 %v384_v11  ;;  %v390_v12 = vsel %vm389_vm0, %v382_v9, %v384_v11  ;;  %v391_v15 = vsel %vm389_vm0, %v386_v8, %v388_v10  ;;  %v633_v8 = vsub.s32 1, %v628_v60 }
 0x13f   : > { %541 = vmatpush1.bf16.msra.mxu0 %v390_v12 }
 0x140   : > { %542 = vmatprep.subr.bf16.mxu0 %v388_v10 }
 0x141   : > { %v399_v13 = vpop.permute.xlu1 %398  ;;  %v397_v14 = vpop.permute.xlu0 %396 }
 0x142   : > { %v405_v18 = vsel %vm404_vm1, %v397_v14, %v399_v13 }
 0x143   : > { %543 = vmatpush1.bf16.msra.mxu0 %v391_v15 }
 0x144   : > { %544 = vmatprep.subr.bf16.mxu0 %v399_v13 }
 0x145   : > { %v403_v16 = vpop.permute.xlu1 %402  ;;  %v401_v17 = vpop.permute.xlu0 %400 }
 0x146   : > { %v406_v21 = vsel %vm404_vm1, %v401_v17, %v403_v16 }
 0x147   : > { %545 = vmatpush1.bf16.msra.mxu0 %v405_v18 }
 0x148   : > { %546 = vmatprep.subr.bf16.mxu0 %v403_v16  ;;  %v630_v16 = vrot.slane %v360_v6, %v629_v4 }
 0x149   : > { %v414_v19 = vpop.permute.xlu1 %413  ;;  %v412_v20 = vpop.permute.xlu0 %411 }
 0x14a   : > { %v420_v24 = vsel %vm419_vm2, %v412_v20, %v414_v19  ;;  %v634_v20 = vrot.slane %v360_v6, %v633_v8 }
 0x14b   : > { %547 = vmatpush1.bf16.msra.mxu0 %v406_v21 }
 0x14c   : > { %548 = vmatprep.subr.bf16.mxu0 %v414_v19 }
 0x14d   : > { %v418_v22 = vpop.permute.xlu1 %417  ;;  %v416_v23 = vpop.permute.xlu0 %415 }
 0x14e   : > { %v421_v27 = vsel %vm419_vm2, %v416_v23, %v418_v22 }
 0x14f   : > { %549 = vmatpush1.bf16.msra.mxu0 %v420_v24 }
 0x150   : > { %550 = vmatprep.subr.bf16.mxu0 %v418_v22 }
 0x151   : > { %v429_v25 = vpop.permute.xlu1 %428  ;;  %v427_v26 = vpop.permute.xlu0 %426 }
 0x152   : > { %v435_v30 = vsel %vm434_vm3, %v427_v26, %v429_v25 }
 0x153   : > { %551 = vmatpush1.bf16.msra.mxu0 %v421_v27 }
 0x154   : > { %552 = vmatprep.subr.bf16.mxu0 %v429_v25 }
 0x155   : > { %v433_v28 = vpop.permute.xlu1 %432  ;;  %v431_v29 = vpop.permute.xlu0 %430 }
 0x156   : > { %v436_v33 = vsel %vm434_vm3, %v431_v29, %v433_v28 }
 0x157   : > { %553 = vmatpush1.bf16.msra.mxu0 %v435_v30  ;;  %v1114_v30 = vld [vmem:[#allocation10 + $0x4] ss:$8 sps:$4 sm:$0xff]  }
 0x158   : > { %554 = vmatprep.subr.bf16.mxu0 %v433_v28 }
 0x159   : > { %v444_v31 = vpop.permute.xlu1 %443  ;;  %v442_v32 = vpop.permute.xlu0 %441 }
 0x15a   : > { %v450_v36 = vsel %vm449_vm4, %v442_v32, %v444_v31  ;;  %v696_v32 = vld [vmem:[#allocation11 + $0x8] sm:$0xff] }
 0x15b   : > { %555 = vmatpush1.bf16.msra.mxu0 %v436_v33 }
 0x15c   : > { %556 = vmatprep.subr.bf16.mxu0 %v444_v31  ;;  %v695_v31 = vld [vmem:[#allocation11] sm:$0xff] }
 0x15d   : > { %v448_v34 = vpop.permute.xlu1 %447  ;;  %v446_v35 = vpop.permute.xlu0 %445 }
 0x15e   : > { %v451_v39 = vsel %vm449_vm4, %v446_v35, %v448_v34 }
 0x15f   : > { %557 = vmatpush1.bf16.msra.mxu0 %v450_v36 }
 0x160   : > { %558 = vmatprep.subr.bf16.mxu0 %v448_v34 }
 0x161   : > { %v459_v37 = vpop.permute.xlu1 %458  ;;  %v457_v38 = vpop.permute.xlu0 %456 }
 0x162   : > { %v465_v42 = vsel %vm464_vm5, %v457_v38, %v459_v37 }
 0x163   : > { %559 = vmatpush1.bf16.msra.mxu0 %v451_v39 }
 0x164   : > { %560 = vmatprep.subr.bf16.mxu0 %v459_v37 }
 0x165   : > { %v463_v40 = vpop.permute.xlu1 %462  ;;  %v461_v41 = vpop.permute.xlu0 %460 }
 0x166   : > { %v466_v45 = vsel %vm464_vm5, %v461_v41, %v463_v40 }
 0x167   : > { %561 = vmatpush1.bf16.msra.mxu0 %v465_v42 }
 0x168   : > { %562 = vmatprep.subr.bf16.mxu0 %v463_v40 }
 0x169   : > { %v474_v43 = vpop.permute.xlu1 %473  ;;  %v472_v44 = vpop.permute.xlu0 %471 }
 0x16a   : > { %v480_v48 = vsel %vm479_vm6, %v472_v44, %v474_v43 }
 0x16b   : > { %563 = vmatpush1.bf16.msra.mxu0 %v466_v45 }
 0x16c   : > { %564 = vmatprep.subr.bf16.mxu0 %v474_v43 }
 0x16d   : > { %v489_v46 = vpop.permute.xlu1 %488  ;;  %v487_v47 = vpop.permute.xlu0 %486 }
 0x16e   : > { %579 = vmatprep.subr.bf16.mxu1 %v489_v46  ;;  %v495_v49 = vsel %vm494_vm7, %v487_v47, %v489_v46 }
 0x16f   : > { %565 = vmatpush1.bf16.msra.mxu0 %v480_v48  ;;  %580 = vmatpush1.bf16.msra.mxu1 %v495_v49 }
 0x171   : > { %v478_v50 = vpop.permute.xlu1 %477  ;;  %v476_v51 = vpop.permute.xlu0 %475 }
 0x172   : > { %566 = vmatprep.subr.bf16.mxu0 %v478_v50  ;;  %v481_v52 = vsel %vm479_vm6, %v476_v51, %v478_v50 }
 0x173   : > { %567 = vmatpush1.bf16.msra.mxu0 %v481_v52 }
 0x175   : > { %v493_v54 = vpop.permute.xlu1 %492  ;;  %v491_v55 = vpop.permute.xlu0 %490 }
 0x176   : > { %581 = vmatprep.subr.bf16.mxu1 %v493_v54  ;;  %569 = vmatmul.mubr.bf16.vlgmr.msra.gmra.mrb[0].mxu0 %v1110_v53  ;;  %v496_v56 = vsel %vm494_vm7, %v491_v55, %v493_v54 }
 0x177   : > { %582 = vmatpush1.bf16.msra.mxu1 %v496_v56 }
 0x178   : > { %720 = vmatprep.subr.bf16.mxu1 %v1400_v5 }
 0x17a   : > { %946 = vmatmul.mubr.msk.bf16.vlgmr.msra.gmra.mrb[0].mxu1 %vm532_vm8, %v1113_v57  ;;  %v1116_v57 = vld [vmem:[#allocation10] ss:$8 sps:$4 sm:$0xff]  }
 0x17b   : > { %949 = vmatprep.mubr.msk.bf16.mxu1 %vm716_vm9, %v1114_v30 }
 0x186   : > { %v510_v59 = vpop.permute.xlu0 %509  ;;  %v515_v0 = vpop.permute.xlu1 %514 }
 0x249   : > { %v570_v61 = vpop.f32.mrb[0].mxu0 }
 0x24a   : > { %v572_v62 = vpop.f32.mrb[1].mxu0  ;;  %v571_v63 = vadd.f32 %v570_v61, %v510_v59 }
 0x24b   : > { %v573_v1 = vadd.f32 %v572_v62, %v510_v59  ;;  %v574_v2 = vpop.f32.mrb[2].mxu0 }
 0x24c   : > { %v576_v3 = vpop.f32.mrb[3].mxu0  ;;  %v575_v9 = vadd.f32 %v574_v2, %v515_v0 }
 0x24d   : > { %v613_v7 = vpop.f32.mrb[0].mxu1  ;;  %v577_v12 = vadd.f32 %v576_v3, %v515_v0 }
 0x24e   : > { %v614_v10 = vadd.f32 %v613_v7, %v571_v63  ;;  %v615_v11 = vpop.f32.mrb[1].mxu1 }
 0x24f   : > { %v616_v13 = vadd.f32 %v615_v11, %v573_v1  ;;  %v617_v14 = vpop.f32.mrb[2].mxu1 }
 0x250   : > { %v622_v15 = vmax.f32 %v614_v10, 0.0  ;;  %v618_v17 = vadd.f32 %v617_v14, %v575_v9  ;;  %v619_v18 = vpop.f32.mrb[3].mxu1 }
 0x251   : > { %v623_v19 = vmax.f32 %v616_v13, 0.0  ;;  %v620_v21 = vadd.f32 %v619_v18, %v577_v12 }
 0x252   : > { %v624_v22 = vmax.f32 %v618_v17, 0.0  ;;  %v637_v24 = vmul.f32 %v630_v16, %v622_v15 }
 0x253   : > { %v625_v23 = vmax.f32 %v620_v21, 0.0  ;;  %v638_v26 = vmul.f32 %v634_v20, %v623_v19 }
 0x254   : > { %v639_v25 = vmul.f32 %v630_v16, %v624_v22 }
 0x255   : > { %v640_v27 = vmul.f32 %v634_v20, %v625_v23 }
 0x256   : > { %v641_v28 = vpack.c.bf16 %v639_v25, %v637_v24 }
 0x257   : > { %v642_v29 = vpack.c.bf16 %v640_v27, %v638_v26 }
 0x258   : > { %645 = vrot.lane.b32.xlu1 %v641_v28, %s1393_s29  ;;  %721 = vmatpush1.bf16.msra.mxu1 %v641_v28 }
 0x259   : > { %647 = vrot.lane.b32.xlu0 %v642_v29, %s1393_s29  ;;  %722 = vmatprep.subr.bf16.mxu1 %v1400_v5  ;;  %s774_s29 = scalar_lea.sflag [#allocation4], %s1699_s19 }
 0x25c   : > { %651 = vrot.lane.b32.xlu1 %v641_v28, %s1394_s10 }
 0x25d   : > { %653 = vrot.lane.b32.xlu0 %v642_v29, %s1394_s10  ;;  %s1287_s10 = scalar_lea.vmem %s1805_s17, 128 }
 0x25e   : > { %p1288_p6 = scmp.ne.s32.totalorder %s1805_s17, %s1287_s10 }
 0x260   : > { %657 = vrot.lane.b32.xlu1 %v641_v28, %s1395_s28  ;;  %p1289_p10 = pnand %p1288_p6, %p1888_p5 }
 0x261   : > { %659 = vrot.lane.b32.xlu0 %v642_v29, %s1395_s28  ;;  %s1291_s28 = sshll.u32 %s1402_s24, 4  ;;  %s1292_s28 = int_to_ptr.vmem [resolvable:$false] %s1291_s28 }
 0x262   : > { %p1290_p11 = pneg %p1289_p10  ;;  %p1294_p2 = scmp.lt.s32.totalorder %s1805_s17, %s1292_s28 }
 0x264   : > { %663 = vrot.lane.b32.xlu1 %v641_v28, %s1396_s30 }
 0x265   : > { %665 = vrot.lane.b32.xlu0 %v642_v29, %s1396_s30  ;;  %s1293_s30 = scalar_lea.vmem %s1292_s28, 256 }
 0x266   : > { %p1295_p4 = scmp.lt.s32.totalorder %s1293_s30, %s1287_s10 }
 0x268   : > { %669 = vrot.lane.b32.xlu1 %v641_v28, %s1397_s14  ;;  %p1296_p9 = por %p1295_p4, %p1294_p2 }
 0x269   : > { %671 = vrot.lane.b32.xlu0 %v642_v29, %s1397_s14 }
 0x26a   : > { %p1297_p8 = pnand %p1296_p9, %p1290_p11 }
 0x26c   : > { %675 = vrot.lane.b32.xlu1 %v641_v28, %s1398_s20 }
 0x26d   : > { %677 = vrot.lane.b32.xlu0 %v642_v29, %s1398_s20 }
 0x270   : > { %681 = vrot.lane.b32.xlu1 %v641_v28, %s1399_s3 }
 0x271   : > { %683 = vrot.lane.b32.xlu0 %v642_v29, %s1399_s3 }
 0x274   : > { %687 = vrot.lane.b32.xlu1 %v641_v28, %s1401_s12 }
 0x275   : > { %689 = vrot.lane.b32.xlu0 %v642_v29, %s1401_s12 }
 0x278   : > { %699 = vperm.xlu1 %1103, %v695_v31  }
 0x279   : > { %704 = vperm.xlu0 %1102, %v696_v32  }
 0x2ca   : > { %v646_v33 = vpop.permute.xlu1 %645 }
 0x2cb   : > { %v648_v34 = vpop.permute.xlu0 %647 }
 0x2cc   : > { %v649_v35 = vsel %vm389_vm0, %v646_v33, %v648_v34 }
 0x2cd   : > { %723 = vmatpush1.bf16.msra.mxu1 %v649_v35 }
 0x2ce   : > { %v652_v36 = vpop.permute.xlu1 %651  ;;  %724 = vmatprep.subr.bf16.mxu1 %v1400_v5 }
 0x2cf   : > { %v654_v37 = vpop.permute.xlu0 %653 }
 0x2d0   : > { %v655_v38 = vsel %vm404_vm1, %v652_v36, %v654_v37 }
 0x2d1   : > { %725 = vmatpush1.bf16.msra.mxu1 %v655_v38 }
 0x2d2   : > { %v658_v39 = vpop.permute.xlu1 %657  ;;  %726 = vmatprep.subr.bf16.mxu1 %v1400_v5 }
 0x2d3   : > { %v660_v40 = vpop.permute.xlu0 %659 }
 0x2d4   : > { %v661_v41 = vsel %vm419_vm2, %v658_v39, %v660_v40 }
 0x2d5   : > { %727 = vmatpush1.bf16.msra.mxu1 %v661_v41 }
 0x2d6   : > { %v664_v42 = vpop.permute.xlu1 %663  ;;  %728 = vmatprep.subr.bf16.mxu1 %v1400_v5 }
 0x2d7   : > { %v666_v43 = vpop.permute.xlu0 %665 }
 0x2d8   : > { %v667_v44 = vsel %vm434_vm3, %v664_v42, %v666_v43 }
 0x2d9   : > { %729 = vmatpush1.bf16.msra.mxu1 %v667_v44 }
 0x2da   : > { %v670_v45 = vpop.permute.xlu1 %669  ;;  %730 = vmatprep.subr.bf16.mxu1 %v1400_v5 }
 0x2db   : > { %v672_v46 = vpop.permute.xlu0 %671 }
 0x2dc   : > { %v673_v47 = vsel %vm449_vm4, %v670_v45, %v672_v46 }
 0x2dd   : > { %731 = vmatpush1.bf16.msra.mxu1 %v673_v47 }
 0x2de   : > { %v676_v48 = vpop.permute.xlu1 %675  ;;  %732 = vmatprep.subr.bf16.mxu1 %v1400_v5 }
 0x2df   : > { %v678_v49 = vpop.permute.xlu0 %677 }
 0x2e0   : > { %v679_v50 = vsel %vm464_vm5, %v676_v48, %v678_v49 }
 0x2e1   : > { %733 = vmatpush1.bf16.msra.mxu1 %v679_v50 }
 0x2e2   : > { %v682_v51 = vpop.permute.xlu1 %681  ;;  %734 = vmatprep.subr.bf16.mxu1 %v1400_v5 }
 0x2e3   : > { %v684_v52 = vpop.permute.xlu0 %683 }
 0x2e4   : > { %v685_v53 = vsel %vm479_vm6, %v682_v51, %v684_v52 }
 0x2e5   : > { %735 = vmatpush1.bf16.msra.mxu1 %v685_v53 }
 0x2e6   : > { %v688_v54 = vpop.permute.xlu1 %687  ;;  %736 = vmatprep.subr.bf16.mxu1 %v1400_v5 }
 0x2e7   : > { %v690_v55 = vpop.permute.xlu0 %689 }
 0x2e8   : > { %v691_v56 = vsel %vm494_vm7, %v688_v54, %v690_v55 }
 0x2e9   : > { %737 = vmatpush1.bf16.msra.mxu1 %v691_v56 }
 0x2ec   : > { %753 = vmatmul.mubr.bf16.vlgmr.msra.gmra.mrb[4].mxu1 %v1116_v57 }
 0x2f7   : > { %v700_v58 = vpop.permute.xlu1 %699 }
 0x2f8   : > { %v705_v62 = vpop.permute.xlu0 %704 }
 0x3bf   : > { %v754_v59 = vpop.f32.mrb[4].mxu1 }
 0x3c0   : > { %v755_v60 = vadd.f32 %v754_v59, %v700_v58  ;;  %v756_v61 = vpop.f32.mrb[5].mxu1 }
 0x3c1   : > { %v757_v63 = vpop.f32.mrb[6].mxu1 }
 0x3c2   : > { %v758_v0 = vadd.f32 %v757_v63, %v705_v62  ;;  %v759_v5 = vpop.f32.mrb[7].mxu1  ;;  %v761_v1 = vmax.f32 %v755_v60, 0.0 }
 0x3c4   : > { %v762_v2 = vmax.f32 %v758_v0, 0.0 }
 0x3c6   : > { %v964_v3 = vpack.c.bf16 %v762_v2, %v761_v1 }
 0x3c8   : > { %965 = vst [vmem:[%s354_s16] sm:$0xff] %v964_v3  }
 0x3c9   : > { %1300 = shalt.err (!%p1297_p8)
}
 0x3ca   : > { %s1301_s14 = scalar_lea.hbm %s1810_s15, 128  ;;  %s1305_s12 = scalar_lea.hbm %s1865_s6, 256 }
 0x3cb   : > { %p1302_p3 = scmp.ne.s32.totalorder %s1810_s15, %s1301_s14  ;;  %p1306_p0 = scmp.lt.u32.totalorder %s1810_s15, %s1865_s6 }
 0x3cc   : > { %p1307_p1 = scmp.lt.u32.totalorder %s1305_s12, %s1301_s14  ;;  %p1309_p6 = scmp.lt.u32.totalorder %s1301_s14, %s1810_s15 }
 0x3cd   : > { %p1303_p12 = pnand %p1302_p3, %p1888_p5 }
 0x3ce   : > { %p1308_p7 = por %p1307_p1, %p1306_p0 }
 0x3cf   : > { %p1304_p13 = pneg %p1303_p12 }
 0x3d0   : > { %p1310_p10 = por %p1309_p6, %p1308_p7 }
 0x3d2   : > { %p1311_p11 = pnand %p1310_p10, %p1304_p13 }
 0x3d4   : > { %1314 = shalt.err (!%p1311_p11)
}
 0x3d5   : > { %s1403_s11 = smov 64   ;;  %s1404_s1 = smov 4  }
 0x3d6   : > { %996 = dma.vmem_to_hbm [thread:$0]  (%p1888_p5), %s1805_s17, 128, %s1810_s15, %s774_s29, %s1403_s11, %s1403_s11, %s1404_s1  }
 0x3d7 PF: > { %s803_s8 = sand.u32 1, %s1361_s21   ;;  %p1889_p2 = scmp.ne.s32.totalorder %s1884_s13, 0 }
 0x3d8   : > { %p1890_p4 = scmp.ge.s32.totalorder %s1381_s26, 2  ;;  %s804_s10 = scalar_lea.sflag [#allocation4], %s803_s8 }
 0x3da   : > { %p1019_p9 = pnand %p1890_p4, %p1889_p2 }
 0x3dc   : > { %1356 = dma.done.wait (!%p1019_p9), %s804_s10, 128  }
 0x3dd   : > { %1358 = vsyncadd (!%p1019_p9), %s804_s10, 4294967168  ;;  %s25_s26 = sadd.s32 1, %s1381_s26   ;;  %s1891_s21 = smov %s1365_s22 }
 0x3de   : > { %p22_p8 = scmp.ge.s32.totalorder %s25_s26, 4   ;;  %s1892_s22 = smov %s1369_s23 }
 0x3df   : > { %s1893_s23 = smov %s1644_s9  ;;  %s1894_s24 = smov %s1377_s25 }
 0x3e0   : > { %s1895_s25 = smov %s1897_s18  ;;  %24 = sbr.rel (!%p22_p8) target bundleno = 12 (0xc), region = 109 }
 0x3e7   :  { %809 = vsyncpa [#allocation3], 1 }
 0x3e8   :  { %811 = vsyncpa [#allocation3 + $0x1], 1 }
 0x3e9   :  { %812 = vsyncpa [#allocation6], 1 }
 0x3ea   :  { %813 = vsyncpa [#allocation9], 1 }
 0x3eb   :  { %814 = vsyncpa [#allocation12], 1 }
 0x3ec   :  { %815 = vsyncpa [#allocation4], 1 }
 0x3ed   :  { %817 = vsyncpa [#allocation4 + $0x1], 1 }

// kernel: channel_attn_unet_forward.17
= control target key start
LH: loop header
LB: loop body
LE: loop exit
PB: predicated region body
PF: predicated region fallthrough
CT: control target
= control target key end

     0   :  { %s420_s0 = inlined_call_operand.hbm [shape: bf16[2,8,256], index: 0, kind: input, shape index: {}]   ;;  %s421_s1 = inlined_call_operand.hbm [shape: bf16[1,8], index: 1, kind: input, shape index: {}]   ;;  %s422_s2 = inlined_call_operand.<no memory space> [shape: f32[1,1], index: 2, kind: input, shape index: {}]   ;;  %s423_s3 = inlined_call_operand.hbm [shape: f32[2,1,256], index: 3, kind: output, shape index: {}]  }
   0x1   :  { %v8_v0 = vstv %s422_s2 }
   0x2   :  { %9 = vst [vmem:[#allocation2] sm:$0x1] %v8_v0 }
   0x3   :  { %10 = vsyncpa [#allocation4], 0 }
   0x4   :  { %11 = vsyncpa [#allocation7], 0 }
   0x5   :  { %12 = vsyncpa [#allocation5], 0  ;;  %s352_s14 = smov [#allocation3]   ;;  %s280_s18 = scalar_lea.hbm %s420_s0, 256 }
   0x6   :  { %s18_s15 = sshll.u32 %s352_s14, 4  ;;  %p281_p0 = scmp.ne.s32.totalorder %s420_s0, %s280_s18  ;;  %s19_s15 = int_to_ptr.vmem [resolvable:$true] %s18_s15 }
   0x7   :  { %p284_p1 = scmp.lt.u32.totalorder %s280_s18, %s420_s0 }
   0x9   :  { %p286_p2 = pnand %p284_p1, %p281_p0 }
   0xb   :  { %289 = shalt.err (!%p286_p2)
}
   0xc   :  { %s290_s2 = scalar_lea.vmem %s19_s15, 256  ;;  %p295_p4 = scmp.lt.s32.totalorder %s19_s15, %s19_s15 }
   0xd   :  { %p291_p3 = scmp.ne.s32.totalorder %s19_s15, %s290_s2  ;;  %p296_p5 = scmp.lt.s32.totalorder %s290_s2, %s290_s2 }
   0xf   :  { %p297_p6 = por %p296_p5, %p295_p4 }
  0x11   :  { %p298_p7 = pnand %p297_p6, %p291_p3 }
  0x13   :  { %301 = shalt.err (!%p298_p7)
}
  0x14   :  { %s353_s23 = smov 128   ;;  %s354_s24 = smov 8  }
  0x15   :  { %24 = dma.hbm_to_vmem [thread:$0]  %s420_s0, 256, %s19_s15, [#allocation4], %s353_s23, %s353_s23, %s354_s24  }
  0x16   :  { %s355_s27 = smov [#allocation6]   ;;  %s302_s4 = scalar_lea.hbm %s421_s1, 16 }
  0x17   :  { %s31_s28 = sshll.u32 %s355_s27, 4  ;;  %p303_p8 = scmp.ne.s32.totalorder %s421_s1, %s302_s4  ;;  %s32_s28 = int_to_ptr.vmem [resolvable:$true] %s31_s28 }
  0x18   :  { %p306_p9 = scmp.lt.u32.totalorder %s302_s4, %s421_s1 }
  0x1a   :  { %p308_p10 = pnand %p306_p9, %p303_p8 }
  0x1c   :  { %311 = shalt.err (!%p308_p10)
}
  0x1d   :  { %s312_s9 = scalar_lea.vmem %s32_s28, 16  ;;  %s316_s0 = scalar_lea.vmem %s32_s28, 32 }
  0x1e   :  { %p313_p11 = scmp.ne.s32.totalorder %s32_s28, %s312_s9  ;;  %p317_p12 = scmp.lt.s32.totalorder %s32_s28, %s32_s28 }
  0x1f   :  { %p318_p13 = scmp.lt.s32.totalorder %s316_s0, %s312_s9 }
  0x21   :  { %p319_p0 = por %p318_p13, %p317_p12 }
  0x23   :  { %p320_p1 = pnand %p319_p0, %p313_p11 }
  0x25   :  { %323 = shalt.err (!%p320_p1)
}
  0x26   :  { %34 = dma.hbm_to_vmem [thread:$0]  %s421_s1, 16, %s32_s28, [#allocation7]  }
  0x27   :  { %346 = dma.done.wait [#allocation4], 256  }
  0x28   :  { %347 = vsyncadd [#allocation4], 4294967040 }
  0x29   :  { %348 = dma.done.wait [#allocation7], 16  }
  0x2a   :  { %349 = vsyncadd [#allocation7], 4294967280  ;;  %v356_v1 = vmov 0   ;;  %v45_v2 = vld [vmem:[#allocation3] sm:$0xff]  ;;  %vm65_vm0 = vcmask 1043456   ;;  %v142_v3 = vld [vmem:[#allocation3 + $0x8] sm:$0xff]  ;;  %v52_v14 = vlaneseq }
  0x2b   :  { %104 = vmatprep.mubr.bf16.mxu0 %v356_v1  ;;  %199 = vmatprep.mubr.bf16.mxu1 %v356_v1  ;;  %v251_v4 = vcombine.high %v45_v2, %v45_v2  ;;  %v255_v5 = vcombine.high %v142_v3, %v142_v3  ;;  %v250_v6 = vcombine.low %v45_v2, %v45_v2  ;;  %v46_v8 = vld [vmem:[#allocation2] sm:$0x1]  ;;  %v44_v12 = vld [vmem:[#allocation6] sm:$0x1]  ;;  %vm61_vm1 = vcmask 64512   ;;  %s358_s1 = smov [#allocation8]  }
  0x2c   :  { %267 = vset.pattern.permute.xlu0 %v356_v1  ;;  %v254_v7 = vcombine.low %v142_v3, %v142_v3  ;;  %v143_v11 = vld [vmem:[#allocation2] sm:$0x1]  ;;  %v140_v13 = vld [vmem:[#allocation6] sm:$0x1]  ;;  %v53_v16 = vshrl.u32 %v52_v14, 7  ;;  %s237_s12 = sshll.u32 %s358_s1, 4  ;;  %s238_s12 = int_to_ptr.vmem [resolvable:$true] %s237_s12 }
  0x2d   :  { %49 = vperm.xlu0 %267, %v46_v8   ;;  %252 = vmatprep.subr.msk.bf16.mxu0 %vm65_vm0, %v251_v4  ;;  %v67_v9 = vsel %vm65_vm0, %v250_v6, 0  ;;  %v357_v33 = vmov 1966171168   ;;  %vm137_vm2 = vcmp.lt.s32.totalorder %v52_v14, 256  ;;  %s324_s13 = scalar_lea.vmem %s238_s12, 64  ;;  %p329_p3 = scmp.lt.s32.totalorder %s238_s12, %s238_s12 }
  0x2e   :  { %256 = vmatprep.subr.msk.bf16.mxu1 %vm65_vm0, %v255_v5  ;;  %v162_v10 = vsel %vm65_vm0, %v254_v7, 0  ;;  %73 = vmatpush1.bf16.msra.mxu0 %v67_v9  ;;  %v54_v17 = vsub.s32 0, %v53_v16  ;;  %v121_v34 = vunpack.c.l.s4 %v357_v33  ;;  %p325_p2 = scmp.ne.s32.totalorder %s238_s12, %s324_s13  ;;  %p330_p4 = scmp.lt.s32.totalorder %s324_s13, %s324_s13 }
  0x2f   :  { %168 = vmatpush1.bf16.msra.mxu1 %v162_v10 }
  0x30   :  { %v122_v35 = vunpack.c.0.s8 %v121_v34  ;;  %p331_p5 = por %p330_p4, %p329_p3 }
  0x31   :  { %146 = vperm.xlu0 %267, %v143_v11   ;;  %253 = vmatmul.mubr.msk.bf16.vlgmr.msra.gmra.mrb[0].mxu0 %vm61_vm1, %v44_v12 }
  0x32   :  { %257 = vmatmul.mubr.msk.bf16.vlgmr.msra.gmra.mrb[0].mxu1 %vm61_vm1, %v140_v13  ;;  %v125_v42 = vsub.s32 %v122_v35, %v53_v16  ;;  %p332_p6 = pnand %p331_p5, %p325_p2 }
  0xac   :  { %v50_v15 = vpop.permute.xlu0 %49 }
  0xad   :  { %v55_v19 = vrot.slane %v50_v15, %v54_v17 }
  0xb0   :  { %v147_v18 = vpop.permute.xlu0 %146 }
  0xb1   :  { %v152_v20 = vrot.slane %v147_v18, %v54_v17 }
 0x104   :  { %v106_v21 = vpop.f32.mrb[0].mxu0 }
 0x105   :  { %v201_v22 = vpop.f32.mrb[0].mxu1  ;;  %v107_v23 = vadd.f32 %v106_v21, %v55_v19  ;;  %v108_v25 = vpop.f32.mrb[1].mxu0 }
 0x106   :  { %v202_v24 = vadd.f32 %v201_v22, %v152_v20  ;;  %v203_v26 = vpop.f32.mrb[1].mxu1  ;;  %v109_v27 = vadd.f32 %v108_v25, %v55_v19  ;;  %v110_v29 = vpop.f32.mrb[2].mxu0 }
 0x107   :  { %v204_v28 = vadd.f32 %v203_v26, %v152_v20  ;;  %v205_v30 = vpop.f32.mrb[2].mxu1  ;;  %272 = vtanh.f32 %v107_v23  ;;  %v111_v31 = vpop.f32.mrb[3].mxu0 }
 0x108   :  { %v206_v32 = vpop.f32.mrb[3].mxu1  ;;  %274 = vtanh.f32 %v202_v24 }
 0x109   :  { %276 = vtanh.f32 %v109_v27 }
 0x10a   :  { %278 = vtanh.f32 %v204_v28 }
 0x111   :  { %v273_v36 = vpop.eup %272 }
 0x112   :  { %v275_v37 = vpop.eup %274  ;;  %v115_v38 = vmul.f32 5.0, %v273_v36 }
 0x113   :  { %v277_v39 = vpop.eup %276  ;;  %v210_v40 = vmul.f32 5.0, %v275_v37 }
 0x114   :  { %v279_v41 = vpop.eup %278  ;;  %v116_v43 = vmul.f32 5.0, %v277_v39 }
 0x115   :  { %v211_v44 = vmul.f32 5.0, %v279_v41 }
 0x116   :  { %v119_v45 = vcombine.low %v115_v38, %v116_v43 }
 0x117   :  { %v214_v46 = vcombine.low %v210_v40, %v211_v44 }
 0x118   :  { %v126_v47 = vrot.slane %v119_v45, %v125_v42 }
 0x119   :  { %v221_v48 = vrot.slane %v214_v46, %v125_v42 }
 0x11a   :  { %v133_v49 = vrot.slane %v126_v47, %v125_v42 }
 0x11b   :  { %v228_v50 = vrot.slane %v221_v48, %v125_v42 }
 0x11c   :  { %139 = vst.msk [vmem:[#allocation8] sm:$0x3] %vm137_vm2, %v133_v49 }
 0x11d   :  { %231 = vst.msk [vmem:[#allocation8 + $0x2] sm:$0x3] %vm137_vm2, %v228_v50 }
 0x11e   :  { %335 = shalt.err (!%p332_p6)
}
 0x11f   :  { %s336_s16 = scalar_lea.hbm %s423_s3, 64 }
 0x120   :  { %p337_p7 = scmp.ne.s32.totalorder %s423_s3, %s336_s16  ;;  %p340_p8 = scmp.lt.u32.totalorder %s336_s16, %s423_s3 }
 0x122   :  { %p342_p9 = pnand %p340_p8, %p337_p7 }
 0x124   :  { %345 = shalt.err (!%p342_p9)
}
 0x125   :  { %s359_s21 = smov 32   ;;  %s360_s22 = smov 2  }
 0x126   :  { %243 = dma.vmem_to_hbm [thread:$0]  %s238_s12, 64, %s423_s3, [#allocation5], %s359_s21, %s359_s21, %s360_s22  }
 0x127   :  { %350 = dma.done.wait [#allocation5], 64  }
 0x128   :  { %351 = vsyncadd [#allocation5], 4294967232 }
 0x129   :  { %247 = vsyncpa [#allocation4], 1 }
 0x12a   :  { %248 = vsyncpa [#allocation7], 1 }
 0x12b   :  { %249 = vsyncpa [#allocation5], 1 }

</bundles_post_ra>
